<compile_context>
chip_gen: v7x
topology: tpu7x:2x2x1
jax: 0.10.0
libtpu: 0.0.40
codegen_flags: <defaults>
</compile_context>

<pallas_src>
import functools
import math

import jax
import jax.numpy as jnp
from jax.experimental import pallas as pl
from jax.experimental.pallas import tpu as pltpu

LANE = 128


def _round_up(x, m):
    return (x + m - 1) // m * m


def _pad2(a, rows, cols):
    return jnp.pad(a, ((0, rows - a.shape[0]), (0, cols - a.shape[1])))


def _vmem_capacity_bytes():
    try:
        info = pltpu.get_tpu_info()
        cap = getattr(info, "vmem_capacity_bytes", None)
        if cap:
            return int(cap)
    except Exception:
        pass
    return 64 << 20  # conservative fallback: v7x per-TensorCore VMEM


# ---------------------------------------------------------------------------
# Kernel 1: P = (X @ W) * d^-1/2   (row-tiled dense matmul + column-side scale)
# ---------------------------------------------------------------------------
def xw_scale_kernel(x_ref, w_ref, dinv_ref, p_ref):
    p = jnp.dot(x_ref[...], w_ref[...], preferred_element_type=jnp.float32)
    p_ref[...] = (p * dinv_ref[...]).astype(p_ref.dtype)


# ---------------------------------------------------------------------------
# Kernel 2: H = ReLU(d^-1/2 * (A @ P) + b)   (A streamed as int8, P resident)
# ---------------------------------------------------------------------------
def spmm_relu_kernel(a_ref, p_ref, dinv_ref, b_ref, h_ref, acc_ref):
    k = pl.program_id(1)

    @pl.when(k == 0)
    def _():
        acc_ref[...] = jnp.zeros_like(acc_ref)

    # int8 -> f32 -> bf16 widening on the VPU; MXU sees bf16 x bf16.
    a = a_ref[...].astype(jnp.float32).astype(jnp.bfloat16)
    acc_ref[...] += jnp.dot(a, p_ref[...], preferred_element_type=jnp.float32)

    @pl.when(k == pl.num_programs(1) - 1)
    def _():
        h = acc_ref[...] * dinv_ref[...] + b_ref[...]
        h_ref[...] = jnp.maximum(h, 0.0).astype(h_ref.dtype)


# ---------------------------------------------------------------------------
# Kernel 3: second GCN layer with fused fc1/fc2/log_softmax epilogue
# ---------------------------------------------------------------------------
def spmm_head_kernel(a_ref, p_ref, dinv_ref, b2_ref,
                     wf1_ref, bf1_ref, wf2_ref, bf2_ref,
                     out_ref, acc_ref, *, num_classes):
    k = pl.program_id(1)

    @pl.when(k == 0)
    def _():
        acc_ref[...] = jnp.zeros_like(acc_ref)

    a = a_ref[...].astype(jnp.float32).astype(jnp.bfloat16)
    acc_ref[...] += jnp.dot(a, p_ref[...], preferred_element_type=jnp.float32)

    @pl.when(k == pl.num_programs(1) - 1)
    def _():
        # GCNConv2 finalize: bias + ReLU  (f32)
        h2 = jnp.maximum(acc_ref[...] * dinv_ref[...] + b2_ref[...], 0.0)
        # flatten(start_dim=1) is a no-op for 2-D node features
        # fc1 + ReLU (bf16 MXU operands, f32 accumulate)
        h3 = jnp.maximum(
            jnp.dot(h2.astype(jnp.bfloat16), wf1_ref[...],
                    preferred_element_type=jnp.float32) + bf1_ref[...], 0.0)
        # fc2
        logits = (jnp.dot(h3.astype(jnp.bfloat16), wf2_ref[...],
                          preferred_element_type=jnp.float32) + bf2_ref[...])
        # mask padded class lanes so the lane reduction is unmasked & exact
        lane = jax.lax.broadcasted_iota(jnp.int32, logits.shape, 1)
        logits = jnp.where(lane < num_classes, logits, jnp.float32(-1e30))
        # log_softmax over classes (dim=1)
        m = jnp.max(logits, axis=1, keepdims=True)
        shifted = logits - m
        lse = jnp.log(jnp.sum(jnp.exp(shifted), axis=1, keepdims=True))
        out_ref[...] = shifted - lse


# ---------------------------------------------------------------------------
# Graph preprocessing (plain-JAX glue, PyG gcn_norm semantics)
# ---------------------------------------------------------------------------
def build_adjacency_int8(edge_index, num_nodes, num_pad):
    """Single-pass build of the padded int8 un-normalized A (+ self loops)
    plus D^-1/2.  Duplicate edges accumulate (int8: multiplicity must stay
    <= 127, which is always true for simple/near-simple graphs); every node
    gets exactly one self-loop of weight 1 (add_remaining_self_loops)."""
    src, dst = edge_index[0], edge_index[1]
    not_loop = src != dst
    a = jnp.zeros((num_pad, num_pad), jnp.int8)
    a = a.at[dst, src].add(not_loop.astype(jnp.int8))     # message src -> dst
    idx = jnp.arange(num_nodes)
    a = a.at[idx, idx].set(jnp.int8(1))                   # self loops, weight 1
    # degrees straight from the edge list (no N^2 reduction pass)
    deg = jnp.zeros((num_nodes,), jnp.float32).at[dst].add(
        not_loop.astype(jnp.float32)) + 1.0
    d_inv_sqrt = jax.lax.rsqrt(deg)
    d_inv_sqrt = jnp.pad(d_inv_sqrt, (0, num_pad - num_nodes))
    return a, d_inv_sqrt.reshape(num_pad, 1)


# ---------------------------------------------------------------------------
# Forward wrapper
# ---------------------------------------------------------------------------
def gcn_forward(x, edge_index, params, *, tile_m=256):
    n, f_in = x.shape
    n_cls = params["wf2"].shape[1]

    n_pad = _round_up(n, math.lcm(tile_m, 512))
    f_pad = _round_up(f_in, LANE)
    h_pad = _round_up(params["w1"].shape[1], LANE)
    c_pad = _round_up(n_cls, LANE)

    a_p, dinv = build_adjacency_int8(edge_index, n, n_pad)   # int8 / f32
    x_p = _pad2(x, n_pad, f_pad).astype(jnp.bfloat16)

    w1 = _pad2(params["w1"], f_pad, h_pad).astype(jnp.bfloat16)
    w2 = _pad2(params["w2"], h_pad, h_pad).astype(jnp.bfloat16)
    b1 = _pad2(params["b1"].reshape(1, -1), 1, h_pad).astype(jnp.float32)
    b2 = _pad2(params["b2"].reshape(1, -1), 1, h_pad).astype(jnp.float32)
    wf1 = _pad2(params["wf1"], h_pad, h_pad).astype(jnp.bfloat16)
    bf1 = _pad2(params["bf1"].reshape(1, -1), 1, h_pad).astype(jnp.float32)
    wf2 = _pad2(params["wf2"], h_pad, c_pad).astype(jnp.bfloat16)
    bf2 = _pad2(params["bf2"].reshape(1, -1), 1, c_pad).astype(jnp.float32)

    # ---- generation-aware VMEM budget & tile_k choice ------------------------
    vmem_cap = _vmem_capacity_bytes()                     # 128 MiB v5e/v6e, 64 MiB v7x
    budget = min(int(0.75 * vmem_cap), 96 << 20)          # <=48 MiB on v7x, <=96 MiB else

    def spmm_footprint(tk):
        # 2 buffers for every block (Pallas double-buffers constant-index too)
        a_blk = tile_m * tk                               # int8
        p_blk = tk * h_pad * 2                            # bf16
        dinv_blk = tile_m * LANE * 4                      # (tile_m,1) f32, lane-padded
        bias_blk = 8 * h_pad * 4
        head_consts = (h_pad * h_pad + h_pad * c_pad) * 2 + 8 * (h_pad + c_pad) * 4
        out_blk = tile_m * max(h_pad * 2, c_pad * 4)
        acc = tile_m * h_pad * 4
        return 2 * (a_blk + p_blk + dinv_blk + bias_blk + head_consts + out_blk) + acc

    # Prefer full-K row blocks (P fully resident, single fetch, no P re-stream);
    # fall back to 512-wide K tiles + accumulator for very large graphs.
    tile_k = n_pad if 2 * spmm_footprint(n_pad) <= budget else 512
    gm, gk = n_pad // tile_m, n_pad // tile_k

    xw_footprint = 2 * (tile_m * max(f_pad, h_pad) * 2
                        + max(f_pad, h_pad) * h_pad * 2
                        + tile_m * LANE * 4 + tile_m * h_pad * 2)
    vmem_limit = int(min(budget,
                         max(2 * max(spmm_footprint(tile_k), xw_footprint),
                             32 << 20)))

    row_cp = pltpu.CompilerParams(dimension_semantics=("parallel",),
                                  vmem_limit_bytes=vmem_limit)
    spmm_cp = pltpu.CompilerParams(dimension_semantics=("parallel", "arbitrary"),
                                   vmem_limit_bytes=vmem_limit)

    def xw_call(feat, w):
        fdim = feat.shape[1]
        return pl.pallas_call(
            xw_scale_kernel,
            grid=(gm,),
            in_specs=[pl.BlockSpec((tile_m, fdim), lambda i: (i, 0)),
                      pl.BlockSpec((fdim, h_pad), lambda i: (0, 0)),
                      pl.BlockSpec((tile_m, 1), lambda i: (i, 0))],
            out_specs=pl.BlockSpec((tile_m, h_pad), lambda i: (i, 0)),
            out_shape=jax.ShapeDtypeStruct((n_pad, h_pad), jnp.bfloat16),
            compiler_params=row_cp,
        )(feat, w, dinv)

    # ---- layer 1: P1 = (X W1) * D^-1/2 ; H1 = relu(D^-1/2 (A P1) + b1) ------
    p1 = xw_call(x_p, w1)
    h1 = pl.pallas_call(
        spmm_relu_kernel,
        grid=(gm, gk),
        in_specs=[pl.BlockSpec((tile_m, tile_k), lambda i, k: (i, k)),
                  pl.BlockSpec((tile_k, h_pad), lambda i, k: (k, 0)),
                  pl.BlockSpec((tile_m, 1), lambda i, k: (i, 0)),
                  pl.BlockSpec((1, h_pad), lambda i, k: (0, 0))],
        out_specs=pl.BlockSpec((tile_m, h_pad), lambda i, k: (i, 0)),
        out_shape=jax.ShapeDtypeStruct((n_pad, h_pad), jnp.bfloat16),
        scratch_shapes=[pltpu.VMEM((tile_m, h_pad), jnp.float32)],
        compiler_params=spmm_cp,
    )(a_p, p1, dinv, b1)

    # ---- layer 2 + fused fc1/fc2/log_softmax head ----------------------------
    p2 = xw_call(h1, w2)
    out_pad = pl.pallas_call(
        functools.partial(spmm_head_kernel, num_classes=n_cls),
        grid=(gm, gk),
        in_specs=[pl.BlockSpec((tile_m, tile_k), lambda i, k: (i, k)),
                  pl.BlockSpec((tile_k, h_pad), lambda i, k: (k, 0)),
                  pl.BlockSpec((tile_m, 1), lambda i, k: (i, 0)),
                  pl.BlockSpec((1, h_pad), lambda i, k: (0, 0)),
                  pl.BlockSpec((h_pad, h_pad), lambda i, k: (0, 0)),
                  pl.BlockSpec((1, h_pad), lambda i, k: (0, 0)),
                  pl.BlockSpec((h_pad, c_pad), lambda i, k: (0, 0)),
                  pl.BlockSpec((1, c_pad), lambda i, k: (0, 0))],
        out_specs=pl.BlockSpec((tile_m, c_pad), lambda i, k: (i, 0)),
        out_shape=jax.ShapeDtypeStruct((n_pad, c_pad), jnp.float32),
        scratch_shapes=[pltpu.VMEM((tile_m, h_pad), jnp.float32)],
        compiler_params=spmm_cp,
    )(a_p, p2, dinv, b2, wf1, bf1, wf2, bf2)

    # padded node rows / class lanes carry garbage by construction -> slice off
    return out_pad[:n, :n_cls]


def init_params(key, input_dim, hidden_dim, output_dim):
    ks = jax.random.split(key, 8)
    scale = 0.1
    return {
        "w1": scale * jax.random.normal(ks[0], (input_dim, hidden_dim), jnp.float32),
        "b1": scale * jax.random.normal(ks[1], (1, hidden_dim), jnp.float32),
        "w2": scale * jax.random.normal(ks[2], (hidden_dim, hidden_dim), jnp.float32),
        "b2": scale * jax.random.normal(ks[3], (1, hidden_dim), jnp.float32),
        "wf1": scale * jax.random.normal(ks[4], (hidden_dim, hidden_dim), jnp.float32),
        "bf1": scale * jax.random.normal(ks[5], (1, hidden_dim), jnp.float32),
        "wf2": scale * jax.random.normal(ks[6], (hidden_dim, output_dim), jnp.float32),
        "bf2": scale * jax.random.normal(ks[7], (1, output_dim), jnp.float32),
    }


def reference_forward(x, edge_index, params):
    """Plain-JAX reference (same bf16 quantization of the heavy matmul operands)."""
    n = x.shape[0]
    src, dst = edge_index[0], edge_index[1]
    not_loop = (src != dst).astype(jnp.float32)
    a = jnp.zeros((n, n), jnp.float32).at[dst, src].add(not_loop)
    idx = jnp.arange(n)
    a = a.at[idx, idx].set(1.0)
    deg = jnp.sum(a, axis=1)
    dinv = jax.lax.rsqrt(deg)
    adj = dinv[:, None] * a * dinv[None, :]
    q = lambda t: t.astype(jnp.bfloat16).astype(jnp.float32)
    h = jnp.maximum(adj @ (q(x) @ q(params["w1"])) + params["b1"].reshape(1, -1), 0.0)
    h = jnp.maximum(adj @ (q(h) @ q(params["w2"])) + params["b2"].reshape(1, -1), 0.0)
    h = jnp.maximum(h @ params["wf1"] + params["bf1"].reshape(1, -1), 0.0)
    logits = h @ params["wf2"] + params["bf2"].reshape(1, -1)
    return jax.nn.log_softmax(logits, axis=1)


if __name__ == "__main__":
    # Small synthetic Cora-like graph: 300 nodes, 16 input feats, hidden 10, 7 classes.
    num_nodes, input_dim, hidden_dim, output_dim = 300, 16, 10, 7

    key = jax.random.PRNGKey(0)
    k_x, k_e, k_p = jax.random.split(key, 3)

    x = jax.random.normal(k_x, (num_nodes, input_dim), jnp.float32)

    # deterministic random undirected edges (both directions listed, Cora-style)
    num_edges = 600
    src = jax.random.randint(k_e, (num_edges,), 0, num_nodes)
    dst = (src + 1 + jax.random.randint(jax.random.fold_in(k_e, 1),
                                        (num_edges,), 0, num_nodes - 1)) % num_nodes
    edge_index = jnp.stack([jnp.concatenate([src, dst]),
                            jnp.concatenate([dst, src])], axis=0).astype(jnp.int32)

    params = init_params(k_p, input_dim, hidden_dim, output_dim)

    fwd = jax.jit(functools.partial(gcn_forward, params=params))
    out = fwd(x, edge_index)
    jax.block_until_ready(out)

    ref = reference_forward(x, edge_index, params)

    assert out.shape == (num_nodes, output_dim)
    # log_softmax rows exp-sum to 1
    assert jnp.allclose(jnp.sum(jnp.exp(out), axis=1), 1.0, atol=1e-4)
    # matches plain-JAX reference (bf16-quantized heavy matmuls)
    assert jnp.allclose(out, ref, atol=5e-2), float(jnp.max(jnp.abs(out - ref)))

    print("KERNEL_OK")
</pallas_src>

<mosaic_0001>
module attributes {stable_mosaic.version = 11 : i64} {
  func.func private @main(%arg0: i32) attributes {dimension_semantics = [#tpu.dimension_semantics<core_parallel>], iteration_bounds = array<i64: 2>, tpu.core_type = #tpu.core_type<sc_scalar_subcore>, window_params = []} {
    return
  }
}

module attributes {stable_mosaic.version = 11 : i64} {
  func.func private @main(%arg0: i32) attributes {dimension_semantics = [#tpu.dimension_semantics<core_parallel>], iteration_bounds = array<i64: 2>, tpu.core_type = #tpu.core_type<sc_scalar_subcore>, window_params = []} {
    return
  }
}

module attributes {stable_mosaic.version = 11 : i64} {
  func.func @xw_scale_kernel(%arg0: i32, %arg1: memref<256x128xbf16, #tpu.memory_space<vmem>>, %arg2: memref<128x128xbf16, #tpu.memory_space<vmem>>, %arg3: memref<256x1xf32, #tpu.memory_space<vmem>>, %arg4: memref<256x128xbf16, #tpu.memory_space<vmem>>) attributes {dimension_semantics = [#tpu.dimension_semantics<parallel>], iteration_bounds = array<i64: 2>, scalar_prefetch = 0 : i64, scratch_operands = 0 : i64, tpu.core_type = #tpu.core_type<tc>, window_params = [{transform_indices = @transform_0, window_bounds = array<i64: 256, 128>}, {pipeline_mode = #tpu.pipeline_mode<synchronous>, transform_indices = @transform_1, window_bounds = array<i64: 128, 128>}, {transform_indices = @transform_2, window_bounds = array<i64: 256, 1>}, {transform_indices = @transform_3, window_bounds = array<i64: 256, 128>}]} {
    %c0 = arith.constant 0 : index
    %c0_0 = arith.constant 0 : index
    %0 = vector.load %arg1[%c0, %c0_0] : memref<256x128xbf16, #tpu.memory_space<vmem>>, vector<256x128xbf16>
    %c0_1 = arith.constant 0 : index
    %c0_2 = arith.constant 0 : index
    %1 = vector.load %arg2[%c0_1, %c0_2] : memref<128x128xbf16, #tpu.memory_space<vmem>>, vector<128x128xbf16>
    %cst = arith.constant dense<0.000000e+00> : vector<256x128xf32>
    %2 = tpu.matmul %0, %1, %cst {dimension_numbers = #tpu.dot_dimension_numbers<[1], [0], [0], [1], [0, 0, 1, 1], [], []>} : vector<256x128xbf16>, vector<128x128xbf16>, vector<256x128xf32> -> vector<256x128xf32>
    %c0_3 = arith.constant 0 : index
    %c0_4 = arith.constant 0 : index
    %3 = vector.load %arg3[%c0_3, %c0_4] : memref<256x1xf32, #tpu.memory_space<vmem>>, vector<256x1xf32>
    %4 = vector.broadcast %3 : vector<256x1xf32> to vector<256x128xf32>
    %5 = arith.mulf %2, %4 : vector<256x128xf32>
    %6 = arith.truncf %5 : vector<256x128xf32> to vector<256x128xbf16>
    %c0_5 = arith.constant 0 : index
    %c0_6 = arith.constant 0 : index
    %7 = vector.load %arg4[%c0_5, %c0_6] : memref<256x128xbf16, #tpu.memory_space<vmem>>, vector<256x128xbf16>
    tpu.vector_store %arg4[%c0_5, %c0_6], %6 {strides = array<i32>} : memref<256x128xbf16, #tpu.memory_space<vmem>>, vector<256x128xbf16>,
    return
  }
  func.func @transform_0(%arg0: i32) -> (i32, i32) {
    %c0_i32 = arith.constant 0 : i32
    %c0_i32_0 = arith.constant 0 : i32
    return %arg0, %c0_i32 : i32, i32
  }
  func.func @transform_1(%arg0: i32) -> (i32, i32) {
    %c0_i32 = arith.constant 0 : i32
    %c0_i32_0 = arith.constant 0 : i32
    %c0_i32_1 = arith.constant 0 : i32
    return %c0_i32, %c0_i32_0 : i32, i32
  }
  func.func @transform_2(%arg0: i32) -> (i32, i32) {
    %c0_i32 = arith.constant 0 : i32
    %c0_i32_0 = arith.constant 0 : i32
    return %arg0, %c0_i32 : i32, i32
  }
  func.func @transform_3(%arg0: i32) -> (i32, i32) {
    %c0_i32 = arith.constant 0 : i32
    %c0_i32_0 = arith.constant 0 : i32
    return %arg0, %c0_i32 : i32, i32
  }
}

module attributes {stable_mosaic.version = 11 : i64} {
  func.func @spmm_relu_kernel(%arg0: i32, %arg1: i32, %arg2: memref<256x512xi8, #tpu.memory_space<vmem>>, %arg3: memref<512x128xbf16, #tpu.memory_space<vmem>>, %arg4: memref<256x1xf32, #tpu.memory_space<vmem>>, %arg5: memref<1x128xf32, #tpu.memory_space<vmem>>, %arg6: memref<256x128xbf16, #tpu.memory_space<vmem>>, %arg7: memref<256x128xf32, #tpu.memory_space<vmem>>) attributes {dimension_semantics = [#tpu.dimension_semantics<parallel>, #tpu.dimension_semantics<arbitrary>], iteration_bounds = array<i64: 2, 1>, scalar_prefetch = 0 : i64, scratch_operands = 1 : i64, tpu.core_type = #tpu.core_type<tc>, window_params = [{transform_indices = @transform_0, window_bounds = array<i64: 256, 512>}, {transform_indices = @transform_1, window_bounds = array<i64: 512, 128>}, {transform_indices = @transform_2, window_bounds = array<i64: 256, 1>}, {pipeline_mode = #tpu.pipeline_mode<synchronous>, transform_indices = @transform_3, window_bounds = array<i64: 1, 128>}, {transform_indices = @transform_4, window_bounds = array<i64: 256, 128>}]} {
    %c0_i32 = arith.constant 0 : i32
    %0 = arith.cmpi eq, %arg1, %c0_i32 : i32
    %1 = arith.extui %0 : i1 to i32
    %c0_i32_0 = arith.constant 0 : i32
    %2 = arith.cmpi ne, %1, %c0_i32_0 : i32
    scf.if %2 {
      %cst_10 = arith.constant 0.000000e+00 : f32
      %14 = vector.broadcast %cst_10 : f32 to vector<256x128xf32>
      %c0_11 = arith.constant 0 : index
      %c0_12 = arith.constant 0 : index
      %15 = vector.load %arg7[%c0_11, %c0_12] : memref<256x128xf32, #tpu.memory_space<vmem>>, vector<256x128xf32>
      tpu.vector_store %arg7[%c0_11, %c0_12], %14 {strides = array<i32>} : memref<256x128xf32, #tpu.memory_space<vmem>>, vector<256x128xf32>,
    } else {
    }
    %c0 = arith.constant 0 : index
    %c0_1 = arith.constant 0 : index
    %3 = vector.load %arg2[%c0, %c0_1] : memref<256x512xi8, #tpu.memory_space<vmem>>, vector<256x512xi8>
    %4 = arith.sitofp %3 : vector<256x512xi8> to vector<256x512xf32>
    %5 = arith.truncf %4 : vector<256x512xf32> to vector<256x512xbf16>
    %c0_2 = arith.constant 0 : index
    %c0_3 = arith.constant 0 : index
    %6 = vector.load %arg7[%c0_2, %c0_3] : memref<256x128xf32, #tpu.memory_space<vmem>>, vector<256x128xf32>
    %c0_4 = arith.constant 0 : index
    %c0_5 = arith.constant 0 : index
    %7 = vector.load %arg3[%c0_4, %c0_5] : memref<512x128xbf16, #tpu.memory_space<vmem>>, vector<512x128xbf16>
    %cst = arith.constant dense<0.000000e+00> : vector<256x128xf32>
    %8 = tpu.matmul %5, %7, %cst {dimension_numbers = #tpu.dot_dimension_numbers<[1], [0], [0], [1], [0, 0, 1, 1], [], []>} : vector<256x512xbf16>, vector<512x128xbf16>, vector<256x128xf32> -> vector<256x128xf32>
    %9 = arith.addf %6, %8 : vector<256x128xf32>
    %c0_6 = arith.constant 0 : index
    %c0_7 = arith.constant 0 : index
    %10 = vector.load %arg7[%c0_6, %c0_7] : memref<256x128xf32, #tpu.memory_space<vmem>>, vector<256x128xf32>
    tpu.vector_store %arg7[%c0_6, %c0_7], %9 {strides = array<i32>} : memref<256x128xf32, #tpu.memory_space<vmem>>, vector<256x128xf32>,
    %c0_i32_8 = arith.constant 0 : i32
    %11 = arith.cmpi eq, %arg1, %c0_i32_8 : i32
    %12 = arith.extui %11 : i1 to i32
    %c0_i32_9 = arith.constant 0 : i32
    %13 = arith.cmpi ne, %12, %c0_i32_9 : i32
    scf.if %13 {
      %c0_10 = arith.constant 0 : index
      %c0_11 = arith.constant 0 : index
      %14 = vector.load %arg7[%c0_10, %c0_11] : memref<256x128xf32, #tpu.memory_space<vmem>>, vector<256x128xf32>
      %c0_12 = arith.constant 0 : index
      %c0_13 = arith.constant 0 : index
      %15 = vector.load %arg4[%c0_12, %c0_13] : memref<256x1xf32, #tpu.memory_space<vmem>>, vector<256x1xf32>
      %16 = vector.broadcast %15 : vector<256x1xf32> to vector<256x128xf32>
      %17 = arith.mulf %14, %16 : vector<256x128xf32>
      %c0_14 = arith.constant 0 : index
      %c0_15 = arith.constant 0 : index
      %18 = vector.load %arg5[%c0_14, %c0_15] : memref<1x128xf32, #tpu.memory_space<vmem>>, vector<1x128xf32>
      %19 = vector.broadcast %18 : vector<1x128xf32> to vector<256x128xf32>
      %20 = arith.addf %17, %19 : vector<256x128xf32>
      %cst_16 = arith.constant 0.000000e+00 : f32
      %21 = vector.broadcast %cst_16 : f32 to vector<256x128xf32>
      %22 = arith.maximumf %20, %21 : vector<256x128xf32>
      %23 = arith.truncf %22 : vector<256x128xf32> to vector<256x128xbf16>
      %c0_17 = arith.constant 0 : index
      %c0_18 = arith.constant 0 : index
      %24 = vector.load %arg6[%c0_17, %c0_18] : memref<256x128xbf16, #tpu.memory_space<vmem>>, vector<256x128xbf16>
      tpu.vector_store %arg6[%c0_17, %c0_18], %23 {strides = array<i32>} : memref<256x128xbf16, #tpu.memory_space<vmem>>, vector<256x128xbf16>,
    } else {
    }
    return
  }
  func.func @transform_0(%arg0: i32, %arg1: i32) -> (i32, i32) {
    %c0_i32 = arith.constant 0 : i32
    return %arg0, %arg1 : i32, i32
  }
  func.func @transform_1(%arg0: i32, %arg1: i32) -> (i32, i32) {
    %c0_i32 = arith.constant 0 : i32
    %c0_i32_0 = arith.constant 0 : i32
    return %arg1, %c0_i32 : i32, i32
  }
  func.func @transform_2(%arg0: i32, %arg1: i32) -> (i32, i32) {
    %c0_i32 = arith.constant 0 : i32
    %c0_i32_0 = arith.constant 0 : i32
    return %arg0, %c0_i32 : i32, i32
  }
  func.func @transform_3(%arg0: i32, %arg1: i32) -> (i32, i32) {
    %c0_i32 = arith.constant 0 : i32
    %c0_i32_0 = arith.constant 0 : i32
    %c0_i32_1 = arith.constant 0 : i32
    return %c0_i32, %c0_i32_0 : i32, i32
  }
  func.func @transform_4(%arg0: i32, %arg1: i32) -> (i32, i32) {
    %c0_i32 = arith.constant 0 : i32
    %c0_i32_0 = arith.constant 0 : i32
    return %arg0, %c0_i32 : i32, i32
  }
}

module attributes {stable_mosaic.version = 11 : i64} {
  func.func @spmm_head_kernel(%arg0: i32, %arg1: i32, %arg2: memref<256x512xi8, #tpu.memory_space<vmem>>, %arg3: memref<512x128xbf16, #tpu.memory_space<vmem>>, %arg4: memref<256x1xf32, #tpu.memory_space<vmem>>, %arg5: memref<1x128xf32, #tpu.memory_space<vmem>>, %arg6: memref<128x128xbf16, #tpu.memory_space<vmem>>, %arg7: memref<1x128xf32, #tpu.memory_space<vmem>>, %arg8: memref<128x128xbf16, #tpu.memory_space<vmem>>, %arg9: memref<1x128xf32, #tpu.memory_space<vmem>>, %arg10: memref<256x128xf32, #tpu.memory_space<vmem>>, %arg11: memref<256x128xf32, #tpu.memory_space<vmem>>) attributes {dimension_semantics = [#tpu.dimension_semantics<parallel>, #tpu.dimension_semantics<arbitrary>], iteration_bounds = array<i64: 2, 1>, scalar_prefetch = 0 : i64, scratch_operands = 1 : i64, tpu.core_type = #tpu.core_type<tc>, window_params = [{transform_indices = @transform_0, window_bounds = array<i64: 256, 512>}, {transform_indices = @transform_1, window_bounds = array<i64: 512, 128>}, {transform_indices = @transform_2, window_bounds = array<i64: 256, 1>}, {pipeline_mode = #tpu.pipeline_mode<synchronous>, transform_indices = @transform_3, window_bounds = array<i64: 1, 128>}, {pipeline_mode = #tpu.pipeline_mode<synchronous>, transform_indices = @transform_4, window_bounds = array<i64: 128, 128>}, {pipeline_mode = #tpu.pipeline_mode<synchronous>, transform_indices = @transform_5, window_bounds = array<i64: 1, 128>}, {pipeline_mode = #tpu.pipeline_mode<synchronous>, transform_indices = @transform_6, window_bounds = array<i64: 128, 128>}, {pipeline_mode = #tpu.pipeline_mode<synchronous>, transform_indices = @transform_7, window_bounds = array<i64: 1, 128>}, {transform_indices = @transform_8, window_bounds = array<i64: 256, 128>}]} {
    %c0_i32 = arith.constant 0 : i32
    %0 = arith.cmpi eq, %arg1, %c0_i32 : i32
    %1 = arith.extui %0 : i1 to i32
    %c0_i32_0 = arith.constant 0 : i32
    %2 = arith.cmpi ne, %1, %c0_i32_0 : i32
    scf.if %2 {
      %cst_10 = arith.constant 0.000000e+00 : f32
      %14 = vector.broadcast %cst_10 : f32 to vector<256x128xf32>
      %c0_11 = arith.constant 0 : index
      %c0_12 = arith.constant 0 : index
      %15 = vector.load %arg11[%c0_11, %c0_12] : memref<256x128xf32, #tpu.memory_space<vmem>>, vector<256x128xf32>
      tpu.vector_store %arg11[%c0_11, %c0_12], %14 {strides = array<i32>} : memref<256x128xf32, #tpu.memory_space<vmem>>, vector<256x128xf32>,
    } else {
    }
    %c0 = arith.constant 0 : index
    %c0_1 = arith.constant 0 : index
    %3 = vector.load %arg2[%c0, %c0_1] : memref<256x512xi8, #tpu.memory_space<vmem>>, vector<256x512xi8>
    %4 = arith.sitofp %3 : vector<256x512xi8> to vector<256x512xf32>
    %5 = arith.truncf %4 : vector<256x512xf32> to vector<256x512xbf16>
    %c0_2 = arith.constant 0 : index
    %c0_3 = arith.constant 0 : index
    %6 = vector.load %arg11[%c0_2, %c0_3] : memref<256x128xf32, #tpu.memory_space<vmem>>, vector<256x128xf32>
    %c0_4 = arith.constant 0 : index
    %c0_5 = arith.constant 0 : index
    %7 = vector.load %arg3[%c0_4, %c0_5] : memref<512x128xbf16, #tpu.memory_space<vmem>>, vector<512x128xbf16>
    %cst = arith.constant dense<0.000000e+00> : vector<256x128xf32>
    %8 = tpu.matmul %5, %7, %cst {dimension_numbers = #tpu.dot_dimension_numbers<[1], [0], [0], [1], [0, 0, 1, 1], [], []>} : vector<256x512xbf16>, vector<512x128xbf16>, vector<256x128xf32> -> vector<256x128xf32>
    %9 = arith.addf %6, %8 : vector<256x128xf32>
    %c0_6 = arith.constant 0 : index
    %c0_7 = arith.constant 0 : index
    %10 = vector.load %arg11[%c0_6, %c0_7] : memref<256x128xf32, #tpu.memory_space<vmem>>, vector<256x128xf32>
    tpu.vector_store %arg11[%c0_6, %c0_7], %9 {strides = array<i32>} : memref<256x128xf32, #tpu.memory_space<vmem>>, vector<256x128xf32>,
    %c0_i32_8 = arith.constant 0 : i32
    %11 = arith.cmpi eq, %arg1, %c0_i32_8 : i32
    %12 = arith.extui %11 : i1 to i32
    %c0_i32_9 = arith.constant 0 : i32
    %13 = arith.cmpi ne, %12, %c0_i32_9 : i32
    scf.if %13 {
      %c0_10 = arith.constant 0 : index
      %c0_11 = arith.constant 0 : index
      %14 = vector.load %arg11[%c0_10, %c0_11] : memref<256x128xf32, #tpu.memory_space<vmem>>, vector<256x128xf32>
      %c0_12 = arith.constant 0 : index
      %c0_13 = arith.constant 0 : index
      %15 = vector.load %arg4[%c0_12, %c0_13] : memref<256x1xf32, #tpu.memory_space<vmem>>, vector<256x1xf32>
      %16 = vector.broadcast %15 : vector<256x1xf32> to vector<256x128xf32>
      %17 = arith.mulf %14, %16 : vector<256x128xf32>
      %c0_14 = arith.constant 0 : index
      %c0_15 = arith.constant 0 : index
      %18 = vector.load %arg5[%c0_14, %c0_15] : memref<1x128xf32, #tpu.memory_space<vmem>>, vector<1x128xf32>
      %19 = vector.broadcast %18 : vector<1x128xf32> to vector<256x128xf32>
      %20 = arith.addf %17, %19 : vector<256x128xf32>
      %cst_16 = arith.constant 0.000000e+00 : f32
      %21 = vector.broadcast %cst_16 : f32 to vector<256x128xf32>
      %22 = arith.maximumf %20, %21 : vector<256x128xf32>
      %23 = arith.truncf %22 : vector<256x128xf32> to vector<256x128xbf16>
      %c0_17 = arith.constant 0 : index
      %c0_18 = arith.constant 0 : index
      %24 = vector.load %arg6[%c0_17, %c0_18] : memref<128x128xbf16, #tpu.memory_space<vmem>>, vector<128x128xbf16>
      %cst_19 = arith.constant dense<0.000000e+00> : vector<256x128xf32>
      %25 = tpu.matmul %23, %24, %cst_19 {dimension_numbers = #tpu.dot_dimension_numbers<[1], [0], [0], [1], [0, 0, 1, 1], [], []>} : vector<256x128xbf16>, vector<128x128xbf16>, vector<256x128xf32> -> vector<256x128xf32>
      %c0_20 = arith.constant 0 : index
      %c0_21 = arith.constant 0 : index
      %26 = vector.load %arg7[%c0_20, %c0_21] : memref<1x128xf32, #tpu.memory_space<vmem>>, vector<1x128xf32>
      %27 = vector.broadcast %26 : vector<1x128xf32> to vector<256x128xf32>
      %28 = arith.addf %25, %27 : vector<256x128xf32>
      %cst_22 = arith.constant 0.000000e+00 : f32
      %29 = vector.broadcast %cst_22 : f32 to vector<256x128xf32>
      %30 = arith.maximumf %28, %29 : vector<256x128xf32>
      %31 = arith.truncf %30 : vector<256x128xf32> to vector<256x128xbf16>
      %c0_23 = arith.constant 0 : index
      %c0_24 = arith.constant 0 : index
      %32 = vector.load %arg8[%c0_23, %c0_24] : memref<128x128xbf16, #tpu.memory_space<vmem>>, vector<128x128xbf16>
      %cst_25 = arith.constant dense<0.000000e+00> : vector<256x128xf32>
      %33 = tpu.matmul %31, %32, %cst_25 {dimension_numbers = #tpu.dot_dimension_numbers<[1], [0], [0], [1], [0, 0, 1, 1], [], []>} : vector<256x128xbf16>, vector<128x128xbf16>, vector<256x128xf32> -> vector<256x128xf32>
      %c0_26 = arith.constant 0 : index
      %c0_27 = arith.constant 0 : index
      %34 = vector.load %arg9[%c0_26, %c0_27] : memref<1x128xf32, #tpu.memory_space<vmem>>, vector<1x128xf32>
      %35 = vector.broadcast %34 : vector<1x128xf32> to vector<256x128xf32>
      %36 = arith.addf %33, %35 : vector<256x128xf32>
      %37 = tpu.iota {dimensions = array<i32: 1>} : vector<256x128xi32>
      %c7_i32 = arith.constant 7 : i32
      %38 = vector.broadcast %c7_i32 : i32 to vector<256x128xi32>
      %39 = arith.cmpi slt, %37, %38 : vector<256x128xi32>
      %cst_28 = arith.constant -1.000000e+30 : f32
      %40 = vector.broadcast %cst_28 : f32 to vector<256x128xf32>
      %41 = arith.select %39, %36, %40 : vector<256x128xi1>, vector<256x128xf32>
      %cst_29 = arith.constant dense<0xFF800000> : vector<256xf32>
      %42 = vector.multi_reduction <maximumf>, %41, %cst_29 [1] : vector<256x128xf32> to vector<256xf32>
      %43 = vector.shape_cast %42 : vector<256xf32> to vector<256x1xf32>
      %44 = vector.broadcast %43 : vector<256x1xf32> to vector<256x128xf32>
      %45 = arith.subf %41, %44 : vector<256x128xf32>
      %46 = math.exp %45 : vector<256x128xf32>
      %cst_30 = arith.constant dense<0.000000e+00> : vector<256xf32>
      %47 = vector.multi_reduction <add>, %46, %cst_30 [1] : vector<256x128xf32> to vector<256xf32>
      %48 = vector.shape_cast %47 : vector<256xf32> to vector<256x1xf32>
      %49 = math.log %48 : vector<256x1xf32>
      %50 = vector.broadcast %49 : vector<256x1xf32> to vector<256x128xf32>
      %51 = arith.subf %45, %50 : vector<256x128xf32>
      %c0_31 = arith.constant 0 : index
      %c0_32 = arith.constant 0 : index
      %52 = vector.load %arg10[%c0_31, %c0_32] : memref<256x128xf32, #tpu.memory_space<vmem>>, vector<256x128xf32>
      tpu.vector_store %arg10[%c0_31, %c0_32], %51 {strides = array<i32>} : memref<256x128xf32, #tpu.memory_space<vmem>>, vector<256x128xf32>,
    } else {
    }
    return
  }
  func.func @transform_0(%arg0: i32, %arg1: i32) -> (i32, i32) {
    %c0_i32 = arith.constant 0 : i32
    return %arg0, %arg1 : i32, i32
  }
  func.func @transform_1(%arg0: i32, %arg1: i32) -> (i32, i32) {
    %c0_i32 = arith.constant 0 : i32
    %c0_i32_0 = arith.constant 0 : i32
    return %arg1, %c0_i32 : i32, i32
  }
  func.func @transform_2(%arg0: i32, %arg1: i32) -> (i32, i32) {
    %c0_i32 = arith.constant 0 : i32
    %c0_i32_0 = arith.constant 0 : i32
    return %arg0, %c0_i32 : i32, i32
  }
  func.func @transform_3(%arg0: i32, %arg1: i32) -> (i32, i32) {
    %c0_i32 = arith.constant 0 : i32
    %c0_i32_0 = arith.constant 0 : i32
    %c0_i32_1 = arith.constant 0 : i32
    return %c0_i32, %c0_i32_0 : i32, i32
  }
  func.func @transform_4(%arg0: i32, %arg1: i32) -> (i32, i32) {
    %c0_i32 = arith.constant 0 : i32
    %c0_i32_0 = arith.constant 0 : i32
    %c0_i32_1 = arith.constant 0 : i32
    return %c0_i32, %c0_i32_0 : i32, i32
  }
  func.func @transform_5(%arg0: i32, %arg1: i32) -> (i32, i32) {
    %c0_i32 = arith.constant 0 : i32
    %c0_i32_0 = arith.constant 0 : i32
    %c0_i32_1 = arith.constant 0 : i32
    return %c0_i32, %c0_i32_0 : i32, i32
  }
  func.func @transform_6(%arg0: i32, %arg1: i32) -> (i32, i32) {
    %c0_i32 = arith.constant 0 : i32
    %c0_i32_0 = arith.constant 0 : i32
    %c0_i32_1 = arith.constant 0 : i32
    return %c0_i32, %c0_i32_0 : i32, i32
  }
  func.func @transform_7(%arg0: i32, %arg1: i32) -> (i32, i32) {
    %c0_i32 = arith.constant 0 : i32
    %c0_i32_0 = arith.constant 0 : i32
    %c0_i32_1 = arith.constant 0 : i32
    return %c0_i32, %c0_i32_0 : i32, i32
  }
  func.func @transform_8(%arg0: i32, %arg1: i32) -> (i32, i32) {
    %c0_i32 = arith.constant 0 : i32
    %c0_i32_0 = arith.constant 0 : i32
    return %arg0, %c0_i32 : i32, i32
  }
}

</mosaic_0001>

<bundles_post_ra>
// kernel: gcn_forward.4
= control target key start
LH: loop header
LB: loop body
LE: loop exit
PB: predicated region body
PF: predicated region fallthrough
CT: control target
= control target key end

     0   :  { %s1350_s12 = smov 0   ;;  %s1505_s0 = inlined_call_operand.vmem [shape: bf16[512,128], index: 0, kind: input, shape index: {}]   ;;  %s1506_s1 = inlined_call_operand.vmem [shape: bf16[128,128], index: 1, kind: input, shape index: {}]   ;;  %s1507_s2 = inlined_call_operand.vmem [shape: f32[512,1], index: 2, kind: input, shape index: {}]   ;;  %s1508_s3 = inlined_call_operand.vmem [shape: bf16[512,128], index: 3, kind: output, shape index: {}]  }
   0x1 LB: > { %s1002_s13 = sadd.s32 4294967295, %s1327_s12   ;;  %p1006_p0 = scmp.ge.s32.totalorder %s1327_s12, 1  ;;  %s1327_s12 = sphi %s1350_s12, %s13_s12  }
   0x2   : > { %p149_p1 = scmp.lt.s32.totalorder %s1327_s12, 3 }
   0x4   : > { %p150_p2 = pnand %p1006_p0, %p149_p1 }
   0x5   : > { %v1297_v0 = vld [vmem:[%s1506_s1] sm:$0xff] (!%p150_p2)   ;;  %v1298_v1 = vld [vmem:[%s1506_s1 + $0x8] sm:$0xff] (!%p150_p2)   ;;  %v1329_v2 = vmov (!%p150_p2), 0   ;;  %s1007_s18 = sshll.u32 (!%p150_p2), %s1002_s13, 5  ;;  %v1299_v3 = vld [vmem:[%s1506_s1 + $0x10] sm:$0xff] (!%p150_p2)  }
   0x6   : > { %153 = sbr.rel (%p150_p2) target bundleno = 283 (0x11b), region = 32  ;;  %1296 = vset.pattern.permute.xlu1 (!%p150_p2), %v1329_v2  ;;  %1295 = vset.pattern.permute.xlu0 (!%p150_p2), %v1329_v2  ;;  %p179_p3 = scmp.lt.s32.totalorder (!%p150_p2), %s1007_s18, 63  ;;  %v1300_v4 = vld [vmem:[%s1506_s1 + $0x18] sm:$0xff] (!%p150_p2)   ;;  %v1301_v11 = vld [vmem:[%s1506_s1 + $0x20] sm:$0xff] (!%p150_p2)   ;;  %v1302_v14 = vld [vmem:[%s1506_s1 + $0x28] sm:$0xff] (!%p150_p2)  }
   0x7   : > { %1222 = vmatprep.subr.bf16.mxu0 (!%p150_p2), %v1297_v0  ;;  %1270 = vmatprep.subr.bf16.mxu1 (!%p150_p2), %v1297_v0  ;;  %v1303_v17 = vld [vmem:[%s1506_s1 + $0x30] sm:$0xff] (!%p150_p2)   ;;  %v1304_v20 = vld [vmem:[%s1506_s1 + $0x38] sm:$0xff] (!%p150_p2)  }
   0x8   : > { %1223 = vmatpush3.bf16.msra.mxu0 (!%p150_p2), %v1297_v0  ;;  %1278 = vmatpush3.bf16.msra.mxu1 (!%p150_p2), %v1297_v0 }
   0x9   : > { %1224 = vmatprep.subr.bf16.mxu0 (!%p150_p2), %v1298_v1  ;;  %1271 = vmatprep.subr.bf16.mxu1 (!%p150_p2), %v1298_v1 }
   0xc   : > { %1225 = vmatpush3.bf16.msra.mxu0 (!%p150_p2), %v1298_v1  ;;  %1279 = vmatpush3.bf16.msra.mxu1 (!%p150_p2), %v1298_v1 }
   0xd   : > { %s1510_s18 = smov (!%p179_p3, %s1007_s18), 63  ;;  %1226 = vmatprep.subr.bf16.mxu0 %v1299_v3  ;;  %1272 = vmatprep.subr.bf16.mxu1 %v1299_v3 }
   0xe   : > { %s1010_s21 = sshll.u32 %s1510_s18, 3  ;;  %s1008_s25 = sshll.u32 %s1510_s18, 2 }
   0xf   : > { %s1373_s24 = scalar_lea.vmem %s1507_s2, %s1010_s21  ;;  %s1386_s30 = scalar_lea.vmem %s1505_s0, %s1008_s25 }
  0x10   : > { %v552_v5 = vld [vmem:[%s1373_s24 + $0x10] sm:$0xff]  ;;  %v550_v6 = vld [vmem:[%s1373_s24] sm:$0xff]  ;;  %v553_v7 = vld [vmem:[%s1373_s24 + $0x18] sm:$0xff]  ;;  %1227 = vmatpush3.bf16.msra.mxu0 %v1299_v3  ;;  %1280 = vmatpush3.bf16.msra.mxu1 %v1299_v3  ;;  %s1473_s15 = scalar_lea.vmem %s1508_s3, %s1008_s25 }
  0x11   : > { %594 = vperm.xlu1 %1296, %v552_v5   ;;  %584 = vperm.xlu0 %1295, %v550_v6   ;;  %v551_v8 = vld [vmem:[%s1373_s24 + $0x8] sm:$0xff]  ;;  %v1305_v9 = vld [vmem:[%s1386_s30] sm:$0xff]   ;;  %v557_v15 = vld [vmem:[%s1373_s24 + $0x38] sm:$0xff] }
  0x12   : > { %v1306_v10 = vld [vmem:[%s1386_s30 + $0x40] sm:$0xff]   ;;  %1228 = vmatprep.subr.bf16.mxu0 %v1300_v4  ;;  %1273 = vmatprep.subr.bf16.mxu1 %v1300_v4  ;;  %v555_v12 = vld [vmem:[%s1373_s24 + $0x28] sm:$0xff]  ;;  %v556_v16 = vld [vmem:[%s1373_s24 + $0x30] sm:$0xff] }
  0x13   : > { %v554_v13 = vld [vmem:[%s1373_s24 + $0x20] sm:$0xff]  ;;  %1238 = vmatprep.mubr.bf16.mxu0 %v1305_v9  ;;  %1254 = vmatprep.mubr.bf16.mxu1 %v1306_v10  ;;  %v559_v18 = vld [vmem:[%s1373_s24 + $0x48] sm:$0xff]  ;;  %v561_v21 = vld [vmem:[%s1373_s24 + $0x58] sm:$0xff] }
  0x14   : > { %1229 = vmatpush3.bf16.msra.mxu0 %v1300_v4  ;;  %1281 = vmatpush3.bf16.msra.mxu1 %v1300_v4  ;;  %v558_v19 = vld [vmem:[%s1373_s24 + $0x40] sm:$0xff]  ;;  %v560_v22 = vld [vmem:[%s1373_s24 + $0x50] sm:$0xff]  ;;  %v1307_v23 = vld [vmem:[%s1386_s30 + $0x8] sm:$0xff]  }
  0x15   : > { %599 = vperm.xlu1 %1296, %v553_v7   ;;  %589 = vperm.xlu0 %1295, %v551_v8   ;;  %v1308_v24 = vld [vmem:[%s1386_s30 + $0x48] sm:$0xff]   ;;  %v562_v26 = vld [vmem:[%s1373_s24 + $0x60] sm:$0xff]  ;;  %v1309_v27 = vld [vmem:[%s1386_s30 + $0x10] sm:$0xff]  }
  0x16   : > { %1230 = vmatprep.subr.bf16.mxu0 %v1301_v11  ;;  %1274 = vmatprep.subr.bf16.mxu1 %v1301_v11  ;;  %v563_v25 = vld [vmem:[%s1373_s24 + $0x68] sm:$0xff]  ;;  %v1310_v28 = vld [vmem:[%s1386_s30 + $0x50] sm:$0xff]   ;;  %v565_v29 = vld [vmem:[%s1373_s24 + $0x78] sm:$0xff] }
  0x17   : > { %v564_v30 = vld [vmem:[%s1373_s24 + $0x70] sm:$0xff]  ;;  %v1311_v31 = vld [vmem:[%s1386_s30 + $0x18] sm:$0xff]   ;;  %v567_v33 = vld [vmem:[%s1373_s24 + $0x88] sm:$0xff] }
  0x18   : > { %1231 = vmatpush3.bf16.msra.mxu0 %v1301_v11  ;;  %1282 = vmatpush3.bf16.msra.mxu1 %v1301_v11  ;;  %v1312_v32 = vld [vmem:[%s1386_s30 + $0x58] sm:$0xff]   ;;  %v566_v34 = vld [vmem:[%s1373_s24 + $0x80] sm:$0xff]  ;;  %v568_v38 = vld [vmem:[%s1373_s24 + $0x90] sm:$0xff] }
  0x19   : > { %609 = vperm.xlu1 %1296, %v555_v12   ;;  %604 = vperm.xlu0 %1295, %v554_v13   ;;  %v1313_v35 = vld [vmem:[%s1386_s30 + $0x20] sm:$0xff]   ;;  %v569_v37 = vld [vmem:[%s1373_s24 + $0x98] sm:$0xff]  ;;  %v1315_v39 = vld [vmem:[%s1386_s30 + $0x28] sm:$0xff]  }
  0x1a   : > { %1232 = vmatprep.subr.bf16.mxu0 %v1302_v14  ;;  %1275 = vmatprep.subr.bf16.mxu1 %v1302_v14  ;;  %v1314_v36 = vld [vmem:[%s1386_s30 + $0x60] sm:$0xff]   ;;  %v1316_v40 = vld [vmem:[%s1386_s30 + $0x68] sm:$0xff]   ;;  %v1317_v43 = vld [vmem:[%s1386_s30 + $0x30] sm:$0xff]  }
  0x1b   : > { %v571_v41 = vld [vmem:[%s1373_s24 + $0xa8] sm:$0xff]  ;;  %v570_v42 = vld [vmem:[%s1373_s24 + $0xa0] sm:$0xff]  ;;  %v1318_v44 = vld [vmem:[%s1386_s30 + $0x70] sm:$0xff]  }
  0x1c   : > { %1233 = vmatpush3.bf16.msra.mxu0 %v1302_v14  ;;  %1283 = vmatpush3.bf16.msra.mxu1 %v1302_v14  ;;  %v573_v45 = vld [vmem:[%s1373_s24 + $0xb8] sm:$0xff]  ;;  %v572_v46 = vld [vmem:[%s1373_s24 + $0xb0] sm:$0xff]  ;;  %v575_v49 = vld [vmem:[%s1373_s24 + $0xc8] sm:$0xff] }
  0x1d   : > { %619 = vperm.xlu1 %1296, %v557_v15   ;;  %614 = vperm.xlu0 %1295, %v556_v16   ;;  %v1319_v47 = vld [vmem:[%s1386_s30 + $0x38] sm:$0xff]   ;;  %v574_v50 = vld [vmem:[%s1373_s24 + $0xc0] sm:$0xff]  ;;  %v576_v52 = vld [vmem:[%s1373_s24 + $0xd0] sm:$0xff] }
  0x1e   : > { %1234 = vmatprep.subr.bf16.mxu0 %v1303_v17  ;;  %1276 = vmatprep.subr.bf16.mxu1 %v1303_v17  ;;  %v1320_v48 = vld [vmem:[%s1386_s30 + $0x78] sm:$0xff]   ;;  %v579_v53 = vld [vmem:[%s1373_s24 + $0xe8] sm:$0xff]  ;;  %v578_v54 = vld [vmem:[%s1373_s24 + $0xe0] sm:$0xff] }
  0x1f   : > { %v577_v51 = vld [vmem:[%s1373_s24 + $0xd8] sm:$0xff]  ;;  %v580_v56 = vld [vmem:[%s1373_s24 + $0xf0] sm:$0xff] }
  0x20   : > { %1235 = vmatpush3.bf16.msra.mxu0 %v1303_v17  ;;  %1284 = vmatpush3.bf16.msra.mxu1 %v1303_v17  ;;  %v581_v55 = vld [vmem:[%s1373_s24 + $0xf8] sm:$0xff] }
  0x21   : > { %629 = vperm.xlu1 %1296, %v559_v18   ;;  %624 = vperm.xlu0 %1295, %v558_v19  }
  0x22   : > { %1236 = vmatprep.subr.bf16.mxu0 %v1304_v20  ;;  %1277 = vmatprep.subr.bf16.mxu1 %v1304_v20 }
  0x24   : > { %1237 = vmatpush3.bf16.msra.mxu0 %v1304_v20  ;;  %1285 = vmatpush3.bf16.msra.mxu1 %v1304_v20 }
  0x25   : > { %639 = vperm.xlu1 %1296, %v561_v21   ;;  %634 = vperm.xlu0 %1295, %v560_v22  }
  0x27   : > { %1239 = vmatmul.mubr.bf16.vlgmr.msra.gmra.mrb[0].mxu0 %v1307_v23  ;;  %1255 = vmatmul.mubr.bf16.vlgmr.msra.gmra.mrb[0].mxu1 %v1308_v24 }
  0x28   : > { %1242 = vmatprep.mubr.bf16.mxu0 %v1309_v27  ;;  %1258 = vmatprep.mubr.bf16.mxu1 %v1310_v28 }
  0x29   : > { %649 = vperm.xlu1 %1296, %v563_v25   ;;  %644 = vperm.xlu0 %1295, %v562_v26  }
  0x2d   : > { %659 = vperm.xlu1 %1296, %v565_v29   ;;  %654 = vperm.xlu0 %1295, %v564_v30  }
  0x2f   : > { %1243 = vmatmul.mubr.bf16.gmra.mrb[4].mxu0 %v1311_v31  ;;  %1259 = vmatmul.mubr.bf16.gmra.mrb[4].mxu1 %v1312_v32 }
  0x30   : > { %1246 = vmatprep.mubr.bf16.mxu0 %v1313_v35  ;;  %1262 = vmatprep.mubr.bf16.mxu1 %v1314_v36 }
  0x31   : > { %669 = vperm.xlu1 %1296, %v567_v33   ;;  %664 = vperm.xlu0 %1295, %v566_v34  }
  0x35   : > { %679 = vperm.xlu1 %1296, %v569_v37   ;;  %674 = vperm.xlu0 %1295, %v568_v38  }
  0x37   : > { %1247 = vmatmul.mubr.bf16.gmra.mrb[8].mxu0 %v1315_v39  ;;  %1263 = vmatmul.mubr.bf16.gmra.mrb[8].mxu1 %v1316_v40 }
  0x38   : > { %1250 = vmatprep.mubr.bf16.mxu0 %v1317_v43  ;;  %1266 = vmatprep.mubr.bf16.mxu1 %v1318_v44 }
  0x39   : > { %689 = vperm.xlu1 %1296, %v571_v41   ;;  %684 = vperm.xlu0 %1295, %v570_v42  }
  0x3d   : > { %699 = vperm.xlu1 %1296, %v573_v45   ;;  %694 = vperm.xlu0 %1295, %v572_v46  }
  0x3f   : > { %1251 = vmatmul.mubr.bf16.gmra.mrb[12].mxu0 %v1319_v47  ;;  %1267 = vmatmul.mubr.bf16.gmra.mrb[12].mxu1 %v1320_v48 }
  0x41   : > { %709 = vperm.xlu1 %1296, %v575_v49   ;;  %704 = vperm.xlu0 %1295, %v574_v50  }
  0x45   : > { %719 = vperm.xlu1 %1296, %v577_v51   ;;  %714 = vperm.xlu0 %1295, %v576_v52  }
  0x49   : > { %729 = vperm.xlu1 %1296, %v579_v53   ;;  %724 = vperm.xlu0 %1295, %v578_v54  }
  0x4d   : > { %739 = vperm.xlu1 %1296, %v581_v55   ;;  %734 = vperm.xlu0 %1295, %v580_v56  }
  0x90   : > { %v595_v57 = vpop.permute.xlu1 %594  ;;  %v585_v58 = vpop.permute.xlu0 %584 }
  0x94   : > { %v600_v59 = vpop.permute.xlu1 %599  ;;  %v590_v60 = vpop.permute.xlu0 %589 }
  0x98   : > { %v1446_v61 = vpop.permute.xlu1 %609  ;;  %v605_v62 = vpop.permute.xlu0 %604 }
  0x9c   : > { %v620_v63 = vpop.permute.xlu1 %619  ;;  %v615_v0 = vpop.permute.xlu0 %614 }
  0xa0   : > { %v1448_v1 = vpop.permute.xlu1 %629  ;;  %v1450_v2 = vpop.permute.xlu0 %624 }
  0xa4   : > { %v1452_v3 = vpop.permute.xlu1 %639  ;;  %v1454_v4 = vpop.permute.xlu0 %634 }
  0xa8   : > { %v1456_v5 = vpop.permute.xlu1 %649  ;;  %v1458_v6 = vpop.permute.xlu0 %644 }
  0xac   : > { %v1460_v7 = vpop.permute.xlu1 %659  ;;  %v1462_v8 = vpop.permute.xlu0 %654 }
  0xb0   : > { %v670_v9 = vpop.permute.xlu1 %669  ;;  %v665_v10 = vpop.permute.xlu0 %664 }
  0xb4   : > { %v680_v11 = vpop.permute.xlu1 %679  ;;  %v675_v12 = vpop.permute.xlu0 %674 }
  0xb8   : > { %v690_v13 = vpop.permute.xlu1 %689  ;;  %v685_v14 = vpop.permute.xlu0 %684 }
  0xbc   : > { %v700_v15 = vpop.permute.xlu1 %699  ;;  %v695_v16 = vpop.permute.xlu0 %694 }
  0xc0   : > { %v1464_v17 = vpop.permute.xlu1 %709  ;;  %v1466_v18 = vpop.permute.xlu0 %704 }
  0xc4   : > { %v720_v39 = vpop.permute.xlu1 %719  ;;  %v715_v40 = vpop.permute.xlu0 %714 }
  0xfa   : > { %v1240_v19 = vpop.f32.mrb[0].mxu0  ;;  %v1256_v20 = vpop.f32.mrb[0].mxu1 }
  0xfb   : > { %v423_v21 = vpop.f32.mrb[1].mxu0  ;;  %v487_v22 = vpop.f32.mrb[1].mxu1  ;;  %v744_v25 = vmul.f32 %v1240_v19, %v595_v57  ;;  %v760_v26 = vmul.f32 %v1256_v20, %v675_v12 }
  0xfc   : > { %v1241_v23 = vpop.f32.mrb[2].mxu0  ;;  %v1257_v24 = vpop.f32.mrb[2].mxu1  ;;  %v742_v31 = vmul.f32 %v585_v58, %v423_v21  ;;  %v758_v32 = vmul.f32 %v665_v10, %v487_v22 }
  0xfd   : > { %v745_v27 = vmul.f32 %v1241_v23, %v600_v59  ;;  %v761_v28 = vmul.f32 %v1257_v24, %v680_v11  ;;  %v426_v29 = vpop.f32.mrb[3].mxu0  ;;  %v490_v30 = vpop.f32.mrb[3].mxu1 }
  0xfe   : > { %v743_v33 = vmul.f32 %v590_v60, %v426_v29  ;;  %v759_v34 = vmul.f32 %v670_v9, %v490_v30  ;;  %v730_v9 = vpop.permute.xlu1 %729 }
  0xff   : > { %v1111_v35 = vpack.c.bf16 %v745_v27, %v744_v25  ;;  %v1151_v36 = vpack.c.bf16 %v761_v28, %v760_v26 }
 0x100   : > { %v1106_v37 = vpack.c.bf16 %v743_v33, %v742_v31  ;;  %v1146_v38 = vpack.c.bf16 %v759_v34, %v758_v32 }
 0x101   : > { %1183 = vst [vmem:[%s1473_s15 + $0x8] sm:$0xff] %v1111_v35   ;;  %1191 = vst [vmem:[%s1473_s15 + $0x48] sm:$0xff] %v1151_v36  }
 0x102   : > { %1107 = vst [vmem:[%s1473_s15] sm:$0xff] %v1106_v37   ;;  %1190 = vst [vmem:[%s1473_s15 + $0x40] sm:$0xff] %v1146_v38   ;;  %v1244_v41 = vpop.f32.mrb[4].mxu0  ;;  %v1260_v42 = vpop.f32.mrb[4].mxu1 }
 0x103   : > { %v439_v43 = vpop.f32.mrb[5].mxu0  ;;  %v503_v44 = vpop.f32.mrb[5].mxu1  ;;  %v748_v47 = vmul.f32 %v1244_v41, %v615_v0  ;;  %v764_v48 = vmul.f32 %v1260_v42, %v695_v16 }
 0x104   : > { %v1245_v45 = vpop.f32.mrb[6].mxu0  ;;  %v1261_v46 = vpop.f32.mrb[6].mxu1  ;;  %v746_v53 = vmul.f32 %v605_v62, %v439_v43  ;;  %v762_v54 = vmul.f32 %v685_v14, %v503_v44 }
 0x105   : > { %v749_v49 = vmul.f32 %v1245_v45, %v620_v63  ;;  %v765_v50 = vmul.f32 %v1261_v46, %v700_v15  ;;  %v442_v51 = vpop.f32.mrb[7].mxu0  ;;  %v506_v52 = vpop.f32.mrb[7].mxu1 }
 0x106   : > { %v747_v55 = vmul.f32 %v1446_v61, %v442_v51  ;;  %v763_v56 = vmul.f32 %v690_v13, %v506_v52  ;;  %v725_v0 = vpop.permute.xlu0 %724  ;;  %v740_v28 = vpop.permute.xlu1 %739 }
 0x107   : > { %v1121_v57 = vpack.c.bf16 %v749_v49, %v748_v47  ;;  %v1161_v58 = vpack.c.bf16 %v765_v50, %v764_v48 }
 0x108   : > { %v1116_v59 = vpack.c.bf16 %v747_v55, %v746_v53  ;;  %v1156_v60 = vpack.c.bf16 %v763_v56, %v762_v54 }
 0x109   : > { %1185 = vst [vmem:[%s1473_s15 + $0x18] sm:$0xff] %v1121_v57   ;;  %1193 = vst [vmem:[%s1473_s15 + $0x58] sm:$0xff] %v1161_v58  }
 0x10a   : > { %1184 = vst [vmem:[%s1473_s15 + $0x10] sm:$0xff] %v1116_v59   ;;  %1192 = vst [vmem:[%s1473_s15 + $0x50] sm:$0xff] %v1156_v60   ;;  %v1248_v63 = vpop.f32.mrb[8].mxu0  ;;  %v1264_v10 = vpop.f32.mrb[8].mxu1 }
 0x10b   : > { %v455_v11 = vpop.f32.mrb[9].mxu0  ;;  %v519_v12 = vpop.f32.mrb[9].mxu1  ;;  %v752_v14 = vmul.f32 %v1248_v63, %v1454_v4  ;;  %v768_v61 = vmul.f32 %v1264_v10, %v715_v40 }
 0x10c   : > { %v1249_v15 = vpop.f32.mrb[10].mxu0  ;;  %v1265_v62 = vpop.f32.mrb[10].mxu1  ;;  %v750_v21 = vmul.f32 %v1450_v2, %v455_v11  ;;  %v766_v22 = vmul.f32 %v1466_v18, %v519_v12 }
 0x10d   : > { %v753_v13 = vmul.f32 %v1249_v15, %v1452_v3  ;;  %v769_v16 = vmul.f32 %v1265_v62, %v720_v39  ;;  %v458_v19 = vpop.f32.mrb[11].mxu0  ;;  %v522_v20 = vpop.f32.mrb[11].mxu1 }
 0x10e   : > { %v751_v23 = vmul.f32 %v1448_v1, %v458_v19  ;;  %v767_v24 = vmul.f32 %v1464_v17, %v522_v20  ;;  %v735_v29 = vpop.permute.xlu0 %734 }
 0x10f   : > { %v1131_v25 = vpack.c.bf16 %v753_v13, %v752_v14  ;;  %v1171_v4 = vpack.c.bf16 %v769_v16, %v768_v61 }
 0x110   : > { %v1126_v26 = vpack.c.bf16 %v751_v23, %v750_v21  ;;  %v1166_v27 = vpack.c.bf16 %v767_v24, %v766_v22 }
 0x111   : > { %1187 = vst [vmem:[%s1473_s15 + $0x28] sm:$0xff] %v1131_v25   ;;  %1195 = vst [vmem:[%s1473_s15 + $0x68] sm:$0xff] %v1171_v4  }
 0x112   : > { %1186 = vst [vmem:[%s1473_s15 + $0x20] sm:$0xff] %v1126_v26   ;;  %1194 = vst [vmem:[%s1473_s15 + $0x60] sm:$0xff] %v1166_v27   ;;  %v1252_v3 = vpop.f32.mrb[12].mxu0  ;;  %v1268_v30 = vpop.f32.mrb[12].mxu1 }
 0x113   : > { %v471_v31 = vpop.f32.mrb[13].mxu0  ;;  %v535_v2 = vpop.f32.mrb[13].mxu1  ;;  %v756_v1 = vmul.f32 %v1252_v3, %v1462_v8  ;;  %v772_v17 = vmul.f32 %v1268_v30, %v735_v29 }
 0x114   : > { %v1253_v32 = vpop.f32.mrb[14].mxu0  ;;  %v1269_v18 = vpop.f32.mrb[14].mxu1  ;;  %v754_v37 = vmul.f32 %v1458_v6, %v471_v31  ;;  %v770_v38 = vmul.f32 %v725_v0, %v535_v2 }
 0x115   : > { %v757_v33 = vmul.f32 %v1253_v32, %v1460_v7  ;;  %v773_v34 = vmul.f32 %v1269_v18, %v740_v28  ;;  %v474_v35 = vpop.f32.mrb[15].mxu0  ;;  %v538_v36 = vpop.f32.mrb[15].mxu1 }
 0x116   : > { %v755_v39 = vmul.f32 %v1456_v5, %v474_v35  ;;  %v771_v40 = vmul.f32 %v730_v9, %v538_v36 }
 0x117   : > { %v1141_v41 = vpack.c.bf16 %v757_v33, %v756_v1  ;;  %v1181_v42 = vpack.c.bf16 %v773_v34, %v772_v17 }
 0x118   : > { %v1136_v43 = vpack.c.bf16 %v755_v39, %v754_v37  ;;  %v1176_v44 = vpack.c.bf16 %v771_v40, %v770_v38 }
 0x119   : > { %1189 = vst [vmem:[%s1473_s15 + $0x38] sm:$0xff] %v1141_v41   ;;  %1197 = vst [vmem:[%s1473_s15 + $0x78] sm:$0xff] %v1181_v42  }
 0x11a   : > { %1188 = vst [vmem:[%s1473_s15 + $0x30] sm:$0xff] %v1136_v43   ;;  %1196 = vst [vmem:[%s1473_s15 + $0x70] sm:$0xff] %v1176_v44  }
 0x11b PF: > { %s13_s12 = sadd.s32 1, %s1327_s12  }
 0x11c   : > { %p10_p4 = scmp.ge.s32.totalorder %s13_s12, 4  }
 0x11e   :  { %12 = sbr.rel (!%p10_p4) target bundleno = 1 (0x1), region = 65 }

// kernel: gcn_forward.5
= control target key start
LH: loop header
LB: loop body
LE: loop exit
PB: predicated region body
PF: predicated region fallthrough
CT: control target
= control target key end

     0   :  { %s2596_s15 = smov 0   ;;  %s2598_s16 = smov 0   ;;  %s2862_s0 = inlined_call_operand.vmem [shape: s8[512,512], index: 0, kind: input, shape index: {}]   ;;  %s2863_s1 = inlined_call_operand.vmem [shape: bf16[512,128], index: 1, kind: input, shape index: {}]   ;;  %s2864_s2 = inlined_call_operand.vmem [shape: f32[512,1], index: 2, kind: input, shape index: {}]   ;;  %s2865_s3 = inlined_call_operand.vmem [shape: f32[1,128], index: 3, kind: input, shape index: {}]   ;;  %s2866_s4 = inlined_call_operand.vmem [shape: bf16[512,128], index: 4, kind: output, shape index: {}]  }
   0x1   :  { %s2600_s17 = smov 0  }
   0x2 LB: > { %s26_s18 = sadd.s32 1, %s2564_s16  ;;  %p1996_p0 = scmp.ge.s32.totalorder %s2568_s17, 1  ;;  %s2568_s17 = sphi %s2600_s17, %s14_s17   ;;  %s2564_s16 = sphi %s2598_s16, %s2868_s16   ;;  %s2560_s15 = sphi %s2596_s15, %s2867_s15  }
   0x3   : > { %p28_p1 = scmp.ge.s32.totalorder %s26_s18, 2  ;;  %p205_p2 = scmp.lt.s32.totalorder %s2568_s17, 3 }
   0x5   : > { %s2870_s18 = smov (%p28_p1, %s26_s18), 0  ;;  %p206_p3 = pnand %p1996_p0, %p205_p2 }
   0x6   : > { %v2514_v0 = vld [vmem:[%s2863_s1 + $0x40] sm:$0xff] (!%p206_p3)   ;;  %v2570_v4 = vmov (!%p206_p3), 0   ;;  %v2518_v5 = vld [vmem:[%s2863_s1 + $0x48] sm:$0xff] (!%p206_p3)   ;;  %v2522_v9 = vld [vmem:[%s2863_s1 + $0x50] sm:$0xff] (!%p206_p3)   ;;  %s1997_s29 = sshll.u32 (!%p206_p3), %s2560_s15, 5 }
   0x7   : > { %209 = sbr.rel (%p206_p3) target bundleno = 389 (0x185), region = 36  ;;  %v2515_v1 = vld [vmem:[%s2863_s1 + $0xc0] sm:$0xff] (!%p206_p3)   ;;  %2263 = vmatprep.subr.bf16.mxu0 (!%p206_p3), %v2514_v0  ;;  %2512 = vset.pattern.permute.xlu0 (!%p206_p3), %v2570_v4  ;;  %v2519_v6 = vld [vmem:[%s2863_s1 + $0xc8] sm:$0xff] (!%p206_p3)   ;;  %v2523_v10 = vld [vmem:[%s2863_s1 + $0xd0] sm:$0xff] (!%p206_p3)   ;;  %p248_p4 = scmp.lt.s32.totalorder (!%p206_p3), %s1997_s29, 63 }
   0x8   : > { %v2516_v2 = vld [vmem:[%s2863_s1] sm:$0xff] (!%p206_p3)   ;;  %2375 = vmatprep.subr.bf16.mxu1 (!%p206_p3), %v2515_v1  ;;  %2513 = vset.pattern.permute.xlu1 (!%p206_p3), %v2570_v4  ;;  %v2520_v7 = vld [vmem:[%s2863_s1 + $0x8] sm:$0xff] (!%p206_p3)   ;;  %v2524_v11 = vld [vmem:[%s2863_s1 + $0x10] sm:$0xff] (!%p206_p3)  }
   0x9   : > { %v2517_v3 = vld [vmem:[%s2863_s1 + $0x80] sm:$0xff] (!%p206_p3)   ;;  %2264 = vmatpush3.bf16.msra.mxu0 (!%p206_p3), %v2516_v2  ;;  %v2521_v8 = vld [vmem:[%s2863_s1 + $0x88] sm:$0xff] (!%p206_p3)   ;;  %v2525_v12 = vld [vmem:[%s2863_s1 + $0x90] sm:$0xff] (!%p206_p3)  }
   0xa   : > { %2376 = vmatpush3.bf16.msra.mxu1 (!%p206_p3), %v2517_v3  ;;  %2265 = vmatprep.subr.bf16.mxu0 (!%p206_p3), %v2518_v5  ;;  %v2526_v13 = vld [vmem:[%s2863_s1 + $0x58] sm:$0xff] (!%p206_p3)   ;;  %v2530_v17 = vld [vmem:[%s2863_s1 + $0x60] sm:$0xff] (!%p206_p3)   ;;  %v2534_v21 = vld [vmem:[%s2863_s1 + $0x68] sm:$0xff] (!%p206_p3)  }
   0xb   : > { %2377 = vmatprep.subr.bf16.mxu1 (!%p206_p3), %v2519_v6  ;;  %v2527_v14 = vld [vmem:[%s2863_s1 + $0xd8] sm:$0xff] (!%p206_p3)   ;;  %v2531_v18 = vld [vmem:[%s2863_s1 + $0xe0] sm:$0xff] (!%p206_p3)   ;;  %v2535_v22 = vld [vmem:[%s2863_s1 + $0xe8] sm:$0xff] (!%p206_p3)  }
   0xc   : > { %v2528_v15 = vld [vmem:[%s2863_s1 + $0x18] sm:$0xff] (!%p206_p3)   ;;  %v2532_v19 = vld [vmem:[%s2863_s1 + $0x20] sm:$0xff] (!%p206_p3)   ;;  %v2536_v23 = vld [vmem:[%s2863_s1 + $0x28] sm:$0xff] (!%p206_p3)  }
   0xd   : > { %2266 = vmatpush3.bf16.msra.mxu0 (!%p206_p3), %v2520_v7  ;;  %v2529_v16 = vld [vmem:[%s2863_s1 + $0x98] sm:$0xff] (!%p206_p3)   ;;  %v2533_v20 = vld [vmem:[%s2863_s1 + $0xa0] sm:$0xff] (!%p206_p3)   ;;  %v2537_v24 = vld [vmem:[%s2863_s1 + $0xa8] sm:$0xff] (!%p206_p3)  }
   0xe   : > { %2378 = vmatpush3.bf16.msra.mxu1 %v2521_v8  ;;  %2267 = vmatprep.subr.bf16.mxu0 %v2522_v9  ;;  %s2872_s29 = smov (!%p248_p4, %s1997_s29), 63  ;;  %v2538_v25 = vld [vmem:[%s2863_s1 + $0x70] sm:$0xff]   ;;  %v2542_v29 = vld [vmem:[%s2863_s1 + $0x78] sm:$0xff]  }
   0xf   : > { %2379 = vmatprep.subr.bf16.mxu1 %v2523_v10  ;;  %v2539_v26 = vld [vmem:[%s2863_s1 + $0xf0] sm:$0xff]   ;;  %s2135_s30 = sshll.u32 %s2872_s29, 3  ;;  %v2543_v30 = vld [vmem:[%s2863_s1 + $0xf8] sm:$0xff]   ;;  %s2003_s26 = sshll.u32 %s2872_s29, 2 }
  0x10   : > { %v2540_v27 = vld [vmem:[%s2863_s1 + $0x30] sm:$0xff]   ;;  %s2715_s12 = scalar_lea.vmem %s2862_s0, %s2135_s30  ;;  %v2544_v31 = vld [vmem:[%s2863_s1 + $0x38] sm:$0xff]   ;;  %s2734_s23 = scalar_lea.vmem %s2864_s2, %s2135_s30 }
  0x11   : > { %2268 = vmatpush3.bf16.msra.mxu0 %v2524_v11  ;;  %v2541_v28 = vld [vmem:[%s2863_s1 + $0xb0] sm:$0xff]   ;;  %v2545_v32 = vld [vmem:[%s2863_s1 + $0xb8] sm:$0xff]   ;;  %v313_v33 = vld [vmem:[%s2715_s12] sm:$0xff]  ;;  %s2805_s30 = scalar_lea.vmem %s2866_s4, %s2003_s26 }
  0x12   : > { %2380 = vmatpush3.bf16.msra.mxu1 %v2525_v12  ;;  %2269 = vmatprep.subr.bf16.mxu0 %v2526_v13  ;;  %v314_v34 = vld [vmem:[%s2715_s12 + $0x8] sm:$0xff]  ;;  %v315_v35 = vld [vmem:[%s2715_s12 + $0x10] sm:$0xff]  ;;  %v345_v36 = vunpack.c.l.s8.bf16 %v313_v33  ;;  %v346_v38 = vunpack.c.h.s8.bf16 %v313_v33  ;;  %v316_v40 = vld [vmem:[%s2715_s12 + $0x18] sm:$0xff] }
  0x13   : > { %2381 = vmatprep.subr.bf16.mxu1 %v2527_v14  ;;  %v347_v37 = vunpack.c.l.s8.bf16 %v314_v34  ;;  %v348_v39 = vunpack.c.h.s8.bf16 %v314_v34  ;;  %v349_v41 = vunpack.c.l.s8.bf16 %v315_v35  ;;  %v351_v42 = vunpack.c.l.s8.bf16 %v316_v40  ;;  %v317_v51 = vld [vmem:[%s2715_s12 + $0x20] sm:$0xff]  ;;  %v318_v52 = vld [vmem:[%s2715_s12 + $0x28] sm:$0xff]  ;;  %v1440_v58 = vld [vmem:[%s2734_s23 + $0x10] sm:$0xff] }
  0x14   : > { %v350_v43 = vunpack.c.h.s8.bf16 %v315_v35  ;;  %v352_v44 = vunpack.c.h.s8.bf16 %v316_v40  ;;  %v353_v53 = vunpack.c.l.s8.bf16 %v317_v51  ;;  %v355_v54 = vunpack.c.l.s8.bf16 %v318_v52  ;;  %v1438_v57 = vld [vmem:[%s2734_s23] sm:$0xff]  ;;  %1482 = vperm.xlu1 %2513, %v1440_v58   ;;  %v1439_v59 = vld [vmem:[%s2734_s23 + $0x8] sm:$0xff]  ;;  %v1441_v62 = vld [vmem:[%s2734_s23 + $0x18] sm:$0xff] }
  0x15   : > { %2270 = vmatpush3.bf16.msra.mxu0 %v2528_v15  ;;  %v2005_v45 = vcombine.high %v345_v36, %v347_v37  ;;  %v2007_v46 = vcombine.high %v346_v38, %v348_v39  ;;  %v2004_v47 = vcombine.low %v345_v36, %v347_v37  ;;  %v2006_v48 = vcombine.low %v346_v38, %v348_v39  ;;  %v319_v1 = vld [vmem:[%s2715_s12 + $0x30] sm:$0xff]  ;;  %v320_v2 = vld [vmem:[%s2715_s12 + $0x38] sm:$0xff]  ;;  %v1442_v3 = vld [vmem:[%s2734_s23 + $0x20] sm:$0xff] }
  0x16   : > { %2382 = vmatpush3.bf16.msra.mxu1 %v2529_v16  ;;  %2271 = vmatprep.subr.bf16.mxu0 %v2530_v17  ;;  %v2009_v49 = vcombine.high %v349_v41, %v351_v42  ;;  %v2011_v50 = vcombine.high %v350_v43, %v352_v44  ;;  %v354_v55 = vunpack.c.h.s8.bf16 %v317_v51  ;;  %v356_v56 = vunpack.c.h.s8.bf16 %v318_v52  ;;  %v1443_v4 = vld [vmem:[%s2734_s23 + $0x28] sm:$0xff]  ;;  %v1444_v9 = vld [vmem:[%s2734_s23 + $0x30] sm:$0xff]  ;;  %v1445_v12 = vld [vmem:[%s2734_s23 + $0x38] sm:$0xff] }
  0x17   : > { %2383 = vmatprep.subr.bf16.mxu1 %v2531_v18  ;;  %1049 = vmatprep.mubr.bf16.mxu0 %v2005_v45  ;;  %v2008_v60 = vcombine.low %v349_v41, %v351_v42  ;;  %v2010_v61 = vcombine.low %v350_v43, %v352_v44  ;;  %v2013_v63 = vcombine.high %v353_v53, %v355_v54  ;;  %v357_v5 = vunpack.c.l.s8.bf16 %v319_v1  ;;  %v321_v15 = vld [vmem:[%s2715_s12 + $0x40] sm:$0xff]  ;;  %v322_v16 = vld [vmem:[%s2715_s12 + $0x48] sm:$0xff]  ;;  %v1452_v37 = vld [vmem:[%s2734_s23 + $0x70] sm:$0xff] }
  0x18   : > { %1210 = vmatprep.mubr.bf16.mxu1 %v2007_v46  ;;  %1472 = vperm.xlu0 %2512, %v1438_v57   ;;  %v2015_v0 = vcombine.high %v354_v55, %v356_v56  ;;  %v359_v6 = vunpack.c.l.s8.bf16 %v320_v2  ;;  %v358_v7 = vunpack.c.h.s8.bf16 %v319_v1  ;;  %v360_v8 = vunpack.c.h.s8.bf16 %v320_v2  ;;  %v1446_v17 = vld [vmem:[%s2734_s23 + $0x40] sm:$0xff]  ;;  %v1447_v18 = vld [vmem:[%s2734_s23 + $0x48] sm:$0xff]  ;;  %v1453_v40 = vld [vmem:[%s2734_s23 + $0x78] sm:$0xff] }
  0x19   : > { %2272 = vmatpush3.bf16.msra.mxu0 %v2532_v19  ;;  %1487 = vperm.xlu1 %2513, %v1441_v62   ;;  %v2012_v10 = vcombine.low %v353_v53, %v355_v54  ;;  %v2014_v11 = vcombine.low %v354_v55, %v356_v56  ;;  %v361_v19 = vunpack.c.l.s8.bf16 %v321_v15  ;;  %v325_v43 = vld [vmem:[%s2715_s12 + $0x60] sm:$0xff]  ;;  %v326_v44 = vld [vmem:[%s2715_s12 + $0x68] sm:$0xff]  ;;  %v1456_v51 = vld [vmem:[%s2734_s23 + $0x90] sm:$0xff] }
  0x1a   : > { %2384 = vmatpush3.bf16.msra.mxu1 %v2533_v20  ;;  %2273 = vmatprep.subr.bf16.mxu0 %v2534_v21  ;;  %v2017_v13 = vcombine.high %v357_v5, %v359_v6  ;;  %v2019_v14 = vcombine.high %v358_v7, %v360_v8  ;;  %v363_v20 = vunpack.c.l.s8.bf16 %v322_v16  ;;  %v362_v21 = vunpack.c.h.s8.bf16 %v321_v15  ;;  %v1454_v45 = vld [vmem:[%s2734_s23 + $0x80] sm:$0xff]  ;;  %v1455_v46 = vld [vmem:[%s2734_s23 + $0x88] sm:$0xff]  ;;  %v1457_v54 = vld [vmem:[%s2734_s23 + $0x98] sm:$0xff] }
  0x1b   : > { %2385 = vmatprep.subr.bf16.mxu1 %v2535_v22  ;;  %v364_v22 = vunpack.c.h.s8.bf16 %v322_v16  ;;  %v327_v57 = vld [vmem:[%s2715_s12 + $0x70] sm:$0xff]  ;;  %v328_v58 = vld [vmem:[%s2715_s12 + $0x78] sm:$0xff] }
  0x1c   : > { %1477 = vperm.xlu0 %2512, %v1439_v59   ;;  %v2020_v38 = vcombine.low %v361_v19, %v363_v20  ;;  %v1458_v59 = vld [vmem:[%s2734_s23 + $0xa0] sm:$0xff]  ;;  %v375_v62 = vunpack.c.l.s8.bf16 %v328_v58  ;;  %v1460_v1 = vld [vmem:[%s2734_s23 + $0xb0] sm:$0xff] }
  0x1d   : > { %2274 = vmatpush3.bf16.msra.mxu0 %v2536_v23  ;;  %1497 = vperm.xlu1 %2513, %v1443_v4   ;;  %v1448_v23 = vld [vmem:[%s2734_s23 + $0x50] sm:$0xff]  ;;  %v2022_v39 = vcombine.low %v362_v21, %v364_v22  ;;  %v1461_v4 = vld [vmem:[%s2734_s23 + $0xb8] sm:$0xff] }
  0x1e   : > { %2386 = vmatpush3.bf16.msra.mxu1 %v2537_v24  ;;  %2275 = vmatprep.subr.bf16.mxu0 %v2538_v25  ;;  %v2016_v24 = vcombine.low %v357_v5, %v359_v6  ;;  %v2018_v25 = vcombine.low %v358_v7, %v360_v8  ;;  %v329_v7 = vld [vmem:[%s2715_s12 + $0x80] sm:$0xff]  ;;  %v330_v8 = vld [vmem:[%s2715_s12 + $0x88] sm:$0xff]  ;;  %v1464_v15 = vld [vmem:[%s2734_s23 + $0xd0] sm:$0xff] }
  0x1f   : > { %2387 = vmatprep.subr.bf16.mxu1 %v2539_v26  ;;  %v1449_v26 = vld [vmem:[%s2734_s23 + $0x58] sm:$0xff] }
  0x20   : > { %1492 = vperm.xlu0 %2512, %v1442_v3  }
  0x21   : > { %2276 = vmatpush3.bf16.msra.mxu0 %v2540_v27  ;;  %1507 = vperm.xlu1 %2513, %v1445_v12   ;;  %v2021_v27 = vcombine.high %v361_v19, %v363_v20  ;;  %v379_v12 = vunpack.c.l.s8.bf16 %v330_v8 }
  0x22   : > { %2388 = vmatpush3.bf16.msra.mxu1 %v2541_v28  ;;  %2277 = vmatprep.subr.bf16.mxu0 %v2542_v29  ;;  %v2023_v28 = vcombine.high %v362_v21, %v364_v22  ;;  %v323_v29 = vld [vmem:[%s2715_s12 + $0x50] sm:$0xff]  ;;  %v332_v22 = vld [vmem:[%s2715_s12 + $0x98] sm:$0xff] }
  0x23   : > { %2389 = vmatprep.subr.bf16.mxu1 %v2543_v30  ;;  %v324_v30 = vld [vmem:[%s2715_s12 + $0x58] sm:$0xff]  ;;  %v365_v33 = vunpack.c.l.s8.bf16 %v323_v29  ;;  %v366_v35 = vunpack.c.h.s8.bf16 %v323_v29  ;;  %v331_v21 = vld [vmem:[%s2715_s12 + $0x90] sm:$0xff] }
  0x24   : > { %1502 = vperm.xlu0 %2512, %v1444_v9   ;;  %v367_v34 = vunpack.c.l.s8.bf16 %v324_v30  ;;  %v368_v36 = vunpack.c.h.s8.bf16 %v324_v30  ;;  %v1462_v9 = vld [vmem:[%s2734_s23 + $0xc0] sm:$0xff]  ;;  %v1468_v29 = vld [vmem:[%s2734_s23 + $0xf0] sm:$0xff] }
  0x25   : > { %2278 = vmatpush3.bf16.msra.mxu0 %v2544_v31  ;;  %1517 = vperm.xlu1 %2513, %v1447_v18   ;;  %v1450_v31 = vld [vmem:[%s2734_s23 + $0x60] sm:$0xff]  ;;  %v1465_v18 = vld [vmem:[%s2734_s23 + $0xd8] sm:$0xff] }
  0x26   : > { %2390 = vmatpush3.bf16.msra.mxu1 %v2545_v32  ;;  %v1451_v32 = vld [vmem:[%s2734_s23 + $0x68] sm:$0xff]  ;;  %v2025_v41 = vcombine.high %v365_v33, %v367_v34  ;;  %v2027_v42 = vcombine.high %v366_v35, %v368_v36  ;;  %v2024_v52 = vcombine.low %v365_v33, %v367_v34  ;;  %v2026_v53 = vcombine.low %v366_v35, %v368_v36  ;;  %v333_v35 = vld [vmem:[%s2715_s12 + $0xa0] sm:$0xff] }
  0x27   : > { %v334_v36 = vld [vmem:[%s2715_s12 + $0xa8] sm:$0xff] }
  0x28   : > { %1050 = vmatmul.mubr.bf16.vlgmr.msra.gmra.mrb[0].mxu0 %v2004_v47  ;;  %1512 = vperm.xlu0 %2512, %v1446_v17   ;;  %v369_v47 = vunpack.c.l.s8.bf16 %v325_v43 }
  0x29   : > { %1211 = vmatmul.mubr.bf16.vlgmr.msra.gmra.mrb[0].mxu1 %v2006_v48  ;;  %1057 = vmatprep.mubr.bf16.mxu0 %v2009_v49  ;;  %v371_v48 = vunpack.c.l.s8.bf16 %v326_v44  ;;  %v370_v49 = vunpack.c.h.s8.bf16 %v325_v43 }
  0x2a   : > { %1218 = vmatprep.mubr.bf16.mxu1 %v2011_v50  ;;  %1527 = vperm.xlu1 %2513, %v1449_v26   ;;  %v372_v50 = vunpack.c.h.s8.bf16 %v326_v44  ;;  %v383_v26 = vunpack.c.l.s8.bf16 %v332_v22 }
  0x2b   : > { %v2029_v55 = vcombine.high %v369_v47, %v371_v48  ;;  %v2028_v2 = vcombine.low %v369_v47, %v371_v48 }
  0x2c   : > { %1522 = vperm.xlu0 %2512, %v1448_v23   ;;  %v2031_v56 = vcombine.high %v370_v49, %v372_v50  ;;  %v2030_v3 = vcombine.low %v370_v49, %v372_v50  ;;  %v1466_v23 = vld [vmem:[%s2734_s23 + $0xe0] sm:$0xff] }
  0x2e   : > { %1537 = vperm.xlu1 %2513, %v1451_v32   ;;  %v1469_v32 = vld [vmem:[%s2734_s23 + $0xf8] sm:$0xff] }
  0x30   : > { %1058 = vmatmul.mubr.bf16.gmra.mrb[4].mxu0 %v2008_v60  ;;  %1532 = vperm.xlu0 %2512, %v1450_v31   ;;  %v1459_v60 = vld [vmem:[%s2734_s23 + $0xa8] sm:$0xff] }
  0x31   : > { %1219 = vmatmul.mubr.bf16.gmra.mrb[4].mxu1 %v2010_v61  ;;  %1065 = vmatprep.mubr.bf16.mxu0 %v2013_v63  ;;  %v373_v61 = vunpack.c.l.s8.bf16 %v327_v57  ;;  %v374_v63 = vunpack.c.h.s8.bf16 %v327_v57 }
  0x32   : > { %1226 = vmatprep.mubr.bf16.mxu1 %v2015_v0  ;;  %1547 = vperm.xlu1 %2513, %v1453_v40   ;;  %v376_v0 = vunpack.c.h.s8.bf16 %v328_v58  ;;  %v388_v40 = vunpack.c.h.s8.bf16 %v334_v36 }
  0x33   : > { %v2033_v5 = vcombine.high %v373_v61, %v375_v62  ;;  %v2032_v16 = vcombine.low %v373_v61, %v375_v62 }
  0x34   : > { %1542 = vperm.xlu0 %2512, %v1452_v37   ;;  %v2035_v6 = vcombine.high %v374_v63, %v376_v0  ;;  %v2034_v17 = vcombine.low %v374_v63, %v376_v0  ;;  %v385_v37 = vunpack.c.l.s8.bf16 %v333_v35 }
  0x36   : > { %1557 = vperm.xlu1 %2513, %v1455_v46   ;;  %v336_v46 = vld [vmem:[%s2715_s12 + $0xb8] sm:$0xff] }
  0x37   : > { %v391_v48 = vunpack.c.l.s8.bf16 %v336_v46  ;;  %v392_v50 = vunpack.c.h.s8.bf16 %v336_v46 }
  0x38   : > { %1066 = vmatmul.mubr.bf16.gmra.mrb[8].mxu0 %v2012_v10  ;;  %1552 = vperm.xlu0 %2512, %v1454_v45   ;;  %v1463_v10 = vld [vmem:[%s2734_s23 + $0xc8] sm:$0xff]  ;;  %v335_v45 = vld [vmem:[%s2715_s12 + $0xb0] sm:$0xff] }
  0x39   : > { %1227 = vmatmul.mubr.bf16.gmra.mrb[8].mxu1 %v2014_v11  ;;  %1073 = vmatprep.mubr.bf16.mxu0 %v2017_v13  ;;  %v377_v11 = vunpack.c.l.s8.bf16 %v329_v7  ;;  %v378_v13 = vunpack.c.h.s8.bf16 %v329_v7  ;;  %v389_v47 = vunpack.c.l.s8.bf16 %v335_v45  ;;  %v390_v49 = vunpack.c.h.s8.bf16 %v335_v45 }
  0x3a   : > { %1234 = vmatprep.mubr.bf16.mxu1 %v2019_v14  ;;  %1567 = vperm.xlu1 %2513, %v1457_v54   ;;  %v380_v14 = vunpack.c.h.s8.bf16 %v330_v8 }
  0x3b   : > { %v2037_v19 = vcombine.high %v377_v11, %v379_v12  ;;  %v2036_v30 = vcombine.low %v377_v11, %v379_v12  ;;  %v2051_v54 = vcombine.high %v390_v49, %v392_v50  ;;  %v2048_v61 = vcombine.low %v389_v47, %v391_v48  ;;  %v341_v11 = vld [vmem:[%s2715_s12 + $0xe0] sm:$0xff]  ;;  %v342_v12 = vld [vmem:[%s2715_s12 + $0xe8] sm:$0xff] }
  0x3c   : > { %1562 = vperm.xlu0 %2512, %v1456_v51   ;;  %v2039_v20 = vcombine.high %v378_v13, %v380_v14  ;;  %v2038_v31 = vcombine.low %v378_v13, %v380_v14  ;;  %v2050_v62 = vcombine.low %v390_v49, %v392_v50  ;;  %v401_v13 = vunpack.c.l.s8.bf16 %v341_v11 }
  0x3d   : > { %v403_v14 = vunpack.c.l.s8.bf16 %v342_v12 }
  0x3e   : > { %1577 = vperm.xlu1 %2513, %v1459_v60  }
  0x40   : > { %1074 = vmatmul.mubr.bf16.gmra.mrb[12].mxu0 %v2016_v24  ;;  %1572 = vperm.xlu0 %2512, %v1458_v59   ;;  %v1467_v24 = vld [vmem:[%s2734_s23 + $0xe8] sm:$0xff] }
  0x41   : > { %1235 = vmatmul.mubr.bf16.gmra.mrb[12].mxu1 %v2018_v25  ;;  %1081 = vmatprep.mubr.bf16.mxu0 %v2021_v27  ;;  %v381_v25 = vunpack.c.l.s8.bf16 %v331_v21  ;;  %v382_v27 = vunpack.c.h.s8.bf16 %v331_v21  ;;  %v343_v21 = vld [vmem:[%s2715_s12 + $0xf0] sm:$0xff] }
  0x42   : > { %1242 = vmatprep.mubr.bf16.mxu1 %v2023_v28  ;;  %1587 = vperm.xlu1 %2513, %v1461_v4   ;;  %v384_v28 = vunpack.c.h.s8.bf16 %v332_v22  ;;  %v344_v22 = vld [vmem:[%s2715_s12 + $0xf8] sm:$0xff] }
  0x43   : > { %v2041_v33 = vcombine.high %v381_v25, %v383_v26 }
  0x44   : > { %1582 = vperm.xlu0 %2512, %v1460_v1   ;;  %v2043_v34 = vcombine.high %v382_v27, %v384_v28  ;;  %v339_v1 = vld [vmem:[%s2715_s12 + $0xd0] sm:$0xff] }
  0x46   : > { %1597 = vperm.xlu1 %2513, %v1463_v10  }
  0x48   : > { %1082 = vmatmul.mubr.bf16.gmra.mrb[16].mxu0 %v2020_v38  ;;  %1592 = vperm.xlu0 %2512, %v1462_v9   ;;  %v387_v38 = vunpack.c.l.s8.bf16 %v334_v36 }
  0x49   : > { %1243 = vmatmul.mubr.bf16.gmra.mrb[16].mxu1 %v2022_v39  ;;  %1089 = vmatprep.mubr.bf16.mxu0 %v2025_v41  ;;  %v386_v39 = vunpack.c.h.s8.bf16 %v333_v35  ;;  %v2040_v41 = vcombine.low %v381_v25, %v383_v26  ;;  %v406_v25 = vunpack.c.h.s8.bf16 %v343_v21  ;;  %v408_v26 = vunpack.c.h.s8.bf16 %v344_v22 }
  0x4a   : > { %1250 = vmatprep.mubr.bf16.mxu1 %v2027_v42  ;;  %1607 = vperm.xlu1 %2513, %v1465_v18   ;;  %v2042_v42 = vcombine.low %v382_v27, %v384_v28  ;;  %v2045_v43 = vcombine.high %v385_v37, %v387_v38  ;;  %v2044_v51 = vcombine.low %v385_v37, %v387_v38 }
  0x4b   : > { %v2047_v44 = vcombine.high %v386_v39, %v388_v40  ;;  %v2060_v27 = vcombine.low %v401_v13, %v403_v14 }
  0x4c   : > { %1602 = vperm.xlu0 %2512, %v1464_v15   ;;  %v402_v15 = vunpack.c.h.s8.bf16 %v341_v11 }
  0x4e   : > { %1617 = vperm.xlu1 %2513, %v1467_v24   ;;  %v407_v24 = vunpack.c.l.s8.bf16 %v344_v22 }
  0x50   : > { %1090 = vmatmul.mubr.bf16.gmra.mrb[20].mxu0 %v2024_v52  ;;  %1612 = vperm.xlu0 %2512, %v1466_v23   ;;  %v2046_v52 = vcombine.low %v386_v39, %v388_v40  ;;  %v405_v23 = vunpack.c.l.s8.bf16 %v343_v21 }
  0x51   : > { %1251 = vmatmul.mubr.bf16.gmra.mrb[20].mxu1 %v2026_v53  ;;  %1097 = vmatprep.mubr.bf16.mxu0 %v2029_v55  ;;  %v2049_v53 = vcombine.high %v389_v47, %v391_v48  ;;  %v337_v55 = vld [vmem:[%s2715_s12 + $0xc0] sm:$0xff] }
  0x52   : > { %1258 = vmatprep.mubr.bf16.mxu1 %v2031_v56  ;;  %1627 = vperm.xlu1 %2513, %v1469_v32   ;;  %v338_v56 = vld [vmem:[%s2715_s12 + $0xc8] sm:$0xff]  ;;  %v393_v57 = vunpack.c.l.s8.bf16 %v337_v55  ;;  %v394_v59 = vunpack.c.h.s8.bf16 %v337_v55  ;;  %v2066_v32 = vcombine.low %v406_v25, %v408_v26  ;;  %v2797_v47 = vld [vmem:[%s2865_s3] ss:$0 sm:$0xff] }
  0x53   : > { %v395_v58 = vunpack.c.l.s8.bf16 %v338_v56  ;;  %v396_v60 = vunpack.c.h.s8.bf16 %v338_v56 }
  0x54   : > { %1622 = vperm.xlu0 %2512, %v1468_v29   ;;  %v2065_v29 = vcombine.high %v405_v23, %v407_v24 }
  0x55   : > { %v2053_v63 = vcombine.high %v393_v57, %v395_v58  ;;  %v2055_v0 = vcombine.high %v394_v59, %v396_v60  ;;  %v2052_v7 = vcombine.low %v393_v57, %v395_v58  ;;  %v2054_v8 = vcombine.low %v394_v59, %v396_v60 }
  0x58   : > { %1098 = vmatmul.mubr.bf16.gmra.mrb[24].mxu0 %v2028_v2  ;;  %v340_v2 = vld [vmem:[%s2715_s12 + $0xd8] sm:$0xff] }
  0x59   : > { %1259 = vmatmul.mubr.bf16.gmra.mrb[24].mxu1 %v2030_v3  ;;  %1105 = vmatprep.mubr.bf16.mxu0 %v2033_v5  ;;  %v397_v3 = vunpack.c.l.s8.bf16 %v339_v1  ;;  %v399_v4 = vunpack.c.l.s8.bf16 %v340_v2  ;;  %v398_v5 = vunpack.c.h.s8.bf16 %v339_v1 }
  0x5a   : > { %1266 = vmatprep.mubr.bf16.mxu1 %v2035_v6  ;;  %v400_v6 = vunpack.c.h.s8.bf16 %v340_v2 }
  0x5b   : > { %v2057_v9 = vcombine.high %v397_v3, %v399_v4 }
  0x5c   : > { %v2059_v10 = vcombine.high %v398_v5, %v400_v6  ;;  %v2058_v18 = vcombine.low %v398_v5, %v400_v6 }
  0x60   : > { %1106 = vmatmul.mubr.bf16.gmra.mrb[28].mxu0 %v2032_v16  ;;  %v404_v16 = vunpack.c.h.s8.bf16 %v342_v12 }
  0x61   : > { %1267 = vmatmul.mubr.bf16.gmra.mrb[28].mxu1 %v2034_v17  ;;  %1113 = vmatprep.mubr.bf16.mxu0 %v2037_v19  ;;  %v2056_v17 = vcombine.low %v397_v3, %v399_v4  ;;  %v2061_v19 = vcombine.high %v401_v13, %v403_v14 }
  0x62   : > { %1274 = vmatprep.mubr.bf16.mxu1 %v2039_v20  ;;  %v2063_v20 = vcombine.high %v402_v15, %v404_v16  ;;  %v2062_v28 = vcombine.low %v402_v15, %v404_v16 }
  0x68   : > { %1114 = vmatmul.mubr.bf16.gmra.mrb[32].mxu0 %v2036_v30  ;;  %v2067_v30 = vcombine.high %v406_v25, %v408_v26 }
  0x69   : > { %1275 = vmatmul.mubr.bf16.gmra.mrb[32].mxu1 %v2038_v31  ;;  %1121 = vmatprep.mubr.bf16.mxu0 %v2041_v33  ;;  %v2064_v31 = vcombine.low %v405_v23, %v407_v24 }
  0x6a   : > { %1282 = vmatprep.mubr.bf16.mxu1 %v2043_v34 }
  0x70   : > { %1122 = vmatmul.mubr.bf16.gmra.mrb[36].mxu0 %v2040_v41 }
  0x71   : > { %1283 = vmatmul.mubr.bf16.gmra.mrb[36].mxu1 %v2042_v42  ;;  %1129 = vmatprep.mubr.bf16.mxu0 %v2045_v43 }
  0x72   : > { %1290 = vmatprep.mubr.bf16.mxu1 %v2047_v44 }
  0x78   : > { %1130 = vmatmul.mubr.bf16.gmra.mrb[40].mxu0 %v2044_v51 }
  0x79   : > { %1291 = vmatmul.mubr.bf16.gmra.mrb[40].mxu1 %v2046_v52  ;;  %1137 = vmatprep.mubr.bf16.mxu0 %v2049_v53 }
  0x7a   : > { %1298 = vmatprep.mubr.bf16.mxu1 %v2051_v54 }
  0x80   : > { %1138 = vmatmul.mubr.bf16.gmra.mrb[44].mxu0 %v2048_v61 }
  0x81   : > { %1299 = vmatmul.mubr.bf16.gmra.mrb[44].mxu1 %v2050_v62  ;;  %1145 = vmatprep.mubr.bf16.mxu0 %v2053_v63 }
  0x82   : > { %1306 = vmatprep.mubr.bf16.mxu1 %v2055_v0 }
  0x88   : > { %1146 = vmatmul.mubr.bf16.gmra.mrb[48].mxu0 %v2052_v7 }
  0x89   : > { %1307 = vmatmul.mubr.bf16.gmra.mrb[48].mxu1 %v2054_v8  ;;  %1153 = vmatprep.mubr.bf16.mxu0 %v2057_v9 }
  0x8a   : > { %1314 = vmatprep.mubr.bf16.mxu1 %v2059_v10 }
  0x90   : > { %1154 = vmatmul.mubr.bf16.gmra.mrb[52].mxu0 %v2056_v17 }
  0x91   : > { %1315 = vmatmul.mubr.bf16.gmra.mrb[52].mxu1 %v2058_v18  ;;  %1161 = vmatprep.mubr.bf16.mxu0 %v2061_v19 }
  0x92   : > { %1322 = vmatprep.mubr.bf16.mxu1 %v2063_v20 }
  0x93   : > { %v1483_v51 = vpop.permute.xlu1 %1482 }
  0x97   : > { %v1473_v33 = vpop.permute.xlu0 %1472 }
  0x98   : > { %1162 = vmatmul.mubr.bf16.gmra.mrb[56].mxu0 %v2060_v27  ;;  %v1488_v9 = vpop.permute.xlu1 %1487 }
  0x99   : > { %1323 = vmatmul.mubr.bf16.gmra.mrb[56].mxu1 %v2062_v28  ;;  %1169 = vmatprep.mubr.bf16.mxu0 %v2065_v29 }
  0x9a   : > { %1330 = vmatprep.mubr.bf16.mxu1 %v2067_v30 }
  0x9b   : > { %v1478_v48 = vpop.permute.xlu0 %1477 }
  0x9f   : > { %v1493_v28 = vpop.permute.xlu0 %1492 }
  0xa0   : > { %1170 = vmatmul.mubr.bf16.gmra.mrb[60].mxu0 %v2064_v31 }
  0xa1   : > { %1331 = vmatmul.mubr.bf16.gmra.mrb[60].mxu1 %v2066_v32  ;;  %v1498_v32 = vpop.permute.xlu1 %1497 }
  0xfb   : > { %v2279_v34 = vpop.f32.mrb[0].mxu0 }
  0xfc   : > { %v2391_v35 = vpop.f32.mrb[0].mxu1  ;;  %v2280_v36 = vpop.f32.mrb[1].mxu0 }
  0xfd   : > { %v2392_v37 = vpop.f32.mrb[1].mxu1  ;;  %v2281_v38 = vadd.f32 %v2280_v36, %v2279_v34  ;;  %v2282_v40 = vpop.f32.mrb[2].mxu0 }
  0xfe   : > { %v2393_v39 = vadd.f32 %v2392_v37, %v2391_v35  ;;  %v2394_v41 = vpop.f32.mrb[2].mxu1  ;;  %v2283_v42 = vpop.f32.mrb[3].mxu0 }
  0xff   : > { %v2395_v43 = vpop.f32.mrb[3].mxu1  ;;  %v2284_v45 = vadd.f32 %v2283_v42, %v2282_v40 }
 0x100   : > { %v1213_v44 = vadd.f32 %v2393_v39, %v2281_v38  ;;  %v2396_v46 = vadd.f32 %v2395_v43, %v2394_v41 }
 0x102   : > { %v1630_v49 = vmul.f32 %v1473_v33, %v1213_v44  ;;  %v1216_v50 = vadd.f32 %v2396_v46, %v2284_v45 }
 0x103   : > { %v2285_v54 = vpop.f32.mrb[4].mxu0 }
 0x104   : > { %v1669_v52 = vadd.f32 %v2797_v47, %v1630_v49  ;;  %v1631_v53 = vmul.f32 %v1478_v48, %v1216_v50  ;;  %v2397_v55 = vpop.f32.mrb[4].mxu1  ;;  %v2286_v56 = vpop.f32.mrb[5].mxu0 }
 0x105   : > { %v2398_v57 = vpop.f32.mrb[5].mxu1  ;;  %v2287_v59 = vadd.f32 %v2286_v56, %v2285_v54  ;;  %v2288_v61 = vpop.f32.mrb[6].mxu0 }
 0x106   : > { %v1670_v58 = vadd.f32 %v2797_v47, %v1631_v53  ;;  %v2399_v60 = vadd.f32 %v2398_v57, %v2397_v55  ;;  %v2400_v62 = vpop.f32.mrb[6].mxu1  ;;  %v1701_v63 = vmax.f32 %v1669_v52, 0.0  ;;  %v2289_v0 = vpop.f32.mrb[7].mxu0 }
 0x107   : > { %v2401_v1 = vpop.f32.mrb[7].mxu1  ;;  %v2290_v4 = vadd.f32 %v2289_v0, %v2288_v61  ;;  %v1503_v52 = vpop.permute.xlu0 %1502 }
 0x108   : > { %v1702_v2 = vmax.f32 %v1670_v58, 0.0  ;;  %v1221_v3 = vadd.f32 %v2399_v60, %v2287_v59  ;;  %v2402_v5 = vadd.f32 %v2401_v1, %v2400_v62  ;;  %v1508_v56 = vpop.permute.xlu1 %1507 }
 0x10a   : > { %v2171_v6 = vpack.c.bf16 %v1702_v2, %v1701_v63  ;;  %v1632_v7 = vmul.f32 %v1483_v51, %v1221_v3  ;;  %v1224_v8 = vadd.f32 %v2402_v5, %v2290_v4 }
 0x10b   : > { %v2291_v12 = vpop.f32.mrb[8].mxu0 }
 0x10c   : > { %2172 = vst [vmem:[%s2805_s30] sm:$0xff] %v2171_v6   ;;  %v1671_v10 = vadd.f32 %v2797_v47, %v1632_v7  ;;  %v1633_v11 = vmul.f32 %v1488_v9, %v1224_v8  ;;  %v2403_v13 = vpop.f32.mrb[8].mxu1  ;;  %v2292_v14 = vpop.f32.mrb[9].mxu0 }
 0x10d   : > { %v2404_v15 = vpop.f32.mrb[9].mxu1  ;;  %v2293_v17 = vadd.f32 %v2292_v14, %v2291_v12  ;;  %v2294_v19 = vpop.f32.mrb[10].mxu0 }
 0x10e   : > { %v1672_v16 = vadd.f32 %v2797_v47, %v1633_v11  ;;  %v2405_v18 = vadd.f32 %v2404_v15, %v2403_v13  ;;  %v2406_v20 = vpop.f32.mrb[10].mxu1  ;;  %v1703_v21 = vmax.f32 %v1671_v10, 0.0  ;;  %v2295_v22 = vpop.f32.mrb[11].mxu0 }
 0x10f   : > { %v2407_v23 = vpop.f32.mrb[11].mxu1  ;;  %v2296_v26 = vadd.f32 %v2295_v22, %v2294_v19  ;;  %v1513_v11 = vpop.permute.xlu0 %1512 }
 0x110   : > { %v1704_v24 = vmax.f32 %v1672_v16, 0.0  ;;  %v1229_v25 = vadd.f32 %v2405_v18, %v2293_v17  ;;  %v2408_v27 = vadd.f32 %v2407_v23, %v2406_v20  ;;  %v1518_v15 = vpop.permute.xlu1 %1517 }
 0x112   : > { %v2176_v29 = vpack.c.bf16 %v1704_v24, %v1703_v21  ;;  %v1634_v30 = vmul.f32 %v1493_v28, %v1229_v25  ;;  %v1232_v31 = vadd.f32 %v2408_v27, %v2296_v26 }
 0x113   : > { %v2297_v35 = vpop.f32.mrb[12].mxu0 }
 0x114   : > { %2248 = vst [vmem:[%s2805_s30 + $0x8] sm:$0xff] %v2176_v29   ;;  %v1673_v33 = vadd.f32 %v2797_v47, %v1634_v30  ;;  %v1635_v34 = vmul.f32 %v1498_v32, %v1232_v31  ;;  %v2409_v36 = vpop.f32.mrb[12].mxu1  ;;  %v2298_v37 = vpop.f32.mrb[13].mxu0 }
 0x115   : > { %v2410_v38 = vpop.f32.mrb[13].mxu1  ;;  %v2299_v40 = vadd.f32 %v2298_v37, %v2297_v35  ;;  %v2300_v42 = vpop.f32.mrb[14].mxu0 }
 0x116   : > { %v1674_v39 = vadd.f32 %v2797_v47, %v1635_v34  ;;  %v2411_v41 = vadd.f32 %v2410_v38, %v2409_v36  ;;  %v2412_v43 = vpop.f32.mrb[14].mxu1  ;;  %v1705_v44 = vmax.f32 %v1673_v33, 0.0  ;;  %v2301_v45 = vpop.f32.mrb[15].mxu0 }
 0x117   : > { %v2413_v46 = vpop.f32.mrb[15].mxu1  ;;  %v2302_v50 = vadd.f32 %v2301_v45, %v2300_v42  ;;  %v1523_v34 = vpop.permute.xlu0 %1522 }
 0x118   : > { %v1706_v48 = vmax.f32 %v1674_v39, 0.0  ;;  %v1237_v49 = vadd.f32 %v2411_v41, %v2299_v40  ;;  %v2414_v51 = vadd.f32 %v2413_v46, %v2412_v43  ;;  %v1528_v38 = vpop.permute.xlu1 %1527 }
 0x11a   : > { %v2181_v53 = vpack.c.bf16 %v1706_v48, %v1705_v44  ;;  %v1636_v54 = vmul.f32 %v1503_v52, %v1237_v49  ;;  %v1240_v55 = vadd.f32 %v2414_v51, %v2302_v50 }
 0x11b   : > { %v2303_v59 = vpop.f32.mrb[16].mxu0 }
 0x11c   : > { %2249 = vst [vmem:[%s2805_s30 + $0x10] sm:$0xff] %v2181_v53   ;;  %v1675_v57 = vadd.f32 %v2797_v47, %v1636_v54  ;;  %v1637_v58 = vmul.f32 %v1508_v56, %v1240_v55  ;;  %v2415_v60 = vpop.f32.mrb[16].mxu1  ;;  %v2304_v61 = vpop.f32.mrb[17].mxu0 }
 0x11d   : > { %v2416_v62 = vpop.f32.mrb[17].mxu1  ;;  %v2305_v0 = vadd.f32 %v2304_v61, %v2303_v59  ;;  %v2306_v2 = vpop.f32.mrb[18].mxu0 }
 0x11e   : > { %v1676_v63 = vadd.f32 %v2797_v47, %v1637_v58  ;;  %v2417_v1 = vadd.f32 %v2416_v62, %v2415_v60  ;;  %v2418_v3 = vpop.f32.mrb[18].mxu1  ;;  %v1707_v4 = vmax.f32 %v1675_v57, 0.0  ;;  %v2307_v5 = vpop.f32.mrb[19].mxu0 }
 0x11f   : > { %v2419_v6 = vpop.f32.mrb[19].mxu1  ;;  %v2308_v9 = vadd.f32 %v2307_v5, %v2306_v2  ;;  %v1533_v58 = vpop.permute.xlu0 %1532 }
 0x120   : > { %v1708_v7 = vmax.f32 %v1676_v63, 0.0  ;;  %v1245_v8 = vadd.f32 %v2417_v1, %v2305_v0  ;;  %v2420_v10 = vadd.f32 %v2419_v6, %v2418_v3  ;;  %v1538_v62 = vpop.permute.xlu1 %1537 }
 0x122   : > { %v2186_v12 = vpack.c.bf16 %v1708_v7, %v1707_v4  ;;  %v1638_v13 = vmul.f32 %v1513_v11, %v1245_v8  ;;  %v1248_v14 = vadd.f32 %v2420_v10, %v2308_v9 }
 0x123   : > { %v2309_v18 = vpop.f32.mrb[20].mxu0 }
 0x124   : > { %2250 = vst [vmem:[%s2805_s30 + $0x18] sm:$0xff] %v2186_v12   ;;  %v1677_v16 = vadd.f32 %v2797_v47, %v1638_v13  ;;  %v1639_v17 = vmul.f32 %v1518_v15, %v1248_v14  ;;  %v2421_v19 = vpop.f32.mrb[20].mxu1  ;;  %v2310_v20 = vpop.f32.mrb[21].mxu0 }
 0x125   : > { %v2422_v21 = vpop.f32.mrb[21].mxu1  ;;  %v2311_v23 = vadd.f32 %v2310_v20, %v2309_v18  ;;  %v2312_v25 = vpop.f32.mrb[22].mxu0 }
 0x126   : > { %v1678_v22 = vadd.f32 %v2797_v47, %v1639_v17  ;;  %v2423_v24 = vadd.f32 %v2422_v21, %v2421_v19  ;;  %v2424_v26 = vpop.f32.mrb[22].mxu1  ;;  %v1709_v27 = vmax.f32 %v1677_v16, 0.0  ;;  %v2313_v28 = vpop.f32.mrb[23].mxu0 }
 0x127   : > { %v2425_v29 = vpop.f32.mrb[23].mxu1  ;;  %v2314_v32 = vadd.f32 %v2313_v28, %v2312_v25  ;;  %v1543_v17 = vpop.permute.xlu0 %1542 }
 0x128   : > { %v1710_v30 = vmax.f32 %v1678_v22, 0.0  ;;  %v1253_v31 = vadd.f32 %v2423_v24, %v2311_v23  ;;  %v2426_v33 = vadd.f32 %v2425_v29, %v2424_v26  ;;  %v1548_v21 = vpop.permute.xlu1 %1547 }
 0x12a   : > { %v2191_v35 = vpack.c.bf16 %v1710_v30, %v1709_v27  ;;  %v1640_v36 = vmul.f32 %v1523_v34, %v1253_v31  ;;  %v1256_v37 = vadd.f32 %v2426_v33, %v2314_v32 }
 0x12b   : > { %v2315_v41 = vpop.f32.mrb[24].mxu0 }
 0x12c   : > { %2251 = vst [vmem:[%s2805_s30 + $0x20] sm:$0xff] %v2191_v35   ;;  %v1679_v39 = vadd.f32 %v2797_v47, %v1640_v36  ;;  %v1641_v40 = vmul.f32 %v1528_v38, %v1256_v37  ;;  %v2427_v42 = vpop.f32.mrb[24].mxu1  ;;  %v2316_v43 = vpop.f32.mrb[25].mxu0 }
 0x12d   : > { %v2428_v44 = vpop.f32.mrb[25].mxu1  ;;  %v2317_v46 = vadd.f32 %v2316_v43, %v2315_v41  ;;  %v2318_v49 = vpop.f32.mrb[26].mxu0 }
 0x12e   : > { %v1680_v45 = vadd.f32 %v2797_v47, %v1641_v40  ;;  %v2429_v48 = vadd.f32 %v2428_v44, %v2427_v42  ;;  %v2430_v50 = vpop.f32.mrb[26].mxu1  ;;  %v1711_v51 = vmax.f32 %v1679_v39, 0.0  ;;  %v2319_v52 = vpop.f32.mrb[27].mxu0 }
 0x12f   : > { %v2431_v53 = vpop.f32.mrb[27].mxu1  ;;  %v2320_v56 = vadd.f32 %v2319_v52, %v2318_v49  ;;  %v1553_v40 = vpop.permute.xlu0 %1552 }
 0x130   : > { %v1712_v54 = vmax.f32 %v1680_v45, 0.0  ;;  %v1261_v55 = vadd.f32 %v2429_v48, %v2317_v46  ;;  %v2432_v57 = vadd.f32 %v2431_v53, %v2430_v50  ;;  %v1558_v44 = vpop.permute.xlu1 %1557 }
 0x132   : > { %v2196_v59 = vpack.c.bf16 %v1712_v54, %v1711_v51  ;;  %v1642_v60 = vmul.f32 %v1533_v58, %v1261_v55  ;;  %v1264_v61 = vadd.f32 %v2432_v57, %v2320_v56 }
 0x133   : > { %v2321_v1 = vpop.f32.mrb[28].mxu0 }
 0x134   : > { %2252 = vst [vmem:[%s2805_s30 + $0x28] sm:$0xff] %v2196_v59   ;;  %v1681_v63 = vadd.f32 %v2797_v47, %v1642_v60  ;;  %v1643_v0 = vmul.f32 %v1538_v62, %v1264_v61  ;;  %v2433_v2 = vpop.f32.mrb[28].mxu1  ;;  %v2322_v3 = vpop.f32.mrb[29].mxu0 }
 0x135   : > { %v2434_v4 = vpop.f32.mrb[29].mxu1  ;;  %v2323_v6 = vadd.f32 %v2322_v3, %v2321_v1  ;;  %v2324_v8 = vpop.f32.mrb[30].mxu0 }
 0x136   : > { %v1682_v5 = vadd.f32 %v2797_v47, %v1643_v0  ;;  %v2435_v7 = vadd.f32 %v2434_v4, %v2433_v2  ;;  %v2436_v9 = vpop.f32.mrb[30].mxu1  ;;  %v1713_v10 = vmax.f32 %v1681_v63, 0.0  ;;  %v2325_v11 = vpop.f32.mrb[31].mxu0 }
 0x137   : > { %v2437_v12 = vpop.f32.mrb[31].mxu1  ;;  %v2326_v15 = vadd.f32 %v2325_v11, %v2324_v8  ;;  %v1563_v0 = vpop.permute.xlu0 %1562 }
 0x138   : > { %v1714_v13 = vmax.f32 %v1682_v5, 0.0  ;;  %v1269_v14 = vadd.f32 %v2435_v7, %v2323_v6  ;;  %v2438_v16 = vadd.f32 %v2437_v12, %v2436_v9  ;;  %v1568_v4 = vpop.permute.xlu1 %1567 }
 0x13a   : > { %v2201_v18 = vpack.c.bf16 %v1714_v13, %v1713_v10  ;;  %v1644_v19 = vmul.f32 %v1543_v17, %v1269_v14  ;;  %v1272_v20 = vadd.f32 %v2438_v16, %v2326_v15 }
 0x13b   : > { %v2327_v24 = vpop.f32.mrb[32].mxu0 }
 0x13c   : > { %2253 = vst [vmem:[%s2805_s30 + $0x30] sm:$0xff] %v2201_v18   ;;  %v1683_v22 = vadd.f32 %v2797_v47, %v1644_v19  ;;  %v1645_v23 = vmul.f32 %v1548_v21, %v1272_v20  ;;  %v2439_v25 = vpop.f32.mrb[32].mxu1  ;;  %v2328_v26 = vpop.f32.mrb[33].mxu0 }
 0x13d   : > { %v2440_v27 = vpop.f32.mrb[33].mxu1  ;;  %v2329_v29 = vadd.f32 %v2328_v26, %v2327_v24  ;;  %v2330_v31 = vpop.f32.mrb[34].mxu0 }
 0x13e   : > { %v1684_v28 = vadd.f32 %v2797_v47, %v1645_v23  ;;  %v2441_v30 = vadd.f32 %v2440_v27, %v2439_v25  ;;  %v2442_v32 = vpop.f32.mrb[34].mxu1  ;;  %v1715_v33 = vmax.f32 %v1683_v22, 0.0  ;;  %v2331_v34 = vpop.f32.mrb[35].mxu0 }
 0x13f   : > { %v2443_v35 = vpop.f32.mrb[35].mxu1  ;;  %v2332_v38 = vadd.f32 %v2331_v34, %v2330_v31  ;;  %v1573_v23 = vpop.permute.xlu0 %1572 }
 0x140   : > { %v1716_v36 = vmax.f32 %v1684_v28, 0.0  ;;  %v1277_v37 = vadd.f32 %v2441_v30, %v2329_v29  ;;  %v2444_v39 = vadd.f32 %v2443_v35, %v2442_v32  ;;  %v1578_v27 = vpop.permute.xlu1 %1577 }
 0x142   : > { %v2206_v41 = vpack.c.bf16 %v1716_v36, %v1715_v33  ;;  %v1646_v42 = vmul.f32 %v1553_v40, %v1277_v37  ;;  %v1280_v43 = vadd.f32 %v2444_v39, %v2332_v38 }
 0x143   : > { %v2333_v48 = vpop.f32.mrb[36].mxu0 }
 0x144   : > { %2254 = vst [vmem:[%s2805_s30 + $0x38] sm:$0xff] %v2206_v41   ;;  %v1685_v45 = vadd.f32 %v2797_v47, %v1646_v42  ;;  %v1647_v46 = vmul.f32 %v1558_v44, %v1280_v43  ;;  %v2445_v49 = vpop.f32.mrb[36].mxu1  ;;  %v2334_v50 = vpop.f32.mrb[37].mxu0 }
 0x145   : > { %v2446_v51 = vpop.f32.mrb[37].mxu1  ;;  %v2335_v53 = vadd.f32 %v2334_v50, %v2333_v48  ;;  %v2336_v55 = vpop.f32.mrb[38].mxu0 }
 0x146   : > { %v1686_v52 = vadd.f32 %v2797_v47, %v1647_v46  ;;  %v2447_v54 = vadd.f32 %v2446_v51, %v2445_v49  ;;  %v2448_v56 = vpop.f32.mrb[38].mxu1  ;;  %v1717_v57 = vmax.f32 %v1685_v45, 0.0  ;;  %v2337_v58 = vpop.f32.mrb[39].mxu0 }
 0x147   : > { %v2449_v59 = vpop.f32.mrb[39].mxu1  ;;  %v2338_v62 = vadd.f32 %v2337_v58, %v2336_v55  ;;  %v1583_v46 = vpop.permute.xlu0 %1582 }
 0x148   : > { %v1718_v60 = vmax.f32 %v1686_v52, 0.0  ;;  %v1285_v61 = vadd.f32 %v2447_v54, %v2335_v53  ;;  %v2450_v63 = vadd.f32 %v2449_v59, %v2448_v56  ;;  %v1588_v51 = vpop.permute.xlu1 %1587 }
 0x14a   : > { %v2211_v1 = vpack.c.bf16 %v1718_v60, %v1717_v57  ;;  %v1648_v2 = vmul.f32 %v1563_v0, %v1285_v61  ;;  %v1288_v3 = vadd.f32 %v2450_v63, %v2338_v62 }
 0x14b   : > { %v2339_v7 = vpop.f32.mrb[40].mxu0 }
 0x14c   : > { %2255 = vst [vmem:[%s2805_s30 + $0x40] sm:$0xff] %v2211_v1   ;;  %v1687_v5 = vadd.f32 %v2797_v47, %v1648_v2  ;;  %v1649_v6 = vmul.f32 %v1568_v4, %v1288_v3  ;;  %v2451_v8 = vpop.f32.mrb[40].mxu1  ;;  %v2340_v9 = vpop.f32.mrb[41].mxu0 }
 0x14d   : > { %v2452_v10 = vpop.f32.mrb[41].mxu1  ;;  %v2341_v12 = vadd.f32 %v2340_v9, %v2339_v7  ;;  %v2342_v14 = vpop.f32.mrb[42].mxu0 }
 0x14e   : > { %v1688_v11 = vadd.f32 %v2797_v47, %v1649_v6  ;;  %v2453_v13 = vadd.f32 %v2452_v10, %v2451_v8  ;;  %v2454_v15 = vpop.f32.mrb[42].mxu1  ;;  %v1719_v16 = vmax.f32 %v1687_v5, 0.0  ;;  %v2343_v17 = vpop.f32.mrb[43].mxu0 }
 0x14f   : > { %v2455_v18 = vpop.f32.mrb[43].mxu1  ;;  %v2344_v21 = vadd.f32 %v2343_v17, %v2342_v14  ;;  %v1593_v6 = vpop.permute.xlu0 %1592 }
 0x150   : > { %v1720_v19 = vmax.f32 %v1688_v11, 0.0  ;;  %v1293_v20 = vadd.f32 %v2453_v13, %v2341_v12  ;;  %v2456_v22 = vadd.f32 %v2455_v18, %v2454_v15  ;;  %v1598_v10 = vpop.permute.xlu1 %1597 }
 0x152   : > { %v2216_v24 = vpack.c.bf16 %v1720_v19, %v1719_v16  ;;  %v1650_v25 = vmul.f32 %v1573_v23, %v1293_v20  ;;  %v1296_v26 = vadd.f32 %v2456_v22, %v2344_v21 }
 0x153   : > { %v2345_v30 = vpop.f32.mrb[44].mxu0 }
 0x154   : > { %2256 = vst [vmem:[%s2805_s30 + $0x48] sm:$0xff] %v2216_v24   ;;  %v1689_v28 = vadd.f32 %v2797_v47, %v1650_v25  ;;  %v1651_v29 = vmul.f32 %v1578_v27, %v1296_v26  ;;  %v2457_v31 = vpop.f32.mrb[44].mxu1  ;;  %v2346_v32 = vpop.f32.mrb[45].mxu0 }
 0x155   : > { %v2458_v33 = vpop.f32.mrb[45].mxu1  ;;  %v2347_v35 = vadd.f32 %v2346_v32, %v2345_v30  ;;  %v2348_v37 = vpop.f32.mrb[46].mxu0 }
 0x156   : > { %v1690_v34 = vadd.f32 %v2797_v47, %v1651_v29  ;;  %v2459_v36 = vadd.f32 %v2458_v33, %v2457_v31  ;;  %v2460_v38 = vpop.f32.mrb[46].mxu1  ;;  %v1721_v39 = vmax.f32 %v1689_v28, 0.0  ;;  %v2349_v40 = vpop.f32.mrb[47].mxu0 }
 0x157   : > { %v2461_v41 = vpop.f32.mrb[47].mxu1  ;;  %v2350_v44 = vadd.f32 %v2349_v40, %v2348_v37  ;;  %v1603_v29 = vpop.permute.xlu0 %1602 }
 0x158   : > { %v1722_v42 = vmax.f32 %v1690_v34, 0.0  ;;  %v1301_v43 = vadd.f32 %v2459_v36, %v2347_v35  ;;  %v2462_v45 = vadd.f32 %v2461_v41, %v2460_v38  ;;  %v1608_v33 = vpop.permute.xlu1 %1607 }
 0x15a   : > { %v2221_v48 = vpack.c.bf16 %v1722_v42, %v1721_v39  ;;  %v1652_v49 = vmul.f32 %v1583_v46, %v1301_v43  ;;  %v1304_v50 = vadd.f32 %v2462_v45, %v2350_v44 }
 0x15b   : > { %v2351_v54 = vpop.f32.mrb[48].mxu0 }
 0x15c   : > { %2257 = vst [vmem:[%s2805_s30 + $0x50] sm:$0xff] %v2221_v48   ;;  %v1691_v52 = vadd.f32 %v2797_v47, %v1652_v49  ;;  %v1653_v53 = vmul.f32 %v1588_v51, %v1304_v50  ;;  %v2463_v55 = vpop.f32.mrb[48].mxu1  ;;  %v2352_v56 = vpop.f32.mrb[49].mxu0 }
 0x15d   : > { %v2464_v57 = vpop.f32.mrb[49].mxu1  ;;  %v2353_v59 = vadd.f32 %v2352_v56, %v2351_v54  ;;  %v2354_v61 = vpop.f32.mrb[50].mxu0 }
 0x15e   : > { %v1692_v58 = vadd.f32 %v2797_v47, %v1653_v53  ;;  %v2465_v60 = vadd.f32 %v2464_v57, %v2463_v55  ;;  %v2466_v62 = vpop.f32.mrb[50].mxu1  ;;  %v1723_v63 = vmax.f32 %v1691_v52, 0.0  ;;  %v2355_v0 = vpop.f32.mrb[51].mxu0 }
 0x15f   : > { %v2467_v1 = vpop.f32.mrb[51].mxu1  ;;  %v2356_v4 = vadd.f32 %v2355_v0, %v2354_v61  ;;  %v1613_v53 = vpop.permute.xlu0 %1612 }
 0x160   : > { %v1724_v2 = vmax.f32 %v1692_v58, 0.0  ;;  %v1309_v3 = vadd.f32 %v2465_v60, %v2353_v59  ;;  %v2468_v5 = vadd.f32 %v2467_v1, %v2466_v62  ;;  %v1618_v57 = vpop.permute.xlu1 %1617 }
 0x162   : > { %v2226_v7 = vpack.c.bf16 %v1724_v2, %v1723_v63  ;;  %v1654_v8 = vmul.f32 %v1593_v6, %v1309_v3  ;;  %v1312_v9 = vadd.f32 %v2468_v5, %v2356_v4 }
 0x163   : > { %v2357_v13 = vpop.f32.mrb[52].mxu0 }
 0x164   : > { %2258 = vst [vmem:[%s2805_s30 + $0x58] sm:$0xff] %v2226_v7   ;;  %v1693_v11 = vadd.f32 %v2797_v47, %v1654_v8  ;;  %v1655_v12 = vmul.f32 %v1598_v10, %v1312_v9  ;;  %v2469_v14 = vpop.f32.mrb[52].mxu1  ;;  %v2358_v15 = vpop.f32.mrb[53].mxu0 }
 0x165   : > { %v2470_v16 = vpop.f32.mrb[53].mxu1  ;;  %v2359_v18 = vadd.f32 %v2358_v15, %v2357_v13  ;;  %v2360_v20 = vpop.f32.mrb[54].mxu0 }
 0x166   : > { %v1694_v17 = vadd.f32 %v2797_v47, %v1655_v12  ;;  %v2471_v19 = vadd.f32 %v2470_v16, %v2469_v14  ;;  %v2472_v21 = vpop.f32.mrb[54].mxu1  ;;  %v1725_v22 = vmax.f32 %v1693_v11, 0.0  ;;  %v2361_v23 = vpop.f32.mrb[55].mxu0 }
 0x167   : > { %v2473_v24 = vpop.f32.mrb[55].mxu1  ;;  %v2362_v27 = vadd.f32 %v2361_v23, %v2360_v20  ;;  %v1623_v12 = vpop.permute.xlu0 %1622 }
 0x168   : > { %v1726_v25 = vmax.f32 %v1694_v17, 0.0  ;;  %v1317_v26 = vadd.f32 %v2471_v19, %v2359_v18  ;;  %v2474_v28 = vadd.f32 %v2473_v24, %v2472_v21  ;;  %v1628_v16 = vpop.permute.xlu1 %1627 }
 0x16a   : > { %v2231_v30 = vpack.c.bf16 %v1726_v25, %v1725_v22  ;;  %v1656_v31 = vmul.f32 %v1603_v29, %v1317_v26  ;;  %v1320_v32 = vadd.f32 %v2474_v28, %v2362_v27 }
 0x16b   : > { %v2363_v36 = vpop.f32.mrb[56].mxu0 }
 0x16c   : > { %2259 = vst [vmem:[%s2805_s30 + $0x60] sm:$0xff] %v2231_v30   ;;  %v1695_v34 = vadd.f32 %v2797_v47, %v1656_v31  ;;  %v1657_v35 = vmul.f32 %v1608_v33, %v1320_v32  ;;  %v2475_v37 = vpop.f32.mrb[56].mxu1  ;;  %v2364_v38 = vpop.f32.mrb[57].mxu0 }
 0x16d   : > { %v2476_v39 = vpop.f32.mrb[57].mxu1  ;;  %v2365_v41 = vadd.f32 %v2364_v38, %v2363_v36  ;;  %v2366_v43 = vpop.f32.mrb[58].mxu0 }
 0x16e   : > { %v1696_v40 = vadd.f32 %v2797_v47, %v1657_v35  ;;  %v2477_v42 = vadd.f32 %v2476_v39, %v2475_v37  ;;  %v2478_v44 = vpop.f32.mrb[58].mxu1  ;;  %v1727_v45 = vmax.f32 %v1695_v34, 0.0  ;;  %v2367_v46 = vpop.f32.mrb[59].mxu0 }
 0x16f   : > { %v2479_v48 = vpop.f32.mrb[59].mxu1  ;;  %v2368_v51 = vadd.f32 %v2367_v46, %v2366_v43 }
 0x170   : > { %v1728_v49 = vmax.f32 %v1696_v40, 0.0  ;;  %v1325_v50 = vadd.f32 %v2477_v42, %v2365_v41  ;;  %v2480_v52 = vadd.f32 %v2479_v48, %v2478_v44 }
 0x172   : > { %v2236_v54 = vpack.c.bf16 %v1728_v49, %v1727_v45  ;;  %v1658_v55 = vmul.f32 %v1613_v53, %v1325_v50  ;;  %v1328_v56 = vadd.f32 %v2480_v52, %v2368_v51 }
 0x173   : > { %v2369_v60 = vpop.f32.mrb[60].mxu0 }
 0x174   : > { %2260 = vst [vmem:[%s2805_s30 + $0x68] sm:$0xff] %v2236_v54   ;;  %v1697_v58 = vadd.f32 %v2797_v47, %v1658_v55  ;;  %v1659_v59 = vmul.f32 %v1618_v57, %v1328_v56  ;;  %v2481_v61 = vpop.f32.mrb[60].mxu1  ;;  %v2370_v62 = vpop.f32.mrb[61].mxu0 }
 0x175   : > { %v2482_v63 = vpop.f32.mrb[61].mxu1  ;;  %v2371_v1 = vadd.f32 %v2370_v62, %v2369_v60  ;;  %v2372_v3 = vpop.f32.mrb[62].mxu0 }
 0x176   : > { %v1698_v0 = vadd.f32 %v2797_v47, %v1659_v59  ;;  %v2483_v2 = vadd.f32 %v2482_v63, %v2481_v61  ;;  %v2484_v4 = vpop.f32.mrb[62].mxu1  ;;  %v1729_v5 = vmax.f32 %v1697_v58, 0.0  ;;  %v2373_v6 = vpop.f32.mrb[63].mxu0 }
 0x177   : > { %v2485_v7 = vpop.f32.mrb[63].mxu1  ;;  %v2374_v10 = vadd.f32 %v2373_v6, %v2372_v3 }
 0x178   : > { %v1730_v8 = vmax.f32 %v1698_v0, 0.0  ;;  %v1333_v9 = vadd.f32 %v2483_v2, %v2371_v1  ;;  %v2486_v11 = vadd.f32 %v2485_v7, %v2484_v4 }
 0x17a   : > { %v2241_v13 = vpack.c.bf16 %v1730_v8, %v1729_v5  ;;  %v1660_v14 = vmul.f32 %v1623_v12, %v1333_v9  ;;  %v1336_v15 = vadd.f32 %v2486_v11, %v2374_v10 }
 0x17c   : > { %2261 = vst [vmem:[%s2805_s30 + $0x70] sm:$0xff] %v2241_v13   ;;  %v1699_v17 = vadd.f32 %v2797_v47, %v1660_v14  ;;  %v1661_v18 = vmul.f32 %v1628_v16, %v1336_v15 }
 0x17e   : > { %v1700_v19 = vadd.f32 %v2797_v47, %v1661_v18  ;;  %v1731_v20 = vmax.f32 %v1699_v17, 0.0 }
 0x180   : > { %v1732_v21 = vmax.f32 %v1700_v19, 0.0 }
 0x182   : > { %v2246_v22 = vpack.c.bf16 %v1732_v21, %v1731_v20 }
 0x184   : > { %2262 = vst [vmem:[%s2805_s30 + $0x78] sm:$0xff] %v2246_v22  }
 0x185 PF: > { %s14_s17 = sadd.s32 1, %s2568_s17   ;;  %s2867_s15 = smov %s2564_s16 }
 0x186   : > { %p11_p5 = scmp.ge.s32.totalorder %s14_s17, 4   ;;  %s2868_s16 = smov %s2870_s18 }
 0x188   :  { %13 = sbr.rel (!%p11_p5) target bundleno = 2 (0x2), region = 80 }

// kernel: gcn_forward.7
= control target key start
LH: loop header
LB: loop body
LE: loop exit
PB: predicated region body
PF: predicated region fallthrough
CT: control target
= control target key end

     0   :  { %s3626_s27 = smov 0   ;;  %s3628_s28 = smov 0   ;;  %s4350_s0 = inlined_call_operand.vmem [shape: s8[512,512], index: 0, kind: input, shape index: {}]   ;;  %s4351_s1 = inlined_call_operand.vmem [shape: bf16[512,128], index: 1, kind: input, shape index: {}]   ;;  %s4352_s2 = inlined_call_operand.vmem [shape: f32[512,1], index: 2, kind: input, shape index: {}]   ;;  %s4353_s3 = inlined_call_operand.vmem [shape: f32[1,128], index: 3, kind: input, shape index: {}]   ;;  %s4354_s4 = inlined_call_operand.vmem [shape: bf16[128,128], index: 4, kind: input, shape index: {}]   ;;  %s4355_s5 = inlined_call_operand.vmem [shape: f32[1,128], index: 5, kind: input, shape index: {}]   ;;  %s4356_s6 = inlined_call_operand.vmem [shape: bf16[128,128], index: 6, kind: input, shape index: {}]   ;;  %s4357_s7 = inlined_call_operand.vmem [shape: f32[1,128], index: 7, kind: input, shape index: {}]   ;;  %s4358_s8 = inlined_call_operand.vmem [shape: f32[512,128], index: 8, kind: output, shape index: {}]  }
   0x1   :  { %s3630_s29 = smov 0  }
   0x2 LB: > { %s30_s30 = sadd.s32 1, %s3574_s28  ;;  %p2859_p0 = scmp.ge.s32.totalorder %s3578_s29, 1  ;;  %s3578_s29 = sphi %s3630_s29, %s18_s29   ;;  %s3574_s28 = sphi %s3628_s28, %s4360_s28   ;;  %s3570_s27 = sphi %s3626_s27, %s4359_s27  }
   0x3   : > { %p32_p1 = scmp.ge.s32.totalorder %s30_s30, 2  ;;  %p305_p2 = scmp.lt.s32.totalorder %s3578_s29, 3 }
   0x5   : > { %s4362_s30 = smov (%p32_p1, %s30_s30), 0  ;;  %p306_p3 = pnand %p2859_p0, %p305_p2 }
   0x6   : > { %v3380_v0 = vld [vmem:[%s4351_s1 + $0x40] sm:$0xff] (!%p306_p3)   ;;  %v3580_v4 = vmov (!%p306_p3), 0   ;;  %v3384_v5 = vld [vmem:[%s4351_s1 + $0x48] sm:$0xff] (!%p306_p3)   ;;  %v3388_v9 = vld [vmem:[%s4351_s1 + $0x50] sm:$0xff] (!%p306_p3)   ;;  %s2860_s23 = sshll.u32 (!%p306_p3), %s3570_s27, 5 }
   0x7   : > { %309 = sbr.rel (%p306_p3) target bundleno = 1147 (0x47b), region = 52  ;;  %v3381_v1 = vld [vmem:[%s4351_s1 + $0xc0] sm:$0xff] (!%p306_p3)   ;;  %2985 = vmatprep.subr.bf16.mxu0 (!%p306_p3), %v3380_v0  ;;  %3378 = vset.pattern.permute.xlu0 (!%p306_p3), %v3580_v4  ;;  %v3385_v6 = vld [vmem:[%s4351_s1 + $0xc8] sm:$0xff] (!%p306_p3)   ;;  %v3389_v10 = vld [vmem:[%s4351_s1 + $0xd0] sm:$0xff] (!%p306_p3)   ;;  %p356_p4 = scmp.lt.s32.totalorder (!%p306_p3), %s2860_s23, 63 }
   0x8   : > { %v3382_v2 = vld [vmem:[%s4351_s1] sm:$0xff] (!%p306_p3)   ;;  %3097 = vmatprep.subr.bf16.mxu1 (!%p306_p3), %v3381_v1  ;;  %3379 = vset.pattern.permute.xlu1 (!%p306_p3), %v3580_v4  ;;  %v3386_v7 = vld [vmem:[%s4351_s1 + $0x8] sm:$0xff] (!%p306_p3)   ;;  %v3390_v11 = vld [vmem:[%s4351_s1 + $0x10] sm:$0xff] (!%p306_p3)  }
   0x9   : > { %v3383_v3 = vld [vmem:[%s4351_s1 + $0x80] sm:$0xff] (!%p306_p3)   ;;  %2986 = vmatpush3.bf16.msra.mxu0 (!%p306_p3), %v3382_v2  ;;  %v3387_v8 = vld [vmem:[%s4351_s1 + $0x88] sm:$0xff] (!%p306_p3)   ;;  %v3391_v12 = vld [vmem:[%s4351_s1 + $0x90] sm:$0xff] (!%p306_p3)  }
   0xa   : > { %3098 = vmatpush3.bf16.msra.mxu1 (!%p306_p3), %v3383_v3  ;;  %2987 = vmatprep.subr.bf16.mxu0 (!%p306_p3), %v3384_v5  ;;  %v3392_v13 = vld [vmem:[%s4351_s1 + $0x58] sm:$0xff] (!%p306_p3)   ;;  %v3396_v17 = vld [vmem:[%s4351_s1 + $0x60] sm:$0xff] (!%p306_p3)   ;;  %v3400_v21 = vld [vmem:[%s4351_s1 + $0x68] sm:$0xff] (!%p306_p3)  }
   0xb   : > { %3099 = vmatprep.subr.bf16.mxu1 (!%p306_p3), %v3385_v6  ;;  %v3393_v14 = vld [vmem:[%s4351_s1 + $0xd8] sm:$0xff] (!%p306_p3)   ;;  %v3397_v18 = vld [vmem:[%s4351_s1 + $0xe0] sm:$0xff] (!%p306_p3)   ;;  %v3401_v22 = vld [vmem:[%s4351_s1 + $0xe8] sm:$0xff] (!%p306_p3)  }
   0xc   : > { %v3394_v15 = vld [vmem:[%s4351_s1 + $0x18] sm:$0xff] (!%p306_p3)   ;;  %v3398_v19 = vld [vmem:[%s4351_s1 + $0x20] sm:$0xff] (!%p306_p3)   ;;  %v3402_v23 = vld [vmem:[%s4351_s1 + $0x28] sm:$0xff] (!%p306_p3)  }
   0xd   : > { %2988 = vmatpush3.bf16.msra.mxu0 (!%p306_p3), %v3386_v7  ;;  %v3395_v16 = vld [vmem:[%s4351_s1 + $0x98] sm:$0xff] (!%p306_p3)   ;;  %v3399_v20 = vld [vmem:[%s4351_s1 + $0xa0] sm:$0xff] (!%p306_p3)   ;;  %v3403_v24 = vld [vmem:[%s4351_s1 + $0xa8] sm:$0xff] (!%p306_p3)  }
   0xe   : > { %3100 = vmatpush3.bf16.msra.mxu1 %v3387_v8  ;;  %2989 = vmatprep.subr.bf16.mxu0 %v3388_v9  ;;  %s4364_s23 = smov (!%p356_p4, %s2860_s23), 63  ;;  %v3404_v25 = vld [vmem:[%s4351_s1 + $0x70] sm:$0xff]   ;;  %v3408_v29 = vld [vmem:[%s4351_s1 + $0x78] sm:$0xff]  }
   0xf   : > { %3101 = vmatprep.subr.bf16.mxu1 %v3389_v10  ;;  %v3405_v26 = vld [vmem:[%s4351_s1 + $0xf0] sm:$0xff]   ;;  %s3728_s10 = sshll.u32 %s4364_s23, 3  ;;  %v3409_v30 = vld [vmem:[%s4351_s1 + $0xf8] sm:$0xff]  }
  0x10   : > { %v3406_v27 = vld [vmem:[%s4351_s1 + $0x30] sm:$0xff]   ;;  %s3743_s23 = scalar_lea.vmem %s4350_s0, %s3728_s10  ;;  %v3410_v31 = vld [vmem:[%s4351_s1 + $0x38] sm:$0xff]   ;;  %s3761_s25 = scalar_lea.vmem %s4352_s2, %s3728_s10 }
  0x11   : > { %2990 = vmatpush3.bf16.msra.mxu0 %v3390_v11  ;;  %v3407_v28 = vld [vmem:[%s4351_s1 + $0xb0] sm:$0xff]   ;;  %v3411_v32 = vld [vmem:[%s4351_s1 + $0xb8] sm:$0xff]   ;;  %v421_v33 = vld [vmem:[%s3743_s23] sm:$0xff]  ;;  %s4275_s13 = scalar_lea.vmem %s4358_s8, %s3728_s10 }
  0x12   : > { %3102 = vmatpush3.bf16.msra.mxu1 %v3391_v12  ;;  %2991 = vmatprep.subr.bf16.mxu0 %v3392_v13  ;;  %v422_v34 = vld [vmem:[%s3743_s23 + $0x8] sm:$0xff]  ;;  %v423_v35 = vld [vmem:[%s3743_s23 + $0x10] sm:$0xff]  ;;  %v453_v36 = vunpack.c.l.s8.bf16 %v421_v33  ;;  %v454_v38 = vunpack.c.h.s8.bf16 %v421_v33  ;;  %v424_v40 = vld [vmem:[%s3743_s23 + $0x18] sm:$0xff] }
  0x13   : > { %3103 = vmatprep.subr.bf16.mxu1 %v3393_v14  ;;  %v455_v37 = vunpack.c.l.s8.bf16 %v422_v34  ;;  %v456_v39 = vunpack.c.h.s8.bf16 %v422_v34  ;;  %v457_v41 = vunpack.c.l.s8.bf16 %v423_v35  ;;  %v459_v42 = vunpack.c.l.s8.bf16 %v424_v40  ;;  %v425_v51 = vld [vmem:[%s3743_s23 + $0x20] sm:$0xff]  ;;  %v426_v52 = vld [vmem:[%s3743_s23 + $0x28] sm:$0xff]  ;;  %v1548_v58 = vld [vmem:[%s3761_s25 + $0x10] sm:$0xff] }
  0x14   : > { %v458_v43 = vunpack.c.h.s8.bf16 %v423_v35  ;;  %v460_v44 = vunpack.c.h.s8.bf16 %v424_v40  ;;  %v461_v53 = vunpack.c.l.s8.bf16 %v425_v51  ;;  %v463_v54 = vunpack.c.l.s8.bf16 %v426_v52  ;;  %v1546_v57 = vld [vmem:[%s3761_s25] sm:$0xff]  ;;  %1590 = vperm.xlu1 %3379, %v1548_v58   ;;  %v1547_v59 = vld [vmem:[%s3761_s25 + $0x8] sm:$0xff]  ;;  %v1549_v62 = vld [vmem:[%s3761_s25 + $0x18] sm:$0xff] }
  0x15   : > { %2992 = vmatpush3.bf16.msra.mxu0 %v3394_v15  ;;  %v2868_v45 = vcombine.high %v453_v36, %v455_v37  ;;  %v2870_v46 = vcombine.high %v454_v38, %v456_v39  ;;  %v2867_v47 = vcombine.low %v453_v36, %v455_v37  ;;  %v2869_v48 = vcombine.low %v454_v38, %v456_v39  ;;  %v427_v1 = vld [vmem:[%s3743_s23 + $0x30] sm:$0xff]  ;;  %v428_v2 = vld [vmem:[%s3743_s23 + $0x38] sm:$0xff]  ;;  %v1550_v3 = vld [vmem:[%s3761_s25 + $0x20] sm:$0xff] }
  0x16   : > { %3104 = vmatpush3.bf16.msra.mxu1 %v3395_v16  ;;  %2993 = vmatprep.subr.bf16.mxu0 %v3396_v17  ;;  %v2872_v49 = vcombine.high %v457_v41, %v459_v42  ;;  %v2874_v50 = vcombine.high %v458_v43, %v460_v44  ;;  %v462_v55 = vunpack.c.h.s8.bf16 %v425_v51  ;;  %v464_v56 = vunpack.c.h.s8.bf16 %v426_v52  ;;  %v1551_v4 = vld [vmem:[%s3761_s25 + $0x28] sm:$0xff]  ;;  %v1552_v9 = vld [vmem:[%s3761_s25 + $0x30] sm:$0xff]  ;;  %v1553_v12 = vld [vmem:[%s3761_s25 + $0x38] sm:$0xff] }
  0x17   : > { %3105 = vmatprep.subr.bf16.mxu1 %v3397_v18  ;;  %1157 = vmatprep.mubr.bf16.mxu0 %v2868_v45  ;;  %v2871_v60 = vcombine.low %v457_v41, %v459_v42  ;;  %v2873_v61 = vcombine.low %v458_v43, %v460_v44  ;;  %v2876_v63 = vcombine.high %v461_v53, %v463_v54  ;;  %v465_v5 = vunpack.c.l.s8.bf16 %v427_v1  ;;  %v429_v15 = vld [vmem:[%s3743_s23 + $0x40] sm:$0xff]  ;;  %v430_v16 = vld [vmem:[%s3743_s23 + $0x48] sm:$0xff]  ;;  %v3414_v35 = vld [vmem:[%s4354_s4 + $0x10] sm:$0xff]  }
  0x18   : > { %1318 = vmatprep.mubr.bf16.mxu1 %v2870_v46  ;;  %1580 = vperm.xlu0 %3378, %v1546_v57   ;;  %v2878_v0 = vcombine.high %v462_v55, %v464_v56  ;;  %v467_v6 = vunpack.c.l.s8.bf16 %v428_v2  ;;  %v466_v7 = vunpack.c.h.s8.bf16 %v427_v1  ;;  %v468_v8 = vunpack.c.h.s8.bf16 %v428_v2  ;;  %v1554_v17 = vld [vmem:[%s3761_s25 + $0x40] sm:$0xff]  ;;  %v1555_v18 = vld [vmem:[%s3761_s25 + $0x48] sm:$0xff]  ;;  %v1560_v40 = vld [vmem:[%s3761_s25 + $0x70] sm:$0xff] }
  0x19   : > { %2994 = vmatpush3.bf16.msra.mxu0 %v3398_v19  ;;  %1595 = vperm.xlu1 %3379, %v1549_v62   ;;  %v2875_v10 = vcombine.low %v461_v53, %v463_v54  ;;  %v2877_v11 = vcombine.low %v462_v55, %v464_v56  ;;  %v3412_v19 = vld [vmem:[%s4354_s4] sm:$0xff]   ;;  %v1559_v34 = vld [vmem:[%s3761_s25 + $0x68] sm:$0xff]  ;;  %v1561_v43 = vld [vmem:[%s3761_s25 + $0x78] sm:$0xff] }
  0x1a   : > { %3106 = vmatpush3.bf16.msra.mxu1 %v3399_v20  ;;  %2995 = vmatprep.subr.bf16.mxu0 %v3400_v21  ;;  %v2880_v13 = vcombine.high %v465_v5, %v467_v6  ;;  %v2882_v14 = vcombine.high %v466_v7, %v468_v8  ;;  %v469_v20 = vunpack.c.l.s8.bf16 %v429_v15  ;;  %v471_v21 = vunpack.c.l.s8.bf16 %v430_v16  ;;  %v1558_v33 = vld [vmem:[%s3761_s25 + $0x60] sm:$0xff]  ;;  %v1564_v55 = vld [vmem:[%s3761_s25 + $0x90] sm:$0xff]  ;;  %v1565_v58 = vld [vmem:[%s3761_s25 + $0x98] sm:$0xff] }
  0x1b   : > { %3107 = vmatprep.subr.bf16.mxu1 %v3401_v22  ;;  %v470_v22 = vunpack.c.h.s8.bf16 %v429_v15  ;;  %v433_v46 = vld [vmem:[%s3743_s23 + $0x60] sm:$0xff]  ;;  %v436_v62 = vld [vmem:[%s3743_s23 + $0x78] sm:$0xff] }
  0x1c   : > { %1585 = vperm.xlu0 %3378, %v1547_v59   ;;  %v2883_v41 = vcombine.low %v469_v20, %v471_v21  ;;  %v477_v51 = vunpack.c.l.s8.bf16 %v433_v46  ;;  %v478_v53 = vunpack.c.h.s8.bf16 %v433_v46  ;;  %v483_v2 = vunpack.c.l.s8.bf16 %v436_v62 }
  0x1d   : > { %2996 = vmatpush3.bf16.msra.mxu0 %v3402_v23  ;;  %1605 = vperm.xlu1 %3379, %v1551_v4   ;;  %v472_v23 = vunpack.c.h.s8.bf16 %v430_v16  ;;  %v484_v4 = vunpack.c.h.s8.bf16 %v436_v62 }
  0x1e   : > { %3108 = vmatpush3.bf16.msra.mxu1 %v3403_v24  ;;  %2997 = vmatprep.subr.bf16.mxu0 %v3404_v25  ;;  %v3413_v24 = vld [vmem:[%s4354_s4 + $0x8] sm:$0xff]   ;;  %v1556_v25 = vld [vmem:[%s3761_s25 + $0x50] sm:$0xff] }
  0x1f   : > { %3109 = vmatprep.subr.bf16.mxu1 %v3405_v26  ;;  %v1557_v26 = vld [vmem:[%s3761_s25 + $0x58] sm:$0xff]  ;;  %v2885_v42 = vcombine.low %v470_v22, %v472_v23 }
  0x20   : > { %1600 = vperm.xlu0 %3378, %v1550_v3  }
  0x21   : > { %2998 = vmatpush3.bf16.msra.mxu0 %v3406_v27  ;;  %1615 = vperm.xlu1 %3379, %v1553_v12   ;;  %v2879_v27 = vcombine.low %v465_v5, %v467_v6  ;;  %v1568_v5 = vld [vmem:[%s3761_s25 + $0xb0] sm:$0xff]  ;;  %v438_v12 = vld [vmem:[%s3743_s23 + $0x88] sm:$0xff] }
  0x22   : > { %3110 = vmatpush3.bf16.msra.mxu1 %v3407_v28  ;;  %2999 = vmatprep.subr.bf16.mxu0 %v3408_v29  ;;  %v2881_v28 = vcombine.low %v466_v7, %v468_v8  ;;  %v431_v29 = vld [vmem:[%s3743_s23 + $0x50] sm:$0xff]  ;;  %v1569_v8 = vld [vmem:[%s3761_s25 + $0xb8] sm:$0xff]  ;;  %v487_v16 = vunpack.c.l.s8.bf16 %v438_v12 }
  0x23   : > { %3111 = vmatprep.subr.bf16.mxu1 %v3409_v30  ;;  %v432_v30 = vld [vmem:[%s3743_s23 + $0x58] sm:$0xff]  ;;  %v473_v36 = vunpack.c.l.s8.bf16 %v431_v29  ;;  %v474_v38 = vunpack.c.h.s8.bf16 %v431_v29 }
  0x24   : > { %1610 = vperm.xlu0 %3378, %v1552_v9   ;;  %v475_v37 = vunpack.c.l.s8.bf16 %v432_v30  ;;  %v476_v39 = vunpack.c.h.s8.bf16 %v432_v30 }
  0x25   : > { %3000 = vmatpush3.bf16.msra.mxu0 %v3410_v31  ;;  %1625 = vperm.xlu1 %3379, %v1555_v18   ;;  %v2884_v31 = vcombine.high %v469_v20, %v471_v21  ;;  %v488_v18 = vunpack.c.h.s8.bf16 %v438_v12 }
  0x26   : > { %3112 = vmatpush3.bf16.msra.mxu1 %v3411_v32  ;;  %3257 = vmatprep.subr.bf16.mxu0 %v3412_v19  ;;  %v2886_v32 = vcombine.high %v470_v22, %v472_v23  ;;  %v2888_v44 = vcombine.high %v473_v36, %v475_v37  ;;  %v2890_v45 = vcombine.high %v474_v38, %v476_v39  ;;  %v1573_v22 = vld [vmem:[%s3761_s25 + $0xd8] sm:$0xff] }
  0x27   : > { %v2887_v56 = vcombine.low %v473_v36, %v475_v37  ;;  %v2889_v57 = vcombine.low %v474_v38, %v476_v39  ;;  %v1577_v36 = vld [vmem:[%s3761_s25 + $0xf8] sm:$0xff]  ;;  %v441_v39 = vld [vmem:[%s3743_s23 + $0xa0] sm:$0xff] }
  0x28   : > { %1158 = vmatmul.mubr.bf16.vlgmr.msra.gmra.mrb[0].mxu0 %v2867_v47  ;;  %1620 = vperm.xlu0 %3378, %v1554_v17   ;;  %v434_v47 = vld [vmem:[%s3743_s23 + $0x68] sm:$0xff] }
  0x29   : > { %1319 = vmatmul.mubr.bf16.vlgmr.msra.gmra.mrb[0].mxu1 %v2869_v48  ;;  %1165 = vmatprep.mubr.bf16.mxu0 %v2872_v49  ;;  %v3415_v48 = vld [vmem:[%s4354_s4 + $0x18] sm:$0xff]   ;;  %v1562_v49 = vld [vmem:[%s3761_s25 + $0x80] sm:$0xff]  ;;  %v479_v52 = vunpack.c.l.s8.bf16 %v434_v47  ;;  %v480_v54 = vunpack.c.h.s8.bf16 %v434_v47 }
  0x2a   : > { %1326 = vmatprep.mubr.bf16.mxu1 %v2874_v50  ;;  %3258 = vmatpush3.bf16.msra.mxu0 %v3412_v19  ;;  %v1563_v50 = vld [vmem:[%s3761_s25 + $0x88] sm:$0xff]  ;;  %v1572_v19 = vld [vmem:[%s3761_s25 + $0xd0] sm:$0xff] }
  0x2b   : > { %3259 = vmatprep.subr.bf16.mxu0 %v3413_v24  ;;  %1635 = vperm.xlu1 %3379, %v1557_v26   ;;  %v2892_v59 = vcombine.high %v477_v51, %v479_v52  ;;  %v2891_v6 = vcombine.low %v477_v51, %v479_v52  ;;  %v2893_v7 = vcombine.low %v478_v53, %v480_v54  ;;  %v440_v26 = vld [vmem:[%s3743_s23 + $0x98] sm:$0xff] }
  0x2c   : > { %1630 = vperm.xlu0 %3378, %v1556_v25   ;;  %v439_v25 = vld [vmem:[%s3743_s23 + $0x90] sm:$0xff]  ;;  %v491_v30 = vunpack.c.l.s8.bf16 %v440_v26 }
  0x2d   : > { %v489_v29 = vunpack.c.l.s8.bf16 %v439_v25 }
  0x2e   : > { %3260 = vmatpush3.bf16.msra.mxu0 %v3413_v24 }
  0x2f   : > { %1645 = vperm.xlu1 %3379, %v1559_v34   ;;  %3261 = vmatprep.subr.bf16.mxu0 %v3414_v35  ;;  %v2904_v37 = vcombine.high %v489_v29, %v491_v30 }
  0x30   : > { %1166 = vmatmul.mubr.bf16.gmra.mrb[4].mxu0 %v2871_v60  ;;  %1640 = vperm.xlu0 %3378, %v1558_v33   ;;  %v2894_v60 = vcombine.high %v478_v53, %v480_v54  ;;  %v1576_v33 = vld [vmem:[%s3761_s25 + $0xf0] sm:$0xff] }
  0x31   : > { %1327 = vmatmul.mubr.bf16.gmra.mrb[4].mxu1 %v2873_v61  ;;  %1173 = vmatprep.mubr.bf16.mxu0 %v2876_v63  ;;  %v435_v61 = vld [vmem:[%s3743_s23 + $0x70] sm:$0xff]  ;;  %v1566_v63 = vld [vmem:[%s3761_s25 + $0xa0] sm:$0xff] }
  0x32   : > { %1334 = vmatprep.mubr.bf16.mxu1 %v2878_v0  ;;  %3262 = vmatpush3.bf16.msra.mxu0 %v3414_v35  ;;  %v1567_v0 = vld [vmem:[%s3761_s25 + $0xa8] sm:$0xff]  ;;  %v481_v1 = vunpack.c.l.s8.bf16 %v435_v61  ;;  %v482_v3 = vunpack.c.h.s8.bf16 %v435_v61 }
  0x33   : > { %1655 = vperm.xlu1 %3379, %v1561_v43   ;;  %3263 = vmatprep.subr.bf16.mxu0 %v3415_v48  ;;  %v494_v43 = vunpack.c.h.s8.bf16 %v441_v39 }
  0x34   : > { %1650 = vperm.xlu0 %3378, %v1560_v40   ;;  %v2896_v9 = vcombine.high %v481_v1, %v483_v2  ;;  %v2895_v20 = vcombine.low %v481_v1, %v483_v2  ;;  %v2897_v21 = vcombine.low %v482_v3, %v484_v4  ;;  %v442_v40 = vld [vmem:[%s3743_s23 + $0xa8] sm:$0xff] }
  0x36   : > { %3264 = vmatpush3.bf16.msra.mxu0 %v3415_v48 }
  0x37   : > { %1665 = vperm.xlu1 %3379, %v1563_v50   ;;  %v444_v50 = vld [vmem:[%s3743_s23 + $0xb8] sm:$0xff] }
  0x38   : > { %1174 = vmatmul.mubr.bf16.gmra.mrb[8].mxu0 %v2875_v10  ;;  %1660 = vperm.xlu0 %3378, %v1562_v49   ;;  %v2898_v10 = vcombine.high %v482_v3, %v484_v4  ;;  %v443_v49 = vld [vmem:[%s3743_s23 + $0xb0] sm:$0xff]  ;;  %v499_v52 = vunpack.c.l.s8.bf16 %v444_v50  ;;  %v500_v54 = vunpack.c.h.s8.bf16 %v444_v50 }
  0x39   : > { %1335 = vmatmul.mubr.bf16.gmra.mrb[8].mxu1 %v2877_v11  ;;  %1181 = vmatprep.mubr.bf16.mxu0 %v2880_v13  ;;  %v437_v11 = vld [vmem:[%s3743_s23 + $0x80] sm:$0xff]  ;;  %v497_v51 = vunpack.c.l.s8.bf16 %v443_v49  ;;  %v498_v53 = vunpack.c.h.s8.bf16 %v443_v49 }
  0x3a   : > { %1342 = vmatprep.mubr.bf16.mxu1 %v2882_v14  ;;  %v1570_v13 = vld [vmem:[%s3761_s25 + $0xc0] sm:$0xff]  ;;  %v1571_v14 = vld [vmem:[%s3761_s25 + $0xc8] sm:$0xff]  ;;  %v485_v15 = vunpack.c.l.s8.bf16 %v437_v11  ;;  %v486_v17 = vunpack.c.h.s8.bf16 %v437_v11 }
  0x3b   : > { %1675 = vperm.xlu1 %3379, %v1565_v58   ;;  %v2914_v58 = vcombine.high %v498_v53, %v500_v54  ;;  %v2911_v1 = vcombine.low %v497_v51, %v499_v52  ;;  %v2913_v2 = vcombine.low %v498_v53, %v500_v54  ;;  %v3416_v11 = vld [vmem:[%s4354_s4 + $0x20] sm:$0xff]  }
  0x3c   : > { %1670 = vperm.xlu0 %3378, %v1564_v55   ;;  %v2900_v23 = vcombine.high %v485_v15, %v487_v16  ;;  %v2902_v24 = vcombine.high %v486_v17, %v488_v18  ;;  %v2899_v34 = vcombine.low %v485_v15, %v487_v16  ;;  %v2901_v35 = vcombine.low %v486_v17, %v488_v18  ;;  %v3417_v16 = vld [vmem:[%s4354_s4 + $0x28] sm:$0xff]   ;;  %v449_v17 = vld [vmem:[%s3743_s23 + $0xe0] sm:$0xff] }
  0x3d   : > { %3265 = vmatprep.subr.bf16.mxu0 %v3416_v11  ;;  %v450_v18 = vld [vmem:[%s3743_s23 + $0xe8] sm:$0xff] }
  0x3e   : > { %3266 = vmatpush3.bf16.msra.mxu0 %v3416_v11 }
  0x3f   : > { %1685 = vperm.xlu1 %3379, %v1567_v0   ;;  %3267 = vmatprep.subr.bf16.mxu0 %v3417_v16 }
  0x40   : > { %1182 = vmatmul.mubr.bf16.gmra.mrb[12].mxu0 %v2879_v27  ;;  %1680 = vperm.xlu0 %3378, %v1566_v63   ;;  %v1574_v27 = vld [vmem:[%s3761_s25 + $0xe0] sm:$0xff] }
  0x41   : > { %1343 = vmatmul.mubr.bf16.gmra.mrb[12].mxu1 %v2881_v28  ;;  %1189 = vmatprep.mubr.bf16.mxu0 %v2884_v31  ;;  %v1575_v28 = vld [vmem:[%s3761_s25 + $0xe8] sm:$0xff]  ;;  %v490_v31 = vunpack.c.h.s8.bf16 %v439_v25 }
  0x42   : > { %1350 = vmatprep.mubr.bf16.mxu1 %v2886_v32  ;;  %v492_v32 = vunpack.c.h.s8.bf16 %v440_v26  ;;  %3268 = vmatpush3.bf16.msra.mxu0 %v3417_v16  ;;  %v3422_v16 = vld [vmem:[%s4356_s6 + $0x10] sm:$0xff]  }
  0x43   : > { %1695 = vperm.xlu1 %3379, %v1569_v8  }
  0x44   : > { %1690 = vperm.xlu0 %3378, %v1568_v5   ;;  %v2906_v38 = vcombine.high %v490_v31, %v492_v32  ;;  %v2905_v46 = vcombine.low %v490_v31, %v492_v32  ;;  %v447_v5 = vld [vmem:[%s3743_s23 + $0xd0] sm:$0xff] }
  0x47   : > { %1705 = vperm.xlu1 %3379, %v1571_v14  }
  0x48   : > { %1190 = vmatmul.mubr.bf16.gmra.mrb[16].mxu0 %v2883_v41  ;;  %1700 = vperm.xlu0 %3378, %v1570_v13   ;;  %v493_v41 = vunpack.c.l.s8.bf16 %v441_v39 }
  0x49   : > { %1351 = vmatmul.mubr.bf16.gmra.mrb[16].mxu1 %v2885_v42  ;;  %1197 = vmatprep.mubr.bf16.mxu0 %v2888_v44  ;;  %v495_v42 = vunpack.c.l.s8.bf16 %v442_v40  ;;  %v496_v44 = vunpack.c.h.s8.bf16 %v442_v40 }
  0x4a   : > { %1358 = vmatprep.mubr.bf16.mxu1 %v2890_v45  ;;  %v2903_v45 = vcombine.low %v489_v29, %v491_v30  ;;  %v451_v29 = vld [vmem:[%s3743_s23 + $0xf0] sm:$0xff]  ;;  %v452_v30 = vld [vmem:[%s3743_s23 + $0xf8] sm:$0xff] }
  0x4b   : > { %1715 = vperm.xlu1 %3379, %v1573_v22   ;;  %v2908_v47 = vcombine.high %v493_v41, %v495_v42  ;;  %v2910_v48 = vcombine.high %v494_v43, %v496_v44  ;;  %v2907_v55 = vcombine.low %v493_v41, %v495_v42  ;;  %v512_v22 = vunpack.c.h.s8.bf16 %v450_v18 }
  0x4c   : > { %1710 = vperm.xlu0 %3378, %v1572_v19   ;;  %v509_v19 = vunpack.c.l.s8.bf16 %v449_v17  ;;  %v513_v31 = vunpack.c.l.s8.bf16 %v451_v29  ;;  %v515_v32 = vunpack.c.l.s8.bf16 %v452_v30 }
  0x4e   : > { %v2927_v39 = vcombine.low %v513_v31, %v515_v32 }
  0x4f   : > { %1725 = vperm.xlu1 %3379, %v1575_v28   ;;  %v3419_v28 = vld [vmem:[%s4354_s4 + $0x38] sm:$0xff]  }
  0x50   : > { %1198 = vmatmul.mubr.bf16.gmra.mrb[20].mxu0 %v2887_v56  ;;  %1720 = vperm.xlu0 %3378, %v1574_v27   ;;  %v2909_v56 = vcombine.low %v494_v43, %v496_v44 }
  0x51   : > { %1359 = vmatmul.mubr.bf16.gmra.mrb[20].mxu1 %v2889_v57  ;;  %1205 = vmatprep.mubr.bf16.mxu0 %v2892_v59  ;;  %v2912_v57 = vcombine.high %v497_v51, %v499_v52  ;;  %v445_v59 = vld [vmem:[%s3743_s23 + $0xc0] sm:$0xff] }
  0x52   : > { %1366 = vmatprep.mubr.bf16.mxu1 %v2894_v60  ;;  %v446_v60 = vld [vmem:[%s3743_s23 + $0xc8] sm:$0xff]  ;;  %v501_v61 = vunpack.c.l.s8.bf16 %v445_v59  ;;  %v502_v63 = vunpack.c.h.s8.bf16 %v445_v59 }
  0x53   : > { %1735 = vperm.xlu1 %3379, %v1577_v36   ;;  %v503_v62 = vunpack.c.l.s8.bf16 %v446_v60  ;;  %v504_v0 = vunpack.c.h.s8.bf16 %v446_v60 }
  0x54   : > { %1730 = vperm.xlu0 %3378, %v1576_v33   ;;  %v514_v33 = vunpack.c.h.s8.bf16 %v451_v29 }
  0x55   : > { %v2916_v3 = vcombine.high %v501_v61, %v503_v62  ;;  %v2918_v4 = vcombine.high %v502_v63, %v504_v0  ;;  %v2915_v12 = vcombine.low %v501_v61, %v503_v62  ;;  %v2917_v13 = vcombine.low %v502_v63, %v504_v0  ;;  %v3420_v0 = vld [vmem:[%s4356_s6] sm:$0xff]  }
  0x56   : > { %3305 = vmatprep.subr.bf16.mxu1 %v3420_v0 }
  0x57   : > { %3306 = vmatpush3.bf16.msra.mxu1 %v3420_v0 }
  0x58   : > { %1206 = vmatmul.mubr.bf16.gmra.mrb[24].mxu0 %v2891_v6  ;;  %v448_v6 = vld [vmem:[%s3743_s23 + $0xd8] sm:$0xff] }
  0x59   : > { %1367 = vmatmul.mubr.bf16.gmra.mrb[24].mxu1 %v2893_v7  ;;  %1213 = vmatprep.mubr.bf16.mxu0 %v2896_v9  ;;  %v505_v7 = vunpack.c.l.s8.bf16 %v447_v5  ;;  %v507_v8 = vunpack.c.l.s8.bf16 %v448_v6  ;;  %v506_v9 = vunpack.c.h.s8.bf16 %v447_v5 }
  0x5a   : > { %1374 = vmatprep.mubr.bf16.mxu1 %v2898_v10  ;;  %v508_v10 = vunpack.c.h.s8.bf16 %v448_v6 }
  0x5b   : > { %v2920_v14 = vcombine.high %v505_v7, %v507_v8 }
  0x5c   : > { %v2922_v15 = vcombine.high %v506_v9, %v508_v10  ;;  %v2921_v25 = vcombine.low %v506_v9, %v508_v10 }
  0x60   : > { %1214 = vmatmul.mubr.bf16.gmra.mrb[28].mxu0 %v2895_v20  ;;  %v511_v20 = vunpack.c.l.s8.bf16 %v450_v18 }
  0x61   : > { %1375 = vmatmul.mubr.bf16.gmra.mrb[28].mxu1 %v2897_v21  ;;  %1221 = vmatprep.mubr.bf16.mxu0 %v2900_v23  ;;  %v510_v21 = vunpack.c.h.s8.bf16 %v449_v17  ;;  %v3418_v23 = vld [vmem:[%s4354_s4 + $0x30] sm:$0xff]  }
  0x62   : > { %1382 = vmatprep.mubr.bf16.mxu1 %v2902_v24  ;;  %3269 = vmatprep.subr.bf16.mxu0 %v3418_v23  ;;  %v2919_v24 = vcombine.low %v505_v7, %v507_v8  ;;  %v2924_v26 = vcombine.high %v509_v19, %v511_v20 }
  0x63   : > { %v2926_v27 = vcombine.high %v510_v21, %v512_v22  ;;  %3270 = vmatpush3.bf16.msra.mxu0 %v3418_v23  ;;  %v2925_v36 = vcombine.low %v510_v21, %v512_v22 }
  0x64   : > { %3271 = vmatprep.subr.bf16.mxu0 %v3419_v28 }
  0x67   : > { %3272 = vmatpush3.bf16.msra.mxu0 %v3419_v28 }
  0x68   : > { %1222 = vmatmul.mubr.bf16.gmra.mrb[32].mxu0 %v2899_v34  ;;  %v516_v34 = vunpack.c.h.s8.bf16 %v452_v30 }
  0x69   : > { %1383 = vmatmul.mubr.bf16.gmra.mrb[32].mxu1 %v2901_v35  ;;  %1229 = vmatprep.mubr.bf16.mxu0 %v2904_v37  ;;  %v2923_v35 = vcombine.low %v509_v19, %v511_v20  ;;  %v2928_v37 = vcombine.high %v513_v31, %v515_v32 }
  0x6a   : > { %1390 = vmatprep.mubr.bf16.mxu1 %v2906_v38  ;;  %v2930_v38 = vcombine.high %v514_v33, %v516_v34  ;;  %v2929_v40 = vcombine.low %v514_v33, %v516_v34 }
  0x70   : > { %1230 = vmatmul.mubr.bf16.gmra.mrb[36].mxu0 %v2903_v45 }
  0x71   : > { %1391 = vmatmul.mubr.bf16.gmra.mrb[36].mxu1 %v2905_v46  ;;  %1237 = vmatprep.mubr.bf16.mxu0 %v2908_v47 }
  0x72   : > { %1398 = vmatprep.mubr.bf16.mxu1 %v2910_v48 }
  0x78   : > { %1238 = vmatmul.mubr.bf16.gmra.mrb[40].mxu0 %v2907_v55  ;;  %v3848_v55 = vld [vmem:[%s4353_s3] ss:$0 sm:$0xff] }
  0x79   : > { %1399 = vmatmul.mubr.bf16.gmra.mrb[40].mxu1 %v2909_v56  ;;  %1245 = vmatprep.mubr.bf16.mxu0 %v2912_v57 }
  0x7a   : > { %1406 = vmatprep.mubr.bf16.mxu1 %v2914_v58 }
  0x80   : > { %1246 = vmatmul.mubr.bf16.gmra.mrb[44].mxu0 %v2911_v1  ;;  %v3421_v1 = vld [vmem:[%s4356_s6 + $0x8] sm:$0xff]  }
  0x81   : > { %1407 = vmatmul.mubr.bf16.gmra.mrb[44].mxu1 %v2913_v2  ;;  %1253 = vmatprep.mubr.bf16.mxu0 %v2916_v3 }
  0x82   : > { %1414 = vmatprep.mubr.bf16.mxu1 %v2918_v4  ;;  %3307 = vmatprep.subr.bf16.mxu1 %v3421_v1 }
  0x83   : > { %3308 = vmatpush3.bf16.msra.mxu1 %v3421_v1 }
  0x84   : > { %3309 = vmatprep.subr.bf16.mxu1 %v3422_v16 }
  0x87   : > { %3310 = vmatpush3.bf16.msra.mxu1 %v3422_v16 }
  0x88   : > { %1254 = vmatmul.mubr.bf16.gmra.mrb[48].mxu0 %v2915_v12 }
  0x89   : > { %1415 = vmatmul.mubr.bf16.gmra.mrb[48].mxu1 %v2917_v13  ;;  %1261 = vmatprep.mubr.bf16.mxu0 %v2920_v14 }
  0x8a   : > { %1422 = vmatprep.mubr.bf16.mxu1 %v2922_v15 }
  0x90   : > { %1262 = vmatmul.mubr.bf16.gmra.mrb[52].mxu0 %v2919_v24 }
  0x91   : > { %1423 = vmatmul.mubr.bf16.gmra.mrb[52].mxu1 %v2921_v25  ;;  %1269 = vmatprep.mubr.bf16.mxu0 %v2924_v26  ;;  %v3423_v25 = vld [vmem:[%s4356_s6 + $0x18] sm:$0xff]  }
  0x92   : > { %1430 = vmatprep.mubr.bf16.mxu1 %v2926_v27  ;;  %3311 = vmatprep.subr.bf16.mxu1 %v3423_v25 }
  0x93   : > { %v1591_v58 = vpop.permute.xlu1 %1590  ;;  %3312 = vmatpush3.bf16.msra.mxu1 %v3423_v25 }
  0x97   : > { %v1581_v41 = vpop.permute.xlu0 %1580 }
  0x98   : > { %1270 = vmatmul.mubr.bf16.gmra.mrb[56].mxu0 %v2923_v35  ;;  %v1596_v20 = vpop.permute.xlu1 %1595 }
  0x99   : > { %1431 = vmatmul.mubr.bf16.gmra.mrb[56].mxu1 %v2925_v36  ;;  %1277 = vmatprep.mubr.bf16.mxu0 %v2928_v37 }
  0x9a   : > { %1438 = vmatprep.mubr.bf16.mxu1 %v2930_v38 }
  0x9b   : > { %v1586_v59 = vpop.permute.xlu0 %1585 }
  0xa0   : > { %1278 = vmatmul.mubr.bf16.gmra.mrb[60].mxu0 %v2927_v39 }
  0xa1   : > { %1439 = vmatmul.mubr.bf16.gmra.mrb[60].mxu1 %v2929_v40  ;;  %v3424_v40 = vld [vmem:[%s4356_s6 + $0x20] sm:$0xff]  }
  0xa2   : > { %3313 = vmatprep.subr.bf16.mxu1 %v3424_v40 }
  0xa3   : > { %3314 = vmatpush3.bf16.msra.mxu1 %v3424_v40 }
  0xfb   : > { %v3001_v42 = vpop.f32.mrb[0].mxu0 }
  0xfc   : > { %v3113_v43 = vpop.f32.mrb[0].mxu1  ;;  %v3002_v44 = vpop.f32.mrb[1].mxu0 }
  0xfd   : > { %v3114_v45 = vpop.f32.mrb[1].mxu1  ;;  %v3003_v46 = vadd.f32 %v3002_v44, %v3001_v42  ;;  %v3004_v48 = vpop.f32.mrb[2].mxu0 }
  0xfe   : > { %v3115_v47 = vadd.f32 %v3114_v45, %v3113_v43  ;;  %v3116_v49 = vpop.f32.mrb[2].mxu1  ;;  %v3005_v50 = vpop.f32.mrb[3].mxu0 }
  0xff   : > { %v3117_v51 = vpop.f32.mrb[3].mxu1  ;;  %v3006_v53 = vadd.f32 %v3005_v50, %v3004_v48  ;;  %v1606_v45 = vpop.permute.xlu1 %1605  ;;  %v3425_v50 = vld [vmem:[%s4356_s6 + $0x28] sm:$0xff]  }
 0x100   : > { %v1321_v52 = vadd.f32 %v3115_v47, %v3003_v46  ;;  %v3118_v54 = vadd.f32 %v3117_v51, %v3116_v49  ;;  %3315 = vmatprep.subr.bf16.mxu1 %v3425_v50 }
 0x101   : > { %3316 = vmatpush3.bf16.msra.mxu1 %v3425_v50 }
 0x102   : > { %v1738_v56 = vmul.f32 %v1581_v41, %v1321_v52  ;;  %v1324_v57 = vadd.f32 %v3118_v54, %v3006_v53  ;;  %v1601_v41 = vpop.permute.xlu0 %1600 }
 0x103   : > { %v3007_v61 = vpop.f32.mrb[4].mxu0 }
 0x104   : > { %v1739_v60 = vmul.f32 %v1586_v59, %v1324_v57  ;;  %v3119_v62 = vpop.f32.mrb[4].mxu1  ;;  %v1777_v63 = vadd.f32 %v3848_v55, %v1738_v56  ;;  %v3008_v2 = vpop.f32.mrb[5].mxu0 }
 0x105   : > { %v3120_v3 = vpop.f32.mrb[5].mxu1  ;;  %v3009_v5 = vadd.f32 %v3008_v2, %v3007_v61  ;;  %v3010_v7 = vpop.f32.mrb[6].mxu0 }
 0x106   : > { %v1778_v4 = vadd.f32 %v3848_v55, %v1739_v60  ;;  %v3121_v6 = vadd.f32 %v3120_v3, %v3119_v62  ;;  %v3122_v8 = vpop.f32.mrb[6].mxu1  ;;  %v3011_v9 = vpop.f32.mrb[7].mxu0  ;;  %v1809_v11 = vmax.f32 %v1777_v63, 0.0 }
 0x107   : > { %v3123_v10 = vpop.f32.mrb[7].mxu1  ;;  %v3012_v14 = vadd.f32 %v3011_v9, %v3010_v7  ;;  %v1611_v2 = vpop.permute.xlu0 %1610 }
 0x108   : > { %v1810_v12 = vmax.f32 %v1778_v4, 0.0  ;;  %v1329_v13 = vadd.f32 %v3121_v6, %v3009_v5  ;;  %v3124_v15 = vadd.f32 %v3123_v10, %v3122_v8  ;;  %v1616_v6 = vpop.permute.xlu1 %1615 }
 0x10a   : > { %v1740_v17 = vmul.f32 %v1591_v58, %v1329_v13  ;;  %v1332_v18 = vadd.f32 %v3124_v15, %v3012_v14  ;;  %v1841_v19 = vpack.c.bf16 %v1810_v12, %v1809_v11 }
 0x10b   : > { %v3013_v23 = vpop.f32.mrb[8].mxu0  ;;  %v1621_v25 = vpop.permute.xlu0 %1620 }
 0x10c   : > { %v1779_v21 = vadd.f32 %v3848_v55, %v1740_v17  ;;  %v1741_v22 = vmul.f32 %v1596_v20, %v1332_v18  ;;  %v3125_v24 = vpop.f32.mrb[8].mxu1  ;;  %3273 = vmatprep.mubr.bf16.mxu0 %v1841_v19  ;;  %v3014_v26 = vpop.f32.mrb[9].mxu0 }
 0x10d   : > { %v3126_v27 = vpop.f32.mrb[9].mxu1  ;;  %v3015_v29 = vadd.f32 %v3014_v26, %v3013_v23  ;;  %v3016_v31 = vpop.f32.mrb[10].mxu0 }
 0x10e   : > { %v1780_v28 = vadd.f32 %v3848_v55, %v1741_v22  ;;  %v3127_v30 = vadd.f32 %v3126_v27, %v3125_v24  ;;  %v3128_v32 = vpop.f32.mrb[10].mxu1  ;;  %v1811_v33 = vmax.f32 %v1779_v21, 0.0  ;;  %v3017_v34 = vpop.f32.mrb[11].mxu0 }
 0x10f   : > { %v3129_v35 = vpop.f32.mrb[11].mxu1  ;;  %v3018_v38 = vadd.f32 %v3017_v34, %v3016_v31 }
 0x110   : > { %v1812_v36 = vmax.f32 %v1780_v28, 0.0  ;;  %v1337_v37 = vadd.f32 %v3127_v30, %v3015_v29  ;;  %v3130_v39 = vadd.f32 %v3129_v35, %v3128_v32  ;;  %v1626_v29 = vpop.permute.xlu1 %1625 }
 0x112   : > { %v1842_v42 = vpack.c.bf16 %v1812_v36, %v1811_v33  ;;  %v1742_v43 = vmul.f32 %v1601_v41, %v1337_v37  ;;  %v1340_v44 = vadd.f32 %v3130_v39, %v3018_v38 }
 0x113   : > { %v3019_v47 = vpop.f32.mrb[12].mxu0 }
 0x114   : > { %v1743_v46 = vmul.f32 %v1606_v45, %v1340_v44  ;;  %v3131_v48 = vpop.f32.mrb[12].mxu1  ;;  %3274 = vmatmul.mubr.bf16.vlgmr.msra.gmra.mrb[64].mxu0 %v1842_v42  ;;  %v1781_v49 = vadd.f32 %v3848_v55, %v1742_v43  ;;  %v3020_v51 = vpop.f32.mrb[13].mxu0 }
 0x115   : > { %v3132_v52 = vpop.f32.mrb[13].mxu1  ;;  %v3021_v53 = vadd.f32 %v3020_v51, %v3019_v47  ;;  %v3022_v56 = vpop.f32.mrb[14].mxu0 }
 0x116   : > { %v3133_v54 = vadd.f32 %v3132_v52, %v3131_v48  ;;  %v3134_v57 = vpop.f32.mrb[14].mxu1  ;;  %v1782_v58 = vadd.f32 %v3848_v55, %v1743_v46  ;;  %v3023_v59 = vpop.f32.mrb[15].mxu0  ;;  %v1813_v61 = vmax.f32 %v1781_v49, 0.0 }
 0x117   : > { %v3135_v60 = vpop.f32.mrb[15].mxu1  ;;  %v3024_v63 = vadd.f32 %v3023_v59, %v3022_v56  ;;  %v1631_v48 = vpop.permute.xlu0 %1630 }
 0x118   : > { %v1345_v62 = vadd.f32 %v3133_v54, %v3021_v53  ;;  %v3136_v0 = vadd.f32 %v3135_v60, %v3134_v57  ;;  %v1814_v1 = vmax.f32 %v1782_v58, 0.0  ;;  %v1636_v52 = vpop.permute.xlu1 %1635 }
 0x11a   : > { %v1744_v3 = vmul.f32 %v1611_v2, %v1345_v62  ;;  %v1348_v4 = vadd.f32 %v3136_v0, %v3024_v63  ;;  %v1843_v5 = vpack.c.bf16 %v1814_v1, %v1813_v61 }
 0x11b   : > { %v3025_v8 = vpop.f32.mrb[16].mxu0 }
 0x11c   : > { %v1745_v7 = vmul.f32 %v1616_v6, %v1348_v4  ;;  %v3137_v9 = vpop.f32.mrb[16].mxu1  ;;  %3277 = vmatprep.mubr.bf16.mxu0 %v1843_v5  ;;  %v1783_v10 = vadd.f32 %v3848_v55, %v1744_v3  ;;  %v3026_v11 = vpop.f32.mrb[17].mxu0 }
 0x11d   : > { %v3138_v12 = vpop.f32.mrb[17].mxu1  ;;  %v3027_v13 = vadd.f32 %v3026_v11, %v3025_v8  ;;  %v3028_v15 = vpop.f32.mrb[18].mxu0 }
 0x11e   : > { %v3139_v14 = vadd.f32 %v3138_v12, %v3137_v9  ;;  %v3140_v16 = vpop.f32.mrb[18].mxu1  ;;  %v1784_v17 = vadd.f32 %v3848_v55, %v1745_v7  ;;  %v3029_v18 = vpop.f32.mrb[19].mxu0  ;;  %v1815_v20 = vmax.f32 %v1783_v10, 0.0 }
 0x11f   : > { %v3141_v19 = vpop.f32.mrb[19].mxu1  ;;  %v3030_v22 = vadd.f32 %v3029_v18, %v3028_v15  ;;  %v1641_v8 = vpop.permute.xlu0 %1640 }
 0x120   : > { %v1353_v21 = vadd.f32 %v3139_v14, %v3027_v13  ;;  %v3142_v23 = vadd.f32 %v3141_v19, %v3140_v16  ;;  %v1816_v24 = vmax.f32 %v1784_v17, 0.0  ;;  %v1646_v12 = vpop.permute.xlu1 %1645 }
 0x122   : > { %v1746_v26 = vmul.f32 %v1621_v25, %v1353_v21  ;;  %v1356_v27 = vadd.f32 %v3142_v23, %v3030_v22  ;;  %v1844_v28 = vpack.c.bf16 %v1816_v24, %v1815_v20 }
 0x123   : > { %v3031_v31 = vpop.f32.mrb[20].mxu0 }
 0x124   : > { %v1747_v30 = vmul.f32 %v1626_v29, %v1356_v27  ;;  %v3143_v32 = vpop.f32.mrb[20].mxu1  ;;  %3278 = vmatmul.mubr.bf16.gmra.mrb[68].mxu0 %v1844_v28  ;;  %v1785_v33 = vadd.f32 %v3848_v55, %v1746_v26  ;;  %v3032_v34 = vpop.f32.mrb[21].mxu0 }
 0x125   : > { %v3144_v35 = vpop.f32.mrb[21].mxu1  ;;  %v3033_v36 = vadd.f32 %v3032_v34, %v3031_v31  ;;  %v3034_v38 = vpop.f32.mrb[22].mxu0 }
 0x126   : > { %v3145_v37 = vadd.f32 %v3144_v35, %v3143_v32  ;;  %v3146_v39 = vpop.f32.mrb[22].mxu1  ;;  %v1786_v40 = vadd.f32 %v3848_v55, %v1747_v30  ;;  %v3035_v41 = vpop.f32.mrb[23].mxu0  ;;  %v1817_v43 = vmax.f32 %v1785_v33, 0.0 }
 0x127   : > { %v3147_v42 = vpop.f32.mrb[23].mxu1  ;;  %v3036_v45 = vadd.f32 %v3035_v41, %v3034_v38  ;;  %v1651_v31 = vpop.permute.xlu0 %1650 }
 0x128   : > { %v1361_v44 = vadd.f32 %v3145_v37, %v3033_v36  ;;  %v3148_v46 = vadd.f32 %v3147_v42, %v3146_v39  ;;  %v1818_v47 = vmax.f32 %v1786_v40, 0.0  ;;  %v1656_v35 = vpop.permute.xlu1 %1655 }
 0x12a   : > { %v1748_v49 = vmul.f32 %v1631_v48, %v1361_v44  ;;  %v1364_v50 = vadd.f32 %v3148_v46, %v3036_v45  ;;  %v1845_v51 = vpack.c.bf16 %v1818_v47, %v1817_v43 }
 0x12b   : > { %v3037_v54 = vpop.f32.mrb[24].mxu0 }
 0x12c   : > { %v1749_v53 = vmul.f32 %v1636_v52, %v1364_v50  ;;  %v3149_v56 = vpop.f32.mrb[24].mxu1  ;;  %3281 = vmatprep.mubr.bf16.mxu0 %v1845_v51  ;;  %v1787_v57 = vadd.f32 %v3848_v55, %v1748_v49  ;;  %v3038_v58 = vpop.f32.mrb[25].mxu0 }
 0x12d   : > { %v3150_v59 = vpop.f32.mrb[25].mxu1  ;;  %v3039_v60 = vadd.f32 %v3038_v58, %v3037_v54  ;;  %v3040_v62 = vpop.f32.mrb[26].mxu0 }
 0x12e   : > { %v3151_v61 = vadd.f32 %v3150_v59, %v3149_v56  ;;  %v3152_v63 = vpop.f32.mrb[26].mxu1  ;;  %v1788_v0 = vadd.f32 %v3848_v55, %v1749_v53  ;;  %v3041_v1 = vpop.f32.mrb[27].mxu0  ;;  %v1819_v3 = vmax.f32 %v1787_v57, 0.0 }
 0x12f   : > { %v3153_v2 = vpop.f32.mrb[27].mxu1  ;;  %v3042_v5 = vadd.f32 %v3041_v1, %v3040_v62  ;;  %v1661_v54 = vpop.permute.xlu0 %1660 }
 0x130   : > { %v1369_v4 = vadd.f32 %v3151_v61, %v3039_v60  ;;  %v3154_v6 = vadd.f32 %v3153_v2, %v3152_v63  ;;  %v1820_v7 = vmax.f32 %v1788_v0, 0.0  ;;  %v1666_v59 = vpop.permute.xlu1 %1665 }
 0x132   : > { %v1750_v9 = vmul.f32 %v1641_v8, %v1369_v4  ;;  %v1372_v10 = vadd.f32 %v3154_v6, %v3042_v5  ;;  %v1846_v11 = vpack.c.bf16 %v1820_v7, %v1819_v3 }
 0x133   : > { %v3043_v14 = vpop.f32.mrb[28].mxu0 }
 0x134   : > { %v1751_v13 = vmul.f32 %v1646_v12, %v1372_v10  ;;  %v3155_v15 = vpop.f32.mrb[28].mxu1  ;;  %3282 = vmatmul.mubr.bf16.gmra.mrb[72].mxu0 %v1846_v11  ;;  %v1789_v16 = vadd.f32 %v3848_v55, %v1750_v9  ;;  %v3044_v17 = vpop.f32.mrb[29].mxu0 }
 0x135   : > { %v3156_v18 = vpop.f32.mrb[29].mxu1  ;;  %v3045_v19 = vadd.f32 %v3044_v17, %v3043_v14  ;;  %v3046_v21 = vpop.f32.mrb[30].mxu0 }
 0x136   : > { %v3157_v20 = vadd.f32 %v3156_v18, %v3155_v15  ;;  %v3158_v22 = vpop.f32.mrb[30].mxu1  ;;  %v1790_v23 = vadd.f32 %v3848_v55, %v1751_v13  ;;  %v3047_v24 = vpop.f32.mrb[31].mxu0  ;;  %v1821_v26 = vmax.f32 %v1789_v16, 0.0 }
 0x137   : > { %v3159_v25 = vpop.f32.mrb[31].mxu1  ;;  %v3048_v28 = vadd.f32 %v3047_v24, %v3046_v21  ;;  %v1671_v14 = vpop.permute.xlu0 %1670 }
 0x138   : > { %v1377_v27 = vadd.f32 %v3157_v20, %v3045_v19  ;;  %v3160_v29 = vadd.f32 %v3159_v25, %v3158_v22  ;;  %v1822_v30 = vmax.f32 %v1790_v23, 0.0  ;;  %v1676_v18 = vpop.permute.xlu1 %1675 }
 0x13a   : > { %v1752_v32 = vmul.f32 %v1651_v31, %v1377_v27  ;;  %v1380_v33 = vadd.f32 %v3160_v29, %v3048_v28  ;;  %v1847_v34 = vpack.c.bf16 %v1822_v30, %v1821_v26 }
 0x13b   : > { %v3049_v37 = vpop.f32.mrb[32].mxu0 }
 0x13c   : > { %v1753_v36 = vmul.f32 %v1656_v35, %v1380_v33  ;;  %v3161_v38 = vpop.f32.mrb[32].mxu1  ;;  %3285 = vmatprep.mubr.bf16.mxu0 %v1847_v34  ;;  %v1791_v39 = vadd.f32 %v3848_v55, %v1752_v32  ;;  %v3050_v40 = vpop.f32.mrb[33].mxu0 }
 0x13d   : > { %v3162_v41 = vpop.f32.mrb[33].mxu1  ;;  %v3051_v42 = vadd.f32 %v3050_v40, %v3049_v37  ;;  %v3052_v44 = vpop.f32.mrb[34].mxu0 }
 0x13e   : > { %v3163_v43 = vadd.f32 %v3162_v41, %v3161_v38  ;;  %v3164_v45 = vpop.f32.mrb[34].mxu1  ;;  %v1792_v46 = vadd.f32 %v3848_v55, %v1753_v36  ;;  %v3053_v47 = vpop.f32.mrb[35].mxu0  ;;  %v1823_v49 = vmax.f32 %v1791_v39, 0.0 }
 0x13f   : > { %v3165_v48 = vpop.f32.mrb[35].mxu1  ;;  %v3054_v51 = vadd.f32 %v3053_v47, %v3052_v44  ;;  %v1681_v37 = vpop.permute.xlu0 %1680 }
 0x140   : > { %v1385_v50 = vadd.f32 %v3163_v43, %v3051_v42  ;;  %v3166_v52 = vadd.f32 %v3165_v48, %v3164_v45  ;;  %v1824_v53 = vmax.f32 %v1792_v46, 0.0  ;;  %v1686_v41 = vpop.permute.xlu1 %1685 }
 0x142   : > { %v1754_v56 = vmul.f32 %v1661_v54, %v1385_v50  ;;  %v1388_v57 = vadd.f32 %v3166_v52, %v3054_v51  ;;  %v1848_v58 = vpack.c.bf16 %v1824_v53, %v1823_v49 }
 0x143   : > { %v3055_v61 = vpop.f32.mrb[36].mxu0 }
 0x144   : > { %v1755_v60 = vmul.f32 %v1666_v59, %v1388_v57  ;;  %v3167_v62 = vpop.f32.mrb[36].mxu1  ;;  %3286 = vmatmul.mubr.bf16.gmra.mrb[76].mxu0 %v1848_v58  ;;  %v1793_v63 = vadd.f32 %v3848_v55, %v1754_v56  ;;  %v3056_v0 = vpop.f32.mrb[37].mxu0 }
 0x145   : > { %v3168_v1 = vpop.f32.mrb[37].mxu1  ;;  %v3057_v2 = vadd.f32 %v3056_v0, %v3055_v61  ;;  %v3058_v4 = vpop.f32.mrb[38].mxu0 }
 0x146   : > { %v3169_v3 = vadd.f32 %v3168_v1, %v3167_v62  ;;  %v3170_v5 = vpop.f32.mrb[38].mxu1  ;;  %v1794_v6 = vadd.f32 %v3848_v55, %v1755_v60  ;;  %v3059_v7 = vpop.f32.mrb[39].mxu0  ;;  %v1825_v9 = vmax.f32 %v1793_v63, 0.0 }
 0x147   : > { %v3171_v8 = vpop.f32.mrb[39].mxu1  ;;  %v3060_v11 = vadd.f32 %v3059_v7, %v3058_v4  ;;  %v1691_v61 = vpop.permute.xlu0 %1690 }
 0x148   : > { %v1393_v10 = vadd.f32 %v3169_v3, %v3057_v2  ;;  %v3172_v12 = vadd.f32 %v3171_v8, %v3170_v5  ;;  %v1826_v13 = vmax.f32 %v1794_v6, 0.0  ;;  %v1696_v1 = vpop.permute.xlu1 %1695 }
 0x14a   : > { %v1756_v15 = vmul.f32 %v1671_v14, %v1393_v10  ;;  %v1396_v16 = vadd.f32 %v3172_v12, %v3060_v11  ;;  %v1849_v17 = vpack.c.bf16 %v1826_v13, %v1825_v9 }
 0x14b   : > { %v3061_v20 = vpop.f32.mrb[40].mxu0 }
 0x14c   : > { %v1757_v19 = vmul.f32 %v1676_v18, %v1396_v16  ;;  %v3173_v21 = vpop.f32.mrb[40].mxu1  ;;  %3289 = vmatprep.mubr.bf16.mxu0 %v1849_v17  ;;  %v1795_v22 = vadd.f32 %v3848_v55, %v1756_v15  ;;  %v3062_v23 = vpop.f32.mrb[41].mxu0 }
 0x14d   : > { %v3174_v24 = vpop.f32.mrb[41].mxu1  ;;  %v3063_v25 = vadd.f32 %v3062_v23, %v3061_v20  ;;  %v3064_v27 = vpop.f32.mrb[42].mxu0 }
 0x14e   : > { %v3175_v26 = vadd.f32 %v3174_v24, %v3173_v21  ;;  %v3176_v28 = vpop.f32.mrb[42].mxu1  ;;  %v1796_v29 = vadd.f32 %v3848_v55, %v1757_v19  ;;  %v3065_v30 = vpop.f32.mrb[43].mxu0  ;;  %v1827_v32 = vmax.f32 %v1795_v22, 0.0 }
 0x14f   : > { %v3177_v31 = vpop.f32.mrb[43].mxu1  ;;  %v3066_v34 = vadd.f32 %v3065_v30, %v3064_v27  ;;  %v1701_v20 = vpop.permute.xlu0 %1700 }
 0x150   : > { %v1401_v33 = vadd.f32 %v3175_v26, %v3063_v25  ;;  %v3178_v35 = vadd.f32 %v3177_v31, %v3176_v28  ;;  %v1828_v36 = vmax.f32 %v1796_v29, 0.0  ;;  %v1706_v24 = vpop.permute.xlu1 %1705 }
 0x152   : > { %v1758_v38 = vmul.f32 %v1681_v37, %v1401_v33  ;;  %v1404_v39 = vadd.f32 %v3178_v35, %v3066_v34  ;;  %v1850_v40 = vpack.c.bf16 %v1828_v36, %v1827_v32 }
 0x153   : > { %v3067_v43 = vpop.f32.mrb[44].mxu0 }
 0x154   : > { %v1759_v42 = vmul.f32 %v1686_v41, %v1404_v39  ;;  %v3179_v44 = vpop.f32.mrb[44].mxu1  ;;  %3290 = vmatmul.mubr.bf16.gmra.mrb[80].mxu0 %v1850_v40  ;;  %v1797_v45 = vadd.f32 %v3848_v55, %v1758_v38  ;;  %v3068_v46 = vpop.f32.mrb[45].mxu0 }
 0x155   : > { %v3180_v47 = vpop.f32.mrb[45].mxu1  ;;  %v3069_v48 = vadd.f32 %v3068_v46, %v3067_v43  ;;  %v3070_v50 = vpop.f32.mrb[46].mxu0  ;;  %v3426_v43 = vld [vmem:[%s4356_s6 + $0x30] sm:$0xff]  }
 0x156   : > { %v3181_v49 = vadd.f32 %v3180_v47, %v3179_v44  ;;  %v3182_v51 = vpop.f32.mrb[46].mxu1  ;;  %v1798_v52 = vadd.f32 %v3848_v55, %v1759_v42  ;;  %v3071_v53 = vpop.f32.mrb[47].mxu0  ;;  %v1829_v56 = vmax.f32 %v1797_v45, 0.0  ;;  %3317 = vmatprep.subr.bf16.mxu1 %v3426_v43 }
 0x157   : > { %v3183_v54 = vpop.f32.mrb[47].mxu1  ;;  %v3072_v58 = vadd.f32 %v3071_v53, %v3070_v50  ;;  %v1711_v44 = vpop.permute.xlu0 %1710  ;;  %3318 = vmatpush3.bf16.msra.mxu1 %v3426_v43  ;;  %v3427_v53 = vld [vmem:[%s4356_s6 + $0x38] sm:$0xff]  }
 0x158   : > { %v1409_v57 = vadd.f32 %v3181_v49, %v3069_v48  ;;  %v3184_v59 = vadd.f32 %v3183_v54, %v3182_v51  ;;  %v1830_v60 = vmax.f32 %v1798_v52, 0.0  ;;  %v1716_v48 = vpop.permute.xlu1 %1715  ;;  %3319 = vmatprep.subr.bf16.mxu1 %v3427_v53 }
 0x15a   : > { %v1760_v62 = vmul.f32 %v1691_v61, %v1409_v57  ;;  %v1412_v63 = vadd.f32 %v3184_v59, %v3072_v58  ;;  %v1851_v0 = vpack.c.bf16 %v1830_v60, %v1829_v56 }
 0x15b   : > { %v3073_v3 = vpop.f32.mrb[48].mxu0  ;;  %3320 = vmatpush3.bf16.msra.mxu1 %v3427_v53 }
 0x15c   : > { %v1761_v2 = vmul.f32 %v1696_v1, %v1412_v63  ;;  %v3185_v4 = vpop.f32.mrb[48].mxu1  ;;  %3293 = vmatprep.mubr.bf16.mxu0 %v1851_v0  ;;  %v1799_v5 = vadd.f32 %v3848_v55, %v1760_v62  ;;  %v3074_v6 = vpop.f32.mrb[49].mxu0 }
 0x15d   : > { %v3186_v7 = vpop.f32.mrb[49].mxu1  ;;  %v3075_v8 = vadd.f32 %v3074_v6, %v3073_v3  ;;  %v3076_v10 = vpop.f32.mrb[50].mxu0 }
 0x15e   : > { %v3187_v9 = vadd.f32 %v3186_v7, %v3185_v4  ;;  %v3188_v11 = vpop.f32.mrb[50].mxu1  ;;  %v1800_v12 = vadd.f32 %v3848_v55, %v1761_v2  ;;  %v3077_v13 = vpop.f32.mrb[51].mxu0  ;;  %v1831_v15 = vmax.f32 %v1799_v5, 0.0 }
 0x15f   : > { %v3189_v14 = vpop.f32.mrb[51].mxu1  ;;  %v3078_v17 = vadd.f32 %v3077_v13, %v3076_v10  ;;  %v1721_v5 = vpop.permute.xlu0 %1720 }
 0x160   : > { %v1417_v16 = vadd.f32 %v3187_v9, %v3075_v8  ;;  %v3190_v18 = vadd.f32 %v3189_v14, %v3188_v11  ;;  %v1832_v19 = vmax.f32 %v1800_v12, 0.0  ;;  %v1726_v9 = vpop.permute.xlu1 %1725 }
 0x162   : > { %v1762_v21 = vmul.f32 %v1701_v20, %v1417_v16  ;;  %v1420_v22 = vadd.f32 %v3190_v18, %v3078_v17  ;;  %v1852_v23 = vpack.c.bf16 %v1832_v19, %v1831_v15 }
 0x163   : > { %v3079_v26 = vpop.f32.mrb[52].mxu0 }
 0x164   : > { %v1763_v25 = vmul.f32 %v1706_v24, %v1420_v22  ;;  %v3191_v27 = vpop.f32.mrb[52].mxu1  ;;  %3294 = vmatmul.mubr.bf16.gmra.mrb[84].mxu0 %v1852_v23  ;;  %v1801_v28 = vadd.f32 %v3848_v55, %v1762_v21  ;;  %v3080_v29 = vpop.f32.mrb[53].mxu0 }
 0x165   : > { %v3192_v30 = vpop.f32.mrb[53].mxu1  ;;  %v3081_v31 = vadd.f32 %v3080_v29, %v3079_v26  ;;  %v3082_v33 = vpop.f32.mrb[54].mxu0 }
 0x166   : > { %v3193_v32 = vadd.f32 %v3192_v30, %v3191_v27  ;;  %v3194_v34 = vpop.f32.mrb[54].mxu1  ;;  %v1802_v35 = vadd.f32 %v3848_v55, %v1763_v25  ;;  %v3083_v36 = vpop.f32.mrb[55].mxu0  ;;  %v1833_v38 = vmax.f32 %v1801_v28, 0.0 }
 0x167   : > { %v3195_v37 = vpop.f32.mrb[55].mxu1  ;;  %v3084_v40 = vadd.f32 %v3083_v36, %v3082_v33  ;;  %v1731_v28 = vpop.permute.xlu0 %1730 }
 0x168   : > { %v1425_v39 = vadd.f32 %v3193_v32, %v3081_v31  ;;  %v3196_v41 = vadd.f32 %v3195_v37, %v3194_v34  ;;  %v1834_v42 = vmax.f32 %v1802_v35, 0.0  ;;  %v1736_v32 = vpop.permute.xlu1 %1735 }
 0x16a   : > { %v1764_v45 = vmul.f32 %v1711_v44, %v1425_v39  ;;  %v1428_v46 = vadd.f32 %v3196_v41, %v3084_v40  ;;  %v1853_v47 = vpack.c.bf16 %v1834_v42, %v1833_v38  ;;  %v3909_v39 = vld [vmem:[%s4355_s5] ss:$0 sm:$0xff] }
 0x16b   : > { %v3085_v50 = vpop.f32.mrb[56].mxu0 }
 0x16c   : > { %v1765_v49 = vmul.f32 %v1716_v48, %v1428_v46  ;;  %v3197_v51 = vpop.f32.mrb[56].mxu1  ;;  %3297 = vmatprep.mubr.bf16.mxu0 %v1853_v47  ;;  %v1803_v52 = vadd.f32 %v3848_v55, %v1764_v45  ;;  %v3086_v54 = vpop.f32.mrb[57].mxu0 }
 0x16d   : > { %v3198_v56 = vpop.f32.mrb[57].mxu1  ;;  %v3087_v57 = vadd.f32 %v3086_v54, %v3085_v50  ;;  %v3088_v59 = vpop.f32.mrb[58].mxu0 }
 0x16e   : > { %v3199_v58 = vadd.f32 %v3198_v56, %v3197_v51  ;;  %v3200_v60 = vpop.f32.mrb[58].mxu1  ;;  %v1804_v61 = vadd.f32 %v3848_v55, %v1765_v49  ;;  %v3089_v62 = vpop.f32.mrb[59].mxu0  ;;  %v1835_v0 = vmax.f32 %v1803_v52, 0.0 }
 0x16f   : > { %v3201_v63 = vpop.f32.mrb[59].mxu1  ;;  %v3090_v2 = vadd.f32 %v3089_v62, %v3088_v59 }
 0x170   : > { %v1433_v1 = vadd.f32 %v3199_v58, %v3087_v57  ;;  %v3202_v3 = vadd.f32 %v3201_v63, %v3200_v60  ;;  %v1836_v4 = vmax.f32 %v1804_v61, 0.0 }
 0x172   : > { %v1766_v6 = vmul.f32 %v1721_v5, %v1433_v1  ;;  %v1436_v7 = vadd.f32 %v3202_v3, %v3090_v2  ;;  %v1854_v8 = vpack.c.bf16 %v1836_v4, %v1835_v0 }
 0x173   : > { %v3091_v11 = vpop.f32.mrb[60].mxu0 }
 0x174   : > { %v1767_v10 = vmul.f32 %v1726_v9, %v1436_v7  ;;  %v3203_v12 = vpop.f32.mrb[60].mxu1  ;;  %3298 = vmatmul.mubr.bf16.gmra.mrb[88].mxu0 %v1854_v8  ;;  %v1805_v13 = vadd.f32 %v3848_v55, %v1766_v6  ;;  %v3092_v14 = vpop.f32.mrb[61].mxu0 }
 0x175   : > { %v3204_v15 = vpop.f32.mrb[61].mxu1  ;;  %v3093_v16 = vadd.f32 %v3092_v14, %v3091_v11  ;;  %v3094_v18 = vpop.f32.mrb[62].mxu0 }
 0x176   : > { %v3205_v17 = vadd.f32 %v3204_v15, %v3203_v12  ;;  %v3206_v19 = vpop.f32.mrb[62].mxu1  ;;  %v1806_v20 = vadd.f32 %v3848_v55, %v1767_v10  ;;  %v3095_v21 = vpop.f32.mrb[63].mxu0  ;;  %v1837_v23 = vmax.f32 %v1805_v13, 0.0 }
 0x177   : > { %v3207_v22 = vpop.f32.mrb[63].mxu1  ;;  %v3096_v25 = vadd.f32 %v3095_v21, %v3094_v18 }
 0x178   : > { %v1441_v24 = vadd.f32 %v3205_v17, %v3093_v16  ;;  %v3208_v26 = vadd.f32 %v3207_v22, %v3206_v19  ;;  %v1838_v27 = vmax.f32 %v1806_v20, 0.0 }
 0x17a   : > { %v1768_v29 = vmul.f32 %v1731_v28, %v1441_v24  ;;  %v1444_v30 = vadd.f32 %v3208_v26, %v3096_v25  ;;  %v1855_v31 = vpack.c.bf16 %v1838_v27, %v1837_v23 }
 0x17c   : > { %v1769_v33 = vmul.f32 %v1736_v32, %v1444_v30  ;;  %3301 = vmatprep.mubr.bf16.mxu0 %v1855_v31  ;;  %v1807_v34 = vadd.f32 %v3848_v55, %v1768_v29 }
 0x17e   : > { %v1808_v35 = vadd.f32 %v3848_v55, %v1769_v33  ;;  %v1839_v36 = vmax.f32 %v1807_v34, 0.0 }
 0x180   : > { %v1840_v37 = vmax.f32 %v1808_v35, 0.0 }
 0x182   : > { %v1856_v38 = vpack.c.bf16 %v1840_v37, %v1839_v36 }
 0x184   : > { %3302 = vmatmul.mubr.bf16.gmra.mrb[92].mxu0 %v1856_v38 }
 0x1e7   : > { %v3275_v40 = vpop.f32.mrb[64].mxu0 }
 0x1e8   : > { %v1971_v41 = vadd.f32 %v3275_v40, %v3909_v39  ;;  %v1962_v42 = vpop.f32.mrb[65].mxu0 }
 0x1e9   : > { %v1963_v43 = vadd.f32 %v3909_v39, %v1962_v42  ;;  %v3276_v44 = vpop.f32.mrb[66].mxu0 }
 0x1ea   : > { %v1974_v45 = vadd.f32 %v3276_v44, %v3909_v39  ;;  %v1965_v46 = vpop.f32.mrb[67].mxu0  ;;  %v2091_v47 = vmax.f32 %v1971_v41, 0.0 }
 0x1eb   : > { %v1966_v55 = vadd.f32 %v3909_v39, %v1965_v46  ;;  %v2089_v49 = vmax.f32 %v1963_v43, 0.0 }
 0x1ec   : > { %v2092_v48 = vmax.f32 %v1974_v45, 0.0 }
 0x1ed   : > { %v2090_v50 = vmax.f32 %v1966_v55, 0.0 }
 0x1ee   : > { %v2122_v51 = vpack.c.bf16 %v2092_v48, %v2091_v47 }
 0x1ef   : > { %v2121_v52 = vpack.c.bf16 %v2090_v50, %v2089_v49 }
 0x1f1   : > { %3321 = vmatprep.mubr.bf16.mxu1 %v2121_v52 }
 0x1f2   : > { %3322 = vmatmul.mubr.bf16.vlgmr.msra.gmra.mrb[64].mxu1 %v2122_v51 }
 0x1f7   : > { %v3279_v53 = vpop.f32.mrb[68].mxu0 }
 0x1f8   : > { %v1987_v54 = vadd.f32 %v3279_v53, %v3909_v39  ;;  %v1978_v56 = vpop.f32.mrb[69].mxu0 }
 0x1f9   : > { %v1979_v57 = vadd.f32 %v3909_v39, %v1978_v56  ;;  %v3280_v58 = vpop.f32.mrb[70].mxu0 }
 0x1fa   : > { %v1990_v59 = vadd.f32 %v3280_v58, %v3909_v39  ;;  %v1981_v60 = vpop.f32.mrb[71].mxu0  ;;  %v2095_v62 = vmax.f32 %v1987_v54, 0.0 }
 0x1fb   : > { %v1982_v61 = vadd.f32 %v3909_v39, %v1981_v60  ;;  %v2093_v0 = vmax.f32 %v1979_v57, 0.0 }
 0x1fc   : > { %v2096_v63 = vmax.f32 %v1990_v59, 0.0 }
 0x1fd   : > { %v2094_v1 = vmax.f32 %v1982_v61, 0.0 }
 0x1fe   : > { %v2124_v2 = vpack.c.bf16 %v2096_v63, %v2095_v62 }
 0x1ff   : > { %v2123_v3 = vpack.c.bf16 %v2094_v1, %v2093_v0 }
 0x201   : > { %3325 = vmatprep.mubr.bf16.mxu1 %v2123_v3 }
 0x202   : > { %3326 = vmatmul.mubr.bf16.gmra.mrb[68].mxu1 %v2124_v2 }
 0x207   : > { %v3283_v4 = vpop.f32.mrb[72].mxu0 }
 0x208   : > { %v2003_v5 = vadd.f32 %v3283_v4, %v3909_v39  ;;  %v1994_v6 = vpop.f32.mrb[73].mxu0 }
 0x209   : > { %v1995_v7 = vadd.f32 %v3909_v39, %v1994_v6  ;;  %v3284_v8 = vpop.f32.mrb[74].mxu0 }
 0x20a   : > { %v2006_v9 = vadd.f32 %v3284_v8, %v3909_v39  ;;  %v1997_v10 = vpop.f32.mrb[75].mxu0  ;;  %v2099_v12 = vmax.f32 %v2003_v5, 0.0 }
 0x20b   : > { %v1998_v11 = vadd.f32 %v3909_v39, %v1997_v10  ;;  %v2097_v14 = vmax.f32 %v1995_v7, 0.0 }
 0x20c   : > { %v2100_v13 = vmax.f32 %v2006_v9, 0.0 }
 0x20d   : > { %v2098_v15 = vmax.f32 %v1998_v11, 0.0 }
 0x20e   : > { %v2126_v16 = vpack.c.bf16 %v2100_v13, %v2099_v12 }
 0x20f   : > { %v2125_v17 = vpack.c.bf16 %v2098_v15, %v2097_v14 }
 0x211   : > { %3329 = vmatprep.mubr.bf16.mxu1 %v2125_v17 }
 0x212   : > { %3330 = vmatmul.mubr.bf16.gmra.mrb[72].mxu1 %v2126_v16 }
 0x217   : > { %v3287_v18 = vpop.f32.mrb[76].mxu0 }
 0x218   : > { %v2019_v19 = vadd.f32 %v3287_v18, %v3909_v39  ;;  %v2010_v20 = vpop.f32.mrb[77].mxu0 }
 0x219   : > { %v2011_v21 = vadd.f32 %v3909_v39, %v2010_v20  ;;  %v3288_v22 = vpop.f32.mrb[78].mxu0 }
 0x21a   : > { %v2022_v23 = vadd.f32 %v3288_v22, %v3909_v39  ;;  %v2013_v24 = vpop.f32.mrb[79].mxu0  ;;  %v2103_v26 = vmax.f32 %v2019_v19, 0.0 }
 0x21b   : > { %v2014_v25 = vadd.f32 %v3909_v39, %v2013_v24  ;;  %v2101_v28 = vmax.f32 %v2011_v21, 0.0 }
 0x21c   : > { %v2104_v27 = vmax.f32 %v2022_v23, 0.0 }
 0x21d   : > { %v2102_v29 = vmax.f32 %v2014_v25, 0.0  ;;  %v2369_v25 = vlaneseq }
 0x21e   : > { %v2128_v30 = vpack.c.bf16 %v2104_v27, %v2103_v26  ;;  %v3948_v27 = vld [vmem:[%s4357_s7] ss:$0 sm:$0xff] }
 0x21f   : > { %v2127_v31 = vpack.c.bf16 %v2102_v29, %v2101_v28  ;;  %v3943_v26 = vand.u32 127, %v2369_v25 }
 0x221   : > { %3333 = vmatprep.mubr.bf16.mxu1 %v2127_v31  ;;  %vm2371_vm0 = vcmp.lt.s32.totalorder %v3943_v26, 7 }
 0x222   : > { %3334 = vmatmul.mubr.bf16.gmra.mrb[76].mxu1 %v2128_v30 }
 0x227   : > { %v3291_v32 = vpop.f32.mrb[80].mxu0 }
 0x228   : > { %v2035_v33 = vadd.f32 %v3291_v32, %v3909_v39  ;;  %v2026_v34 = vpop.f32.mrb[81].mxu0 }
 0x229   : > { %v2027_v35 = vadd.f32 %v3909_v39, %v2026_v34  ;;  %v3292_v36 = vpop.f32.mrb[82].mxu0 }
 0x22a   : > { %v2038_v37 = vadd.f32 %v3292_v36, %v3909_v39  ;;  %v2029_v38 = vpop.f32.mrb[83].mxu0  ;;  %v2107_v41 = vmax.f32 %v2035_v33, 0.0 }
 0x22b   : > { %v2030_v40 = vadd.f32 %v3909_v39, %v2029_v38  ;;  %v2105_v43 = vmax.f32 %v2027_v35, 0.0 }
 0x22c   : > { %v2108_v42 = vmax.f32 %v2038_v37, 0.0 }
 0x22d   : > { %v2106_v44 = vmax.f32 %v2030_v40, 0.0 }
 0x22e   : > { %v2130_v45 = vpack.c.bf16 %v2108_v42, %v2107_v41 }
 0x22f   : > { %v2129_v46 = vpack.c.bf16 %v2106_v44, %v2105_v43 }
 0x231   : > { %3337 = vmatprep.mubr.bf16.mxu1 %v2129_v46 }
 0x232   : > { %3338 = vmatmul.mubr.bf16.gmra.mrb[80].mxu1 %v2130_v45 }
 0x237   : > { %v3295_v55 = vpop.f32.mrb[84].mxu0 }
 0x238   : > { %v2051_v47 = vadd.f32 %v3295_v55, %v3909_v39  ;;  %v2042_v48 = vpop.f32.mrb[85].mxu0 }
 0x239   : > { %v2043_v49 = vadd.f32 %v3909_v39, %v2042_v48  ;;  %v3296_v50 = vpop.f32.mrb[86].mxu0 }
 0x23a   : > { %v2054_v51 = vadd.f32 %v3296_v50, %v3909_v39  ;;  %v2045_v52 = vpop.f32.mrb[87].mxu0  ;;  %v2111_v54 = vmax.f32 %v2051_v47, 0.0 }
 0x23b   : > { %v2046_v53 = vadd.f32 %v3909_v39, %v2045_v52  ;;  %v2109_v57 = vmax.f32 %v2043_v49, 0.0 }
 0x23c   : > { %v2112_v56 = vmax.f32 %v2054_v51, 0.0 }
 0x23d   : > { %v2110_v58 = vmax.f32 %v2046_v53, 0.0 }
 0x23e   : > { %v2132_v59 = vpack.c.bf16 %v2112_v56, %v2111_v54 }
 0x23f   : > { %v2131_v60 = vpack.c.bf16 %v2110_v58, %v2109_v57 }
 0x241   : > { %3341 = vmatprep.mubr.bf16.mxu1 %v2131_v60 }
 0x242   : > { %3342 = vmatmul.mubr.bf16.gmra.mrb[84].mxu1 %v2132_v59 }
 0x247   : > { %v3299_v61 = vpop.f32.mrb[88].mxu0 }
 0x248   : > { %v2067_v62 = vadd.f32 %v3299_v61, %v3909_v39  ;;  %v2058_v63 = vpop.f32.mrb[89].mxu0 }
 0x249   : > { %v2059_v0 = vadd.f32 %v3909_v39, %v2058_v63  ;;  %v3300_v1 = vpop.f32.mrb[90].mxu0 }
 0x24a   : > { %v2070_v2 = vadd.f32 %v3300_v1, %v3909_v39  ;;  %v2061_v3 = vpop.f32.mrb[91].mxu0  ;;  %v2115_v5 = vmax.f32 %v2067_v62, 0.0 }
 0x24b   : > { %v2062_v4 = vadd.f32 %v3909_v39, %v2061_v3  ;;  %v2113_v7 = vmax.f32 %v2059_v0, 0.0 }
 0x24c   : > { %v2116_v6 = vmax.f32 %v2070_v2, 0.0 }
 0x24d   : > { %v2114_v8 = vmax.f32 %v2062_v4, 0.0 }
 0x24e   : > { %v2134_v9 = vpack.c.bf16 %v2116_v6, %v2115_v5 }
 0x24f   : > { %v2133_v10 = vpack.c.bf16 %v2114_v8, %v2113_v7 }
 0x251   : > { %3345 = vmatprep.mubr.bf16.mxu1 %v2133_v10 }
 0x252   : > { %3346 = vmatmul.mubr.bf16.gmra.mrb[88].mxu1 %v2134_v9 }
 0x257   : > { %v3303_v11 = vpop.f32.mrb[92].mxu0 }
 0x258   : > { %v2083_v12 = vadd.f32 %v3303_v11, %v3909_v39  ;;  %v2074_v13 = vpop.f32.mrb[93].mxu0 }
 0x259   : > { %v2075_v14 = vadd.f32 %v3909_v39, %v2074_v13  ;;  %v3304_v15 = vpop.f32.mrb[94].mxu0 }
 0x25a   : > { %v2086_v16 = vadd.f32 %v3304_v15, %v3909_v39  ;;  %v2077_v17 = vpop.f32.mrb[95].mxu0  ;;  %v2119_v19 = vmax.f32 %v2083_v12, 0.0 }
 0x25b   : > { %v2078_v18 = vadd.f32 %v3909_v39, %v2077_v17  ;;  %v2117_v21 = vmax.f32 %v2075_v14, 0.0 }
 0x25c   : > { %v2120_v20 = vmax.f32 %v2086_v16, 0.0 }
 0x25d   : > { %v2118_v22 = vmax.f32 %v2078_v18, 0.0 }
 0x25e   : > { %v2136_v23 = vpack.c.bf16 %v2120_v20, %v2119_v19 }
 0x25f   : > { %v2135_v24 = vpack.c.bf16 %v2118_v22, %v2117_v21 }
 0x261   : > { %3349 = vmatprep.mubr.bf16.mxu1 %v2135_v24 }
 0x262   : > { %3350 = vmatmul.mubr.bf16.gmra.mrb[92].mxu1 %v2136_v23 }
 0x2c5   : > { %v3323_v28 = vpop.f32.mrb[64].mxu1 }
 0x2c6   : > { %v2251_v39 = vadd.f32 %v3323_v28, %v3948_v27  ;;  %v2242_v29 = vpop.f32.mrb[65].mxu1 }
 0x2c7   : > { %v3324_v30 = vpop.f32.mrb[66].mxu1  ;;  %v2243_v31 = vadd.f32 %v3948_v27, %v2242_v29 }
 0x2c8   : > { %v2245_v32 = vpop.f32.mrb[67].mxu1  ;;  %v3955_v33 = vsel %vm2371_vm0, %v2251_v39, -1e+30  ;;  %v2254_v36 = vadd.f32 %v3324_v30, %v3948_v27 }
 0x2c9   : > { %v2246_v34 = vadd.f32 %v3948_v27, %v2245_v32  ;;  %2408 = vmax.xlane.f32.xlu0 %v3955_v33  ;;  %v3967_v37 = vsel %vm2371_vm0, %v2243_v31, -1e+30 }
 0x2ca   : > { %v3972_v38 = vsel %vm2371_vm0, %v2254_v36, -1e+30 }
 0x2cb   : > { %v3961_v35 = vsel %vm2371_vm0, %v2246_v34, -1e+30 }
 0x2cc   : > { %2406 = vmax.xlane.f32.xlu1 %v3961_v35 }
 0x2cd   : > { %2404 = vmax.xlane.f32.xlu0 %v3967_v37 }
 0x2d1   : > { %2410 = vmax.xlane.f32.xlu0 %v3972_v38 }
 0x2d5   : > { %v3327_v40 = vpop.f32.mrb[68].mxu1 }
 0x2d6   : > { %v2267_v41 = vadd.f32 %v3327_v40, %v3948_v27  ;;  %v2258_v42 = vpop.f32.mrb[69].mxu1 }
 0x2d7   : > { %v3328_v43 = vpop.f32.mrb[70].mxu1  ;;  %v2259_v44 = vadd.f32 %v3948_v27, %v2258_v42 }
 0x2d8   : > { %v2270_v45 = vadd.f32 %v3328_v43, %v3948_v27  ;;  %v2261_v46 = vpop.f32.mrb[71].mxu1  ;;  %v3980_v55 = vsel %vm2371_vm0, %v2267_v41, -1e+30 }
 0x2d9   : > { %2416 = vmax.xlane.f32.xlu1 %v3980_v55  ;;  %v2262_v47 = vadd.f32 %v3948_v27, %v2261_v46  ;;  %v3991_v49 = vsel %vm2371_vm0, %v2259_v44, -1e+30 }
 0x2da   : > { %v3986_v48 = vsel %vm2371_vm0, %v2270_v45, -1e+30 }
 0x2db   : > { %2418 = vmax.xlane.f32.xlu0 %v3986_v48  ;;  %v3996_v50 = vsel %vm2371_vm0, %v2262_v47, -1e+30 }
 0x2dd   : > { %2412 = vmax.xlane.f32.xlu1 %v3991_v49 }
 0x2df   : > { %2414 = vmax.xlane.f32.xlu0 %v3996_v50 }
 0x2e5   : > { %v3331_v51 = vpop.f32.mrb[72].mxu1 }
 0x2e6   : > { %v2283_v52 = vadd.f32 %v3331_v51, %v3948_v27  ;;  %v2274_v53 = vpop.f32.mrb[73].mxu1 }
 0x2e7   : > { %v3332_v54 = vpop.f32.mrb[74].mxu1  ;;  %v2275_v56 = vadd.f32 %v3948_v27, %v2274_v53 }
 0x2e8   : > { %v2286_v57 = vadd.f32 %v3332_v54, %v3948_v27  ;;  %v2277_v58 = vpop.f32.mrb[75].mxu1  ;;  %v4004_v59 = vsel %vm2371_vm0, %v2283_v52, -1e+30 }
 0x2e9   : > { %2424 = vmax.xlane.f32.xlu1 %v4004_v59  ;;  %v2278_v60 = vadd.f32 %v3948_v27, %v2277_v58  ;;  %v4015_v62 = vsel %vm2371_vm0, %v2275_v56, -1e+30 }
 0x2ea   : > { %v4010_v61 = vsel %vm2371_vm0, %v2286_v57, -1e+30 }
 0x2eb   : > { %2426 = vmax.xlane.f32.xlu0 %v4010_v61  ;;  %v4020_v63 = vsel %vm2371_vm0, %v2278_v60, -1e+30 }
 0x2ed   : > { %2420 = vmax.xlane.f32.xlu1 %v4015_v62 }
 0x2ef   : > { %2422 = vmax.xlane.f32.xlu0 %v4020_v63 }
 0x2f5   : > { %v3335_v0 = vpop.f32.mrb[76].mxu1 }
 0x2f6   : > { %v2299_v1 = vadd.f32 %v3335_v0, %v3948_v27  ;;  %v2290_v2 = vpop.f32.mrb[77].mxu1 }
 0x2f7   : > { %v3336_v3 = vpop.f32.mrb[78].mxu1  ;;  %v2291_v4 = vadd.f32 %v3948_v27, %v2290_v2 }
 0x2f8   : > { %v2302_v5 = vadd.f32 %v3336_v3, %v3948_v27  ;;  %v2293_v6 = vpop.f32.mrb[79].mxu1  ;;  %v4028_v7 = vsel %vm2371_vm0, %v2299_v1, -1e+30 }
 0x2f9   : > { %2432 = vmax.xlane.f32.xlu1 %v4028_v7  ;;  %v2294_v8 = vadd.f32 %v3948_v27, %v2293_v6  ;;  %v4039_v10 = vsel %vm2371_vm0, %v2291_v4, -1e+30 }
 0x2fa   : > { %v4034_v9 = vsel %vm2371_vm0, %v2302_v5, -1e+30 }
 0x2fb   : > { %2434 = vmax.xlane.f32.xlu0 %v4034_v9  ;;  %v4044_v11 = vsel %vm2371_vm0, %v2294_v8, -1e+30 }
 0x2fd   : > { %2428 = vmax.xlane.f32.xlu1 %v4039_v10 }
 0x2ff   : > { %2430 = vmax.xlane.f32.xlu0 %v4044_v11 }
 0x305   : > { %v3339_v12 = vpop.f32.mrb[80].mxu1 }
 0x306   : > { %v2315_v13 = vadd.f32 %v3339_v12, %v3948_v27  ;;  %v2306_v14 = vpop.f32.mrb[81].mxu1 }
 0x307   : > { %v3340_v15 = vpop.f32.mrb[82].mxu1  ;;  %v2307_v16 = vadd.f32 %v3948_v27, %v2306_v14 }
 0x308   : > { %v2318_v17 = vadd.f32 %v3340_v15, %v3948_v27  ;;  %v2309_v18 = vpop.f32.mrb[83].mxu1  ;;  %v4052_v19 = vsel %vm2371_vm0, %v2315_v13, -1e+30 }
 0x309   : > { %2440 = vmax.xlane.f32.xlu1 %v4052_v19  ;;  %v2310_v20 = vadd.f32 %v3948_v27, %v2309_v18  ;;  %v4063_v22 = vsel %vm2371_vm0, %v2307_v16, -1e+30 }
 0x30a   : > { %v4058_v21 = vsel %vm2371_vm0, %v2318_v17, -1e+30 }
 0x30b   : > { %2442 = vmax.xlane.f32.xlu0 %v4058_v21  ;;  %v4068_v23 = vsel %vm2371_vm0, %v2310_v20, -1e+30 }
 0x30d   : > { %2436 = vmax.xlane.f32.xlu1 %v4063_v22 }
 0x30f   : > { %2438 = vmax.xlane.f32.xlu0 %v4068_v23 }
 0x315   : > { %v3343_v24 = vpop.f32.mrb[84].mxu1 }
 0x316   : > { %v2331_v25 = vadd.f32 %v3343_v24, %v3948_v27  ;;  %v2322_v28 = vpop.f32.mrb[85].mxu1 }
 0x317   : > { %v3344_v39 = vpop.f32.mrb[86].mxu1  ;;  %v2323_v29 = vadd.f32 %v3948_v27, %v2322_v28 }
 0x318   : > { %v2334_v30 = vadd.f32 %v3344_v39, %v3948_v27  ;;  %v2325_v31 = vpop.f32.mrb[87].mxu1  ;;  %v4076_v32 = vsel %vm2371_vm0, %v2331_v25, -1e+30 }
 0x319   : > { %2448 = vmax.xlane.f32.xlu1 %v4076_v32  ;;  %v2326_v34 = vadd.f32 %v3948_v27, %v2325_v31  ;;  %v4087_v40 = vsel %vm2371_vm0, %v2323_v29, -1e+30 }
 0x31a   : > { %v4082_v36 = vsel %vm2371_vm0, %v2334_v30, -1e+30 }
 0x31b   : > { %2450 = vmax.xlane.f32.xlu0 %v4082_v36  ;;  %v4092_v41 = vsel %vm2371_vm0, %v2326_v34, -1e+30 }
 0x31d   : > { %2444 = vmax.xlane.f32.xlu1 %v4087_v40 }
 0x31f   : > { %2446 = vmax.xlane.f32.xlu0 %v4092_v41 }
 0x325   : > { %v3347_v42 = vpop.f32.mrb[88].mxu1 }
 0x326   : > { %v2347_v43 = vadd.f32 %v3347_v42, %v3948_v27  ;;  %v2338_v44 = vpop.f32.mrb[89].mxu1 }
 0x327   : > { %v3348_v45 = vpop.f32.mrb[90].mxu1  ;;  %v2339_v46 = vadd.f32 %v3948_v27, %v2338_v44 }
 0x328   : > { %v2350_v47 = vadd.f32 %v3348_v45, %v3948_v27  ;;  %v2341_v51 = vpop.f32.mrb[91].mxu1  ;;  %v4100_v52 = vsel %vm2371_vm0, %v2347_v43, -1e+30 }
 0x329   : > { %2456 = vmax.xlane.f32.xlu1 %v4100_v52  ;;  %v2342_v53 = vadd.f32 %v3948_v27, %v2341_v51  ;;  %v4111_v56 = vsel %vm2371_vm0, %v2339_v46, -1e+30 }
 0x32a   : > { %v4106_v54 = vsel %vm2371_vm0, %v2350_v47, -1e+30 }
 0x32b   : > { %2458 = vmax.xlane.f32.xlu0 %v4106_v54  ;;  %v4116_v57 = vsel %vm2371_vm0, %v2342_v53, -1e+30 }
 0x32d   : > { %2452 = vmax.xlane.f32.xlu1 %v4111_v56 }
 0x32f   : > { %2454 = vmax.xlane.f32.xlu0 %v4116_v57 }
 0x335   : > { %v3351_v58 = vpop.f32.mrb[92].mxu1 }
 0x336   : > { %v2354_v60 = vpop.f32.mrb[93].mxu1  ;;  %v2363_v3 = vadd.f32 %v3351_v58, %v3948_v27 }
 0x337   : > { %v2355_v0 = vadd.f32 %v3948_v27, %v2354_v60  ;;  %v3352_v1 = vpop.f32.mrb[94].mxu1 }
 0x338   : > { %v2357_v2 = vpop.f32.mrb[95].mxu1  ;;  %v2366_v6 = vadd.f32 %v3352_v1, %v3948_v27  ;;  %v4135_v12 = vsel %vm2371_vm0, %v2363_v3, -1e+30 }
 0x339   : > { %v2358_v4 = vadd.f32 %v3948_v27, %v2357_v2  ;;  %v4124_v5 = vsel %vm2371_vm0, %v2355_v0, -1e+30 }
 0x33a   : > { %2460 = vmax.xlane.f32.xlu1 %v4124_v5  ;;  %v4140_v13 = vsel %vm2371_vm0, %v2366_v6, -1e+30 }
 0x33b   : > { %v4130_v8 = vsel %vm2371_vm0, %v2358_v4, -1e+30 }
 0x33c   : > { %2462 = vmax.xlane.f32.xlu0 %v4130_v8 }
 0x33e   : > { %2464 = vmax.xlane.f32.xlu1 %v4135_v12 }
 0x340   : > { %2466 = vmax.xlane.f32.xlu0 %v4140_v13 }
 0x356   : > { %v2409_v14 = vpop.xlane.xlu0 %2408 }
 0x357   : > { %v4144_v27 = vsub.f32 %v3955_v33, %v2409_v14 }
 0x359   : > { %v2504_v15 = vmul.f32 1.442695, %v4144_v27  ;;  %v2407_v18 = vpop.xlane.xlu1 %2406 }
 0x35a   : > { %v2405_v16 = vpop.xlane.xlu0 %2404  ;;  %v4152_v26 = vsub.f32 %v3961_v35, %v2407_v18 }
 0x35b   : > { %3428 = vpow2.f32 %v2504_v15  ;;  %v4148_v17 = vsub.f32 %v3967_v37, %v2405_v16 }
 0x35c   : > { %v2502_v28 = vmul.f32 1.442695, %v4152_v26 }
 0x35d   : > { %v2500_v20 = vmul.f32 1.442695, %v4148_v17 }
 0x35e   : > { %v2411_v24 = vpop.xlane.xlu0 %2410 }
 0x35f   : > { %3430 = vpow2.f32 %v2500_v20  ;;  %v4155_v25 = vsub.f32 %v3972_v38, %v2411_v24 }
 0x361   : > { %v2506_v33 = vmul.f32 1.442695, %v4155_v25 }
 0x363   : > { %3432 = vpow2.f32 %v2506_v33 }
 0x364   : > { %3434 = vpow2.f32 %v2502_v28 }
 0x365   : > { %v3429_v39 = vpop.eup %3428 }
 0x366   : > { %2568 = vadd.xlane.f32.xlu1 %v3429_v39  ;;  %v2417_v37 = vpop.xlane.xlu1 %2416 }
 0x367   : > { %v4160_v29 = vsub.f32 %v3980_v55, %v2417_v37 }
 0x368   : > { %v2419_v30 = vpop.xlane.xlu0 %2418 }
 0x369   : > { %v3431_v31 = vpop.eup %3430  ;;  %v2512_v35 = vmul.f32 1.442695, %v4160_v29  ;;  %v4164_v34 = vsub.f32 %v3986_v48, %v2419_v30 }
 0x36a   : > { %v2413_v38 = vpop.xlane.xlu1 %2412  ;;  %2564 = vadd.xlane.f32.xlu1 %v3431_v31 }
 0x36b   : > { %3436 = vpow2.f32 %v2512_v35  ;;  %v2514_v42 = vmul.f32 1.442695, %v4164_v34  ;;  %v4168_v43 = vsub.f32 %v3991_v49, %v2413_v38 }
 0x36c   : > { %v2415_v44 = vpop.xlane.xlu0 %2414 }
 0x36d   : > { %v3433_v45 = vpop.eup %3432  ;;  %3438 = vpow2.f32 %v2514_v42  ;;  %v2508_v55 = vmul.f32 1.442695, %v4168_v43  ;;  %v4172_v46 = vsub.f32 %v3996_v50, %v2415_v44 }
 0x36e   : > { %2570 = vadd.xlane.f32.xlu0 %v3433_v45  ;;  %v3435_v47 = vpop.eup %3434 }
 0x36f   : > { %3440 = vpow2.f32 %v2508_v55  ;;  %v2510_v48 = vmul.f32 1.442695, %v4172_v46 }
 0x371   : > { %3442 = vpow2.f32 %v2510_v48 }
 0x372   : > { %2566 = vadd.xlane.f32.xlu0 %v3435_v47 }
 0x375   : > { %v3437_v51 = vpop.eup %3436 }
 0x376   : > { %v2425_v53 = vpop.xlane.xlu1 %2424  ;;  %2576 = vadd.xlane.f32.xlu1 %v3437_v51 }
 0x377   : > { %v3439_v49 = vpop.eup %3438  ;;  %v4176_v58 = vsub.f32 %v4004_v59, %v2425_v53 }
 0x378   : > { %2578 = vadd.xlane.f32.xlu0 %v3439_v49  ;;  %v2427_v60 = vpop.xlane.xlu0 %2426 }
 0x379   : > { %v3441_v0 = vpop.eup %3440  ;;  %v2520_v50 = vmul.f32 1.442695, %v4176_v58  ;;  %v4180_v1 = vsub.f32 %v4010_v61, %v2427_v60 }
 0x37a   : > { %v2421_v2 = vpop.xlane.xlu1 %2420  ;;  %2572 = vadd.xlane.f32.xlu1 %v3441_v0 }
 0x37b   : > { %v3443_v3 = vpop.eup %3442  ;;  %3444 = vpow2.f32 %v2520_v50  ;;  %v2522_v4 = vmul.f32 1.442695, %v4180_v1  ;;  %v4184_v6 = vsub.f32 %v4015_v62, %v2421_v2 }
 0x37c   : > { %2574 = vadd.xlane.f32.xlu0 %v3443_v3  ;;  %v2423_v59 = vpop.xlane.xlu0 %2422 }
 0x37d   : > { %3446 = vpow2.f32 %v2522_v4  ;;  %v2516_v14 = vmul.f32 1.442695, %v4184_v6  ;;  %v4188_v15 = vsub.f32 %v4020_v63, %v2423_v59 }
 0x37f   : > { %3448 = vpow2.f32 %v2516_v14  ;;  %v2518_v61 = vmul.f32 1.442695, %v4188_v15 }
 0x381   : > { %3450 = vpow2.f32 %v2518_v61 }
 0x385   : > { %v3445_v16 = vpop.eup %3444 }
 0x386   : > { %v2433_v18 = vpop.xlane.xlu1 %2432  ;;  %2584 = vadd.xlane.f32.xlu1 %v3445_v16 }
 0x387   : > { %v3447_v20 = vpop.eup %3446  ;;  %v4192_v24 = vsub.f32 %v4028_v7, %v2433_v18 }
 0x388   : > { %2586 = vadd.xlane.f32.xlu0 %v3447_v20  ;;  %v2435_v62 = vpop.xlane.xlu0 %2434 }
 0x389   : > { %v3449_v33 = vpop.eup %3448  ;;  %v2528_v28 = vmul.f32 1.442695, %v4192_v24  ;;  %v4196_v39 = vsub.f32 %v4034_v9, %v2435_v62 }
 0x38a   : > { %v2429_v63 = vpop.xlane.xlu1 %2428  ;;  %2580 = vadd.xlane.f32.xlu1 %v3449_v33 }
 0x38b   : > { %v3451_v37 = vpop.eup %3450  ;;  %3452 = vpow2.f32 %v2528_v28  ;;  %v2530_v30 = vmul.f32 1.442695, %v4196_v39  ;;  %v4200_v31 = vsub.f32 %v4039_v10, %v2429_v63 }
 0x38c   : > { %2582 = vadd.xlane.f32.xlu0 %v3451_v37  ;;  %v2431_v7 = vpop.xlane.xlu0 %2430 }
 0x38d   : > { %3454 = vpow2.f32 %v2530_v30  ;;  %v2524_v35 = vmul.f32 1.442695, %v4200_v31  ;;  %v4204_v38 = vsub.f32 %v4044_v11, %v2431_v7 }
 0x38f   : > { %3456 = vpow2.f32 %v2524_v35  ;;  %v2526_v9 = vmul.f32 1.442695, %v4204_v38 }
 0x391   : > { %3458 = vpow2.f32 %v2526_v9 }
 0x395   : > { %v3453_v42 = vpop.eup %3452 }
 0x396   : > { %v2441_v44 = vpop.xlane.xlu1 %2440  ;;  %2592 = vadd.xlane.f32.xlu1 %v3453_v42 }
 0x397   : > { %v3455_v45 = vpop.eup %3454  ;;  %v4208_v55 = vsub.f32 %v4052_v19, %v2441_v44 }
 0x398   : > { %2594 = vadd.xlane.f32.xlu0 %v3455_v45  ;;  %v2443_v10 = vpop.xlane.xlu0 %2442 }
 0x399   : > { %v3457_v48 = vpop.eup %3456  ;;  %v2536_v47 = vmul.f32 1.442695, %v4208_v55  ;;  %v4212_v51 = vsub.f32 %v4058_v21, %v2443_v10 }
 0x39a   : > { %v2437_v11 = vpop.xlane.xlu1 %2436  ;;  %2588 = vadd.xlane.f32.xlu1 %v3457_v48 }
 0x39b   : > { %v3459_v53 = vpop.eup %3458  ;;  %3460 = vpow2.f32 %v2536_v47  ;;  %v2538_v49 = vmul.f32 1.442695, %v4212_v51  ;;  %v4216_v60 = vsub.f32 %v4063_v22, %v2437_v11 }
 0x39c   : > { %2590 = vadd.xlane.f32.xlu0 %v3459_v53  ;;  %v2439_v19 = vpop.xlane.xlu0 %2438 }
 0x39d   : > { %3462 = vpow2.f32 %v2538_v49  ;;  %v2532_v0 = vmul.f32 1.442695, %v4216_v60  ;;  %v4220_v50 = vsub.f32 %v4068_v23, %v2439_v19 }
 0x39f   : > { %3464 = vpow2.f32 %v2532_v0  ;;  %v2534_v21 = vmul.f32 1.442695, %v4220_v50 }
 0x3a1   : > { %3466 = vpow2.f32 %v2534_v21 }
 0x3a5   : > { %v3461_v2 = vpop.eup %3460 }
 0x3a6   : > { %v2449_v3 = vpop.xlane.xlu1 %2448  ;;  %2600 = vadd.xlane.f32.xlu1 %v3461_v2 }
 0x3a7   : > { %v3463_v4 = vpop.eup %3462  ;;  %v4224_v59 = vsub.f32 %v4076_v32, %v2449_v3 }
 0x3a8   : > { %2602 = vadd.xlane.f32.xlu0 %v3463_v4  ;;  %v2451_v22 = vpop.xlane.xlu0 %2450 }
 0x3a9   : > { %v3465_v14 = vpop.eup %3464  ;;  %v2544_v61 = vmul.f32 1.442695, %v4224_v59  ;;  %v4228_v16 = vsub.f32 %v4082_v36, %v2451_v22 }
 0x3aa   : > { %v2445_v23 = vpop.xlane.xlu1 %2444  ;;  %2596 = vadd.xlane.f32.xlu1 %v3465_v14 }
 0x3ab   : > { %v3467_v18 = vpop.eup %3466  ;;  %3468 = vpow2.f32 %v2544_v61  ;;  %v2546_v20 = vmul.f32 1.442695, %v4228_v16  ;;  %v4232_v62 = vsub.f32 %v4087_v40, %v2445_v23 }
 0x3ac   : > { %2598 = vadd.xlane.f32.xlu0 %v3467_v18  ;;  %v2447_v32 = vpop.xlane.xlu0 %2446 }
 0x3ad   : > { %3470 = vpow2.f32 %v2546_v20  ;;  %v2540_v33 = vmul.f32 1.442695, %v4232_v62  ;;  %v4236_v28 = vsub.f32 %v4092_v41, %v2447_v32 }
 0x3af   : > { %3472 = vpow2.f32 %v2540_v33  ;;  %v2542_v36 = vmul.f32 1.442695, %v4236_v28 }
 0x3b1   : > { %3474 = vpow2.f32 %v2542_v36 }
 0x3b5   : > { %v3469_v63 = vpop.eup %3468 }
 0x3b6   : > { %v2457_v37 = vpop.xlane.xlu1 %2456  ;;  %2608 = vadd.xlane.f32.xlu1 %v3469_v63 }
 0x3b7   : > { %v3471_v30 = vpop.eup %3470  ;;  %v4240_v7 = vsub.f32 %v4100_v52, %v2457_v37 }
 0x3b8   : > { %2610 = vadd.xlane.f32.xlu0 %v3471_v30  ;;  %v2459_v40 = vpop.xlane.xlu0 %2458 }
 0x3b9   : > { %v3473_v35 = vpop.eup %3472  ;;  %v2552_v9 = vmul.f32 1.442695, %v4240_v7  ;;  %v4244_v42 = vsub.f32 %v4106_v54, %v2459_v40 }
 0x3ba   : > { %v2453_v41 = vpop.xlane.xlu1 %2452  ;;  %2604 = vadd.xlane.f32.xlu1 %v3473_v35 }
 0x3bb   : > { %v3475_v44 = vpop.eup %3474  ;;  %3476 = vpow2.f32 %v2552_v9  ;;  %v2554_v45 = vmul.f32 1.442695, %v4244_v42  ;;  %v4248_v10 = vsub.f32 %v4111_v56, %v2453_v41 }
 0x3bc   : > { %2606 = vadd.xlane.f32.xlu0 %v3475_v44  ;;  %v2455_v52 = vpop.xlane.xlu0 %2454 }
 0x3bd   : > { %3478 = vpow2.f32 %v2554_v45  ;;  %v2548_v48 = vmul.f32 1.442695, %v4248_v10  ;;  %v4252_v47 = vsub.f32 %v4116_v57, %v2455_v52 }
 0x3bf   : > { %3480 = vpow2.f32 %v2548_v48  ;;  %v2550_v54 = vmul.f32 1.442695, %v4252_v47 }
 0x3c1   : > { %3482 = vpow2.f32 %v2550_v54 }
 0x3c5   : > { %v3477_v11 = vpop.eup %3476 }
 0x3c6   : > { %2616 = vadd.xlane.f32.xlu1 %v3477_v11 }
 0x3c7   : > { %v3479_v53 = vpop.eup %3478  ;;  %v2461_v49 = vpop.xlane.xlu1 %2460 }
 0x3c8   : > { %v4256_v19 = vsub.f32 %v4124_v5, %v2461_v49  ;;  %2618 = vadd.xlane.f32.xlu0 %v3479_v53 }
 0x3c9   : > { %v3481_v56 = vpop.eup %3480  ;;  %v2463_v0 = vpop.xlane.xlu0 %2462 }
 0x3ca   : > { %v2556_v21 = vmul.f32 1.442695, %v4256_v19  ;;  %v4260_v2 = vsub.f32 %v4130_v8, %v2463_v0  ;;  %2612 = vadd.xlane.f32.xlu1 %v3481_v56 }
 0x3cb   : > { %v3483_v57 = vpop.eup %3482  ;;  %v2465_v3 = vpop.xlane.xlu1 %2464 }
 0x3cc   : > { %3484 = vpow2.f32 %v2556_v21  ;;  %v2558_v4 = vmul.f32 1.442695, %v4260_v2  ;;  %v4264_v22 = vsub.f32 %v4135_v12, %v2465_v3  ;;  %2614 = vadd.xlane.f32.xlu0 %v3483_v57 }
 0x3cd   : > { %v2467_v5 = vpop.xlane.xlu0 %2466 }
 0x3ce   : > { %3486 = vpow2.f32 %v2558_v4  ;;  %v2560_v14 = vmul.f32 1.442695, %v4264_v22  ;;  %v4268_v61 = vsub.f32 %v4140_v13, %v2467_v5 }
 0x3d0   : > { %3488 = vpow2.f32 %v2560_v14  ;;  %v2562_v8 = vmul.f32 1.442695, %v4268_v61 }
 0x3d2   : > { %3490 = vpow2.f32 %v2562_v8 }
 0x3d6   : > { %v3485_v23 = vpop.eup %3484 }
 0x3d7   : > { %2620 = vadd.xlane.f32.xlu1 %v3485_v23 }
 0x3d8   : > { %v3487_v18 = vpop.eup %3486 }
 0x3d9   : > { %2622 = vadd.xlane.f32.xlu0 %v3487_v18 }
 0x3da   : > { %v3489_v20 = vpop.eup %3488 }
 0x3db   : > { %2624 = vadd.xlane.f32.xlu1 %v3489_v20 }
 0x3dc   : > { %v3491_v12 = vpop.eup %3490 }
 0x3dd   : > { %2626 = vadd.xlane.f32.xlu0 %v3491_v12 }
 0x3f3   : > { %v2569_v32 = vpop.xlane.xlu1 %2568 }
 0x3f4   : > { %3492 = vlog2.f32 %v2569_v32 }
 0x3f7   : > { %v2565_v33 = vpop.xlane.xlu1 %2564 }
 0x3f8   : > { %3494 = vlog2.f32 %v2565_v33 }
 0x3fb   : > { %v2571_v36 = vpop.xlane.xlu0 %2570 }
 0x3fc   : > { %3496 = vlog2.f32 %v2571_v36 }
 0x3fe   : > { %v3493_v13 = vpop.eup %3492 }
 0x3ff   : > { %v2633_v63 = vmul.f32 0.6931472, %v3493_v13  ;;  %v2567_v37 = vpop.xlane.xlu0 %2566 }
 0x400   : > { %3498 = vlog2.f32 %v2567_v37 }
 0x401   : > { %v2694_v30 = vsub.f32 %v4144_v27, %v2633_v63 }
 0x402   : > { %v3495_v40 = vpop.eup %3494 }
 0x403   : > { %2726 = vst [vmem:[%s4275_s13 + $0x10] sm:$0xff] %v2694_v30  ;;  %v2629_v35 = vmul.f32 0.6931472, %v3495_v40  ;;  %v2577_v9 = vpop.xlane.xlu1 %2576 }
 0x404   : > { %3500 = vlog2.f32 %v2577_v9 }
 0x405   : > { %v2692_v41 = vsub.f32 %v4148_v17, %v2629_v35  ;;  %v2579_v44 = vpop.xlane.xlu0 %2578 }
 0x406   : > { %v3497_v45 = vpop.eup %3496  ;;  %3502 = vlog2.f32 %v2579_v44 }
 0x407   : > { %2724 = vst [vmem:[%s4275_s13] sm:$0xff] %v2692_v41  ;;  %v2635_v52 = vmul.f32 0.6931472, %v3497_v45  ;;  %v2573_v48 = vpop.xlane.xlu1 %2572 }
 0x408   : > { %3504 = vlog2.f32 %v2573_v48 }
 0x409   : > { %v2695_v54 = vsub.f32 %v4155_v25, %v2635_v52  ;;  %v2575_v27 = vpop.xlane.xlu0 %2574 }
 0x40a   : > { %v3499_v11 = vpop.eup %3498  ;;  %3506 = vlog2.f32 %v2575_v27 }
 0x40b   : > { %2727 = vst [vmem:[%s4275_s13 + $0x18] sm:$0xff] %v2695_v54  ;;  %v2631_v53 = vmul.f32 0.6931472, %v3499_v11 }
 0x40d   : > { %v2693_v49 = vsub.f32 %v4152_v26, %v2631_v53 }
 0x40e   : > { %v3501_v17 = vpop.eup %3500 }
 0x40f   : > { %2725 = vst [vmem:[%s4275_s13 + $0x8] sm:$0xff] %v2693_v49  ;;  %v2641_v56 = vmul.f32 0.6931472, %v3501_v17 }
 0x410   : > { %v3503_v0 = vpop.eup %3502 }
 0x411   : > { %v2698_v21 = vsub.f32 %v4160_v29, %v2641_v56  ;;  %v2643_v57 = vmul.f32 0.6931472, %v3503_v0 }
 0x412   : > { %v3505_v3 = vpop.eup %3504 }
 0x413   : > { %2730 = vst [vmem:[%s4275_s13 + $0x30] sm:$0xff] %v2698_v21  ;;  %v2699_v25 = vsub.f32 %v4164_v34, %v2643_v57  ;;  %v2637_v4 = vmul.f32 0.6931472, %v3505_v3  ;;  %v2585_v5 = vpop.xlane.xlu1 %2584 }
 0x414   : > { %v3507_v14 = vpop.eup %3506  ;;  %3508 = vlog2.f32 %v2585_v5 }
 0x415   : > { %2731 = vst [vmem:[%s4275_s13 + $0x38] sm:$0xff] %v2699_v25  ;;  %v2696_v26 = vsub.f32 %v4168_v43, %v2637_v4  ;;  %v2639_v8 = vmul.f32 0.6931472, %v3507_v14  ;;  %v2587_v23 = vpop.xlane.xlu0 %2586 }
 0x416   : > { %3510 = vlog2.f32 %v2587_v23 }
 0x417   : > { %2728 = vst [vmem:[%s4275_s13 + $0x20] sm:$0xff] %v2696_v26  ;;  %v2697_v29 = vsub.f32 %v4172_v46, %v2639_v8  ;;  %v2581_v18 = vpop.xlane.xlu1 %2580 }
 0x418   : > { %3512 = vlog2.f32 %v2581_v18 }
 0x419   : > { %2729 = vst [vmem:[%s4275_s13 + $0x28] sm:$0xff] %v2697_v29  ;;  %v2583_v20 = vpop.xlane.xlu0 %2582 }
 0x41a   : > { %3514 = vlog2.f32 %v2583_v20 }
 0x41e   : > { %v3509_v34 = vpop.eup %3508 }
 0x41f   : > { %v2649_v12 = vmul.f32 0.6931472, %v3509_v34 }
 0x420   : > { %v3511_v32 = vpop.eup %3510 }
 0x421   : > { %v2702_v33 = vsub.f32 %v4176_v58, %v2649_v12  ;;  %v2651_v43 = vmul.f32 0.6931472, %v3511_v32 }
 0x422   : > { %v3513_v36 = vpop.eup %3512 }
 0x423   : > { %2734 = vst [vmem:[%s4275_s13 + $0x50] sm:$0xff] %v2702_v33  ;;  %v2703_v13 = vsub.f32 %v4180_v1, %v2651_v43  ;;  %v2645_v63 = vmul.f32 0.6931472, %v3513_v36  ;;  %v2593_v46 = vpop.xlane.xlu1 %2592 }
 0x424   : > { %v3515_v37 = vpop.eup %3514  ;;  %3516 = vlog2.f32 %v2593_v46 }
 0x425   : > { %2735 = vst [vmem:[%s4275_s13 + $0x58] sm:$0xff] %v2703_v13  ;;  %v2700_v30 = vsub.f32 %v4184_v6, %v2645_v63  ;;  %v2647_v40 = vmul.f32 0.6931472, %v3515_v37  ;;  %v2595_v35 = vpop.xlane.xlu0 %2594 }
 0x426   : > { %3518 = vlog2.f32 %v2595_v35 }
 0x427   : > { %2732 = vst [vmem:[%s4275_s13 + $0x40] sm:$0xff] %v2700_v30  ;;  %v2701_v58 = vsub.f32 %v4188_v15, %v2647_v40  ;;  %v2589_v9 = vpop.xlane.xlu1 %2588 }
 0x428   : > { %3520 = vlog2.f32 %v2589_v9 }
 0x429   : > { %2733 = vst [vmem:[%s4275_s13 + $0x48] sm:$0xff] %v2701_v58  ;;  %v2591_v41 = vpop.xlane.xlu0 %2590 }
 0x42a   : > { %3522 = vlog2.f32 %v2591_v41 }
 0x42e   : > { %v3517_v1 = vpop.eup %3516 }
 0x42f   : > { %v2657_v44 = vmul.f32 0.6931472, %v3517_v1 }
 0x430   : > { %v3519_v45 = vpop.eup %3518 }
 0x431   : > { %v2706_v52 = vsub.f32 %v4192_v24, %v2657_v44  ;;  %v2659_v6 = vmul.f32 0.6931472, %v3519_v45 }
 0x432   : > { %v3521_v48 = vpop.eup %3520 }
 0x433   : > { %2738 = vst [vmem:[%s4275_s13 + $0x70] sm:$0xff] %v2706_v52  ;;  %v2707_v54 = vsub.f32 %v4196_v39, %v2659_v6  ;;  %v2653_v27 = vmul.f32 0.6931472, %v3521_v48  ;;  %v2601_v15 = vpop.xlane.xlu1 %2600 }
 0x434   : > { %v3523_v11 = vpop.eup %3522  ;;  %3524 = vlog2.f32 %v2601_v15 }
 0x435   : > { %2739 = vst [vmem:[%s4275_s13 + $0x78] sm:$0xff] %v2707_v54  ;;  %v2704_v53 = vsub.f32 %v4200_v31, %v2653_v27  ;;  %v2655_v49 = vmul.f32 0.6931472, %v3523_v11  ;;  %v2603_v17 = vpop.xlane.xlu0 %2602 }
 0x436   : > { %3526 = vlog2.f32 %v2603_v17 }
 0x437   : > { %2736 = vst [vmem:[%s4275_s13 + $0x60] sm:$0xff] %v2704_v53  ;;  %v2705_v24 = vsub.f32 %v4204_v38, %v2655_v49  ;;  %v2597_v56 = vpop.xlane.xlu1 %2596 }
 0x438   : > { %3528 = vlog2.f32 %v2597_v56 }
 0x439   : > { %2737 = vst [vmem:[%s4275_s13 + $0x68] sm:$0xff] %v2705_v24  ;;  %v2599_v0 = vpop.xlane.xlu0 %2598 }
 0x43a   : > { %3530 = vlog2.f32 %v2599_v0 }
 0x43e   : > { %v3525_v39 = vpop.eup %3524 }
 0x43f   : > { %v2665_v21 = vmul.f32 0.6931472, %v3525_v39 }
 0x440   : > { %v3527_v57 = vpop.eup %3526 }
 0x441   : > { %v2710_v3 = vsub.f32 %v4208_v55, %v2665_v21  ;;  %v2667_v31 = vmul.f32 0.6931472, %v3527_v57 }
 0x442   : > { %v3529_v25 = vpop.eup %3528 }
 0x443   : > { %2742 = vst [vmem:[%s4275_s13 + $0x90] sm:$0xff] %v2710_v3  ;;  %v2711_v4 = vsub.f32 %v4212_v51, %v2667_v31  ;;  %v2661_v5 = vmul.f32 0.6931472, %v3529_v25  ;;  %v2609_v38 = vpop.xlane.xlu1 %2608 }
 0x444   : > { %v3531_v14 = vpop.eup %3530  ;;  %3532 = vlog2.f32 %v2609_v38 }
 0x445   : > { %2743 = vst [vmem:[%s4275_s13 + $0x98] sm:$0xff] %v2711_v4  ;;  %v2708_v26 = vsub.f32 %v4216_v60, %v2661_v5  ;;  %v2663_v8 = vmul.f32 0.6931472, %v3531_v14  ;;  %v2611_v23 = vpop.xlane.xlu0 %2610 }
 0x446   : > { %3534 = vlog2.f32 %v2611_v23 }
 0x447   : > { %2740 = vst [vmem:[%s4275_s13 + $0x80] sm:$0xff] %v2708_v26  ;;  %v2709_v55 = vsub.f32 %v4220_v50, %v2663_v8  ;;  %v2605_v29 = vpop.xlane.xlu1 %2604 }
 0x448   : > { %3536 = vlog2.f32 %v2605_v29 }
 0x449   : > { %2741 = vst [vmem:[%s4275_s13 + $0x88] sm:$0xff] %v2709_v55  ;;  %v2607_v18 = vpop.xlane.xlu0 %2606 }
 0x44a   : > { %3538 = vlog2.f32 %v2607_v18 }
 0x44e   : > { %v3533_v51 = vpop.eup %3532 }
 0x44f   : > { %v2673_v20 = vmul.f32 0.6931472, %v3533_v51 }
 0x450   : > { %v3535_v34 = vpop.eup %3534 }
 0x451   : > { %v2714_v12 = vsub.f32 %v4224_v59, %v2673_v20  ;;  %v2675_v60 = vmul.f32 0.6931472, %v3535_v34 }
 0x452   : > { %v3537_v32 = vpop.eup %3536 }
 0x453   : > { %2746 = vst [vmem:[%s4275_s13 + $0xb0] sm:$0xff] %v2714_v12  ;;  %v2715_v33 = vsub.f32 %v4228_v16, %v2675_v60  ;;  %v2669_v43 = vmul.f32 0.6931472, %v3537_v32  ;;  %v2617_v50 = vpop.xlane.xlu1 %2616 }
 0x454   : > { %v3539_v36 = vpop.eup %3538  ;;  %3540 = vlog2.f32 %v2617_v50 }
 0x455   : > { %2747 = vst [vmem:[%s4275_s13 + $0xb8] sm:$0xff] %v2715_v33  ;;  %v2712_v13 = vsub.f32 %v4232_v62, %v2669_v43  ;;  %v2671_v63 = vmul.f32 0.6931472, %v3539_v36  ;;  %v2619_v46 = vpop.xlane.xlu0 %2618 }
 0x456   : > { %3542 = vlog2.f32 %v2619_v46 }
 0x457   : > { %2744 = vst [vmem:[%s4275_s13 + $0xa0] sm:$0xff] %v2712_v13  ;;  %v2713_v59 = vsub.f32 %v4236_v28, %v2671_v63  ;;  %v2613_v37 = vpop.xlane.xlu1 %2612 }
 0x458   : > { %3544 = vlog2.f32 %v2613_v37 }
 0x459   : > { %2745 = vst [vmem:[%s4275_s13 + $0xa8] sm:$0xff] %v2713_v59  ;;  %v2615_v30 = vpop.xlane.xlu0 %2614 }
 0x45a   : > { %3546 = vlog2.f32 %v2615_v30 }
 0x45e   : > { %v3541_v16 = vpop.eup %3540 }
 0x45f   : > { %v2681_v40 = vmul.f32 0.6931472, %v3541_v16 }
 0x460   : > { %v3543_v35 = vpop.eup %3542 }
 0x461   : > { %v2718_v58 = vsub.f32 %v4240_v7, %v2681_v40  ;;  %v2683_v62 = vmul.f32 0.6931472, %v3543_v35 }
 0x462   : > { %v3545_v9 = vpop.eup %3544 }
 0x463   : > { %2750 = vst [vmem:[%s4275_s13 + $0xd0] sm:$0xff] %v2718_v58  ;;  %v2719_v41 = vsub.f32 %v4244_v42, %v2683_v62  ;;  %v2677_v1 = vmul.f32 0.6931472, %v3545_v9 }
 0x464   : > { %v3547_v28 = vpop.eup %3546  ;;  %v2621_v44 = vpop.xlane.xlu1 %2620 }
 0x465   : > { %2751 = vst [vmem:[%s4275_s13 + $0xd8] sm:$0xff] %v2719_v41  ;;  %v2716_v45 = vsub.f32 %v4248_v10, %v2677_v1  ;;  %v2679_v52 = vmul.f32 0.6931472, %v3547_v28  ;;  %3548 = vlog2.f32 %v2621_v44 }
 0x466   : > { %v2623_v6 = vpop.xlane.xlu0 %2622 }
 0x467   : > { %2748 = vst [vmem:[%s4275_s13 + $0xc0] sm:$0xff] %v2716_v45  ;;  %v2717_v48 = vsub.f32 %v4252_v47, %v2679_v52  ;;  %3550 = vlog2.f32 %v2623_v6 }
 0x468   : > { %v2625_v7 = vpop.xlane.xlu1 %2624 }
 0x469   : > { %2749 = vst [vmem:[%s4275_s13 + $0xc8] sm:$0xff] %v2717_v48  ;;  %3552 = vlog2.f32 %v2625_v7 }
 0x46a   : > { %v2627_v42 = vpop.xlane.xlu0 %2626 }
 0x46b   : > { %3554 = vlog2.f32 %v2627_v42 }
 0x46f   : > { %v3549_v54 = vpop.eup %3548 }
 0x470   : > { %v2685_v27 = vmul.f32 0.6931472, %v3549_v54 }
 0x471   : > { %v3551_v15 = vpop.eup %3550 }
 0x472   : > { %v2720_v10 = vsub.f32 %v4256_v19, %v2685_v27  ;;  %v2687_v11 = vmul.f32 0.6931472, %v3551_v15 }
 0x473   : > { %v3553_v53 = vpop.eup %3552 }
 0x474   : > { %2752 = vst [vmem:[%s4275_s13 + $0xe0] sm:$0xff] %v2720_v10  ;;  %v2721_v49 = vsub.f32 %v4260_v2, %v2687_v11  ;;  %v2689_v47 = vmul.f32 0.6931472, %v3553_v53 }
 0x475   : > { %v3555_v17 = vpop.eup %3554 }
 0x476   : > { %2753 = vst [vmem:[%s4275_s13 + $0xe8] sm:$0xff] %v2721_v49  ;;  %v2722_v24 = vsub.f32 %v4264_v22, %v2689_v47  ;;  %v2691_v56 = vmul.f32 0.6931472, %v3555_v17 }
 0x478   : > { %2754 = vst [vmem:[%s4275_s13 + $0xf0] sm:$0xff] %v2722_v24  ;;  %v2723_v0 = vsub.f32 %v4268_v61, %v2691_v56 }
 0x47a   : > { %2755 = vst [vmem:[%s4275_s13 + $0xf8] sm:$0xff] %v2723_v0 }
 0x47b PF: > { %s18_s29 = sadd.s32 1, %s3578_s29   ;;  %s4359_s27 = smov %s3574_s28 }
 0x47c   : > { %p15_p5 = scmp.ge.s32.totalorder %s18_s29, 4   ;;  %s4360_s28 = smov %s4362_s30 }
 0x47e   :  { %17 = sbr.rel (!%p15_p5) target bundleno = 2 (0x2), region = 96 }

</bundles_post_ra>
